<compile_context>
chip_gen: v7x
topology: tpu7x:2x2x1
jax: 0.10.0
libtpu: 0.0.40
codegen_flags: <defaults>
</compile_context>

<pallas_src>
import functools
import jax
import jax.numpy as jnp
from jax.experimental import pallas as pl
from jax.experimental.pallas import tpu as pltpu

MXU_DTYPE = jnp.bfloat16   # MXU operand dtype (accumulation is always f32)


# ----------------------------------------------------------------------------
# Fused decoder-stack Pallas kernel (grid = (batch, layer))
# ----------------------------------------------------------------------------

def _decoder_stack_kernel(*refs, nhead, eps, has_tgt_mask, has_mem_mask,
                          has_final_norm):
    it = iter(refs)
    x_ref = next(it)                                    # (1, T, E) f32
    mem_ref = next(it)                                  # (1, S, E) f32
    tmask_ref = next(it) if has_tgt_mask else None      # (T, T) additive, f32
    mmask_ref = next(it) if has_mem_mask else None      # (T, S) additive, f32
    # self-attention projections (Q scale pre-folded into wq/bq)
    wq_s = next(it); wk_s = next(it); wv_s = next(it)   # (E, E) bf16
    bq_s = next(it); bk_s = next(it); bv_s = next(it)   # (1, E) f32
    wo_s = next(it); bo_s = next(it)                    # (H, Dh, E) bf16, (1, E) f32
    # cross-attention projections
    wq_c = next(it); wk_c = next(it); wv_c = next(it)
    bq_c = next(it); bk_c = next(it); bv_c = next(it)
    wo_c = next(it); bo_c = next(it)
    # feed-forward
    w1 = next(it); b1 = next(it)                        # (E, F) bf16, (1, F) f32
    w2 = next(it); b2 = next(it)                        # (F, E) bf16, (1, E) f32
    # layer norms
    g1 = next(it); be1 = next(it)
    g2 = next(it); be2 = next(it)
    g3 = next(it); be3 = next(it)
    if has_final_norm:
        gn = next(it); bn = next(it)
    out_ref = next(it)                                  # (1, T, E) f32 (state carry)
    attn_ref = next(it)                                 # (1, T, S) f32
    kc_scr = next(it)                                   # (S, E) f32 scratch
    vc_scr = next(it)                                   # (S, E) f32 scratch

    T, E = x_ref.shape[1], x_ref.shape[2]
    S = mem_ref.shape[1]
    Dh = E // nhead
    layer = pl.program_id(1)
    n_layers = pl.num_programs(1)

    def ln(y, g, bb):
        mu = jnp.mean(y, axis=-1, keepdims=True)
        yc = y - mu
        var = jnp.mean(yc * yc, axis=-1, keepdims=True)
        return yc * jax.lax.rsqrt(var + eps) * g[...] + bb[...]

    def split_heads(t):                                 # (N, E) f32 -> (N, H, Dh)
        return t.reshape(t.shape[0], nhead, Dh)

    def attention(q, k, v, mask_ref, wo3, bo):
        # q: (Tq, E) f32 (scale already folded in), k/v: (Tk, E) f32
        qh = split_heads(q).astype(MXU_DTYPE)           # (Tq, H, Dh)
        kh = split_heads(k).astype(MXU_DTYPE)            # (Tk, H, Dh)
        vh = split_heads(v).astype(MXU_DTYPE)            # (Tk, H, Dh)
        # scores (H, Tq, Tk): one batched-over-heads contraction
        s = jnp.einsum('qhd,khd->hqk', qh, kh,
                       preferred_element_type=jnp.float32)
        if mask_ref is not None:
            s = s + mask_ref[...][None, :, :]
        m = jnp.max(s, axis=-1, keepdims=True)
        p = jnp.exp(s - m)
        p = p * pl.reciprocal(jnp.sum(p, axis=-1, keepdims=True), approx=True)
        # context (H, Tq, Dh)
        ctx = jnp.einsum('hqk,khd->hqd', p.astype(MXU_DTYPE), vh,
                         preferred_element_type=jnp.float32)
        # out-projection: batched per-head dot + head-sum (no concat/transpose)
        per_head = jnp.einsum('hqd,hde->hqe', ctx.astype(MXU_DTYPE), wo3[...],
                              preferred_element_type=jnp.float32)
        proj = jnp.sum(per_head, axis=0) + bo[...]       # (Tq, E) f32
        avg_w = jnp.sum(p, axis=0) * (1.0 / nhead)       # (Tq, Tk) f32
        return proj, avg_w

    # Layer 0 of each batch block: load the input state into the resident output
    # block and compute the layer-invariant cross-attn K/V of `memory` once.
    @pl.when(layer == 0)
    def _():
        out_ref[0] = x_ref[0]
        mem = mem_ref[0].astype(MXU_DTYPE)
        kc = jnp.dot(mem, wk_c[...], preferred_element_type=jnp.float32) + bk_c[...]
        vc = jnp.dot(mem, wv_c[...], preferred_element_type=jnp.float32) + bv_c[...]
        kc_scr[...] = kc
        vc_scr[...] = vc

    x = out_ref[0].astype(jnp.float32)                   # (T, E) carried state
    xb = x.astype(MXU_DTYPE)

    # --- self-attention block (post-norm) ---
    q_s = jnp.dot(xb, wq_s[...], preferred_element_type=jnp.float32) + bq_s[...]
    k_s = jnp.dot(xb, wk_s[...], preferred_element_type=jnp.float32) + bk_s[...]
    v_s = jnp.dot(xb, wv_s[...], preferred_element_type=jnp.float32) + bv_s[...]
    sa, _ = attention(q_s, k_s, v_s, tmask_ref, wo_s, bo_s)
    x1 = ln(x + sa, g1, be1)

    # --- cross-attention block (K/V reused from scratch across layers) ---
    q_c = jnp.dot(x1.astype(MXU_DTYPE), wq_c[...],
                  preferred_element_type=jnp.float32) + bq_c[...]
    ca, avg_w = attention(q_c, kc_scr[...], vc_scr[...], mmask_ref, wo_c, bo_c)
    x2 = ln(x1 + ca, g2, be2)

    # --- feed-forward block (linear1 + ReLU + linear2, hidden kept on-chip) ---
    h = jnp.maximum(
        jnp.dot(x2.astype(MXU_DTYPE), w1[...],
                preferred_element_type=jnp.float32) + b1[...], 0.0)
    f = jnp.dot(h.astype(MXU_DTYPE), w2[...],
                preferred_element_type=jnp.float32) + b2[...]
    x3 = ln(x2 + f, g3, be3)

    out_ref[0] = x3.astype(out_ref.dtype)
    attn_ref[0] = avg_w.astype(attn_ref.dtype)

    if has_final_norm:
        @pl.when(layer == n_layers - 1)
        def _():
            out_ref[0] = ln(x3, gn, bn).astype(out_ref.dtype)


_WEIGHT_ORDER = ("wq_s", "wk_s", "wv_s", "bq_s", "bk_s", "bv_s", "wo_s", "bo_s",
                 "wq_c", "wk_c", "wv_c", "bq_c", "bk_c", "bv_c", "wo_c", "bo_c",
                 "w1", "b1", "w2", "b2",
                 "g1", "be1", "g2", "be2", "g3", "be3")


def decoder_stack(x_bt, mem_bs, pp, nhead, num_layers, tgt_mask=None,
                  memory_mask=None, final_norm=None):
    """Whole decoder stack in one pallas_call. x_bt: (B,T,E), mem_bs: (B,S,E)."""
    B, T, E = x_bt.shape
    S = mem_bs.shape[1]
    has_tm = tgt_mask is not None
    has_mm = memory_mask is not None
    has_fn = final_norm is not None

    inputs = [x_bt, mem_bs]
    in_specs = [pl.BlockSpec((1, T, E), lambda b, l: (b, 0, 0)),
                pl.BlockSpec((1, S, E), lambda b, l: (b, 0, 0))]
    if has_tm:
        inputs.append(tgt_mask.astype(jnp.float32))
        in_specs.append(pl.BlockSpec((T, T), lambda b, l: (0, 0)))
    if has_mm:
        inputs.append(memory_mask.astype(jnp.float32))
        in_specs.append(pl.BlockSpec((T, S), lambda b, l: (0, 0)))

    weights = [pp[k] for k in _WEIGHT_ORDER]
    if has_fn:
        weights += [final_norm["g"].reshape(1, E).astype(jnp.float32),
                    final_norm["b"].reshape(1, E).astype(jnp.float32)]
    for w in weights:
        inputs.append(w)
        # Constant index_map -> weight blocks are DMA'd once and stay resident.
        in_specs.append(pl.BlockSpec(w.shape, lambda b, l, nd=w.ndim: (0,) * nd))

    kernel = functools.partial(_decoder_stack_kernel, nhead=nhead, eps=1e-5,
                               has_tgt_mask=has_tm, has_mem_mask=has_mm,
                               has_final_norm=has_fn)
    out, attn = pl.pallas_call(
        kernel,
        out_shape=(jax.ShapeDtypeStruct((B, T, E), x_bt.dtype),
                   jax.ShapeDtypeStruct((B, T, S), jnp.float32)),
        grid=(B, num_layers),
        in_specs=in_specs,
        out_specs=(pl.BlockSpec((1, T, E), lambda b, l: (b, 0, 0)),
                   pl.BlockSpec((1, T, S), lambda b, l: (b, 0, 0))),
        scratch_shapes=[pltpu.VMEM((S, E), jnp.float32),   # cross-attn K (per batch)
                        pltpu.VMEM((S, E), jnp.float32)],  # cross-attn V (per batch)
        compiler_params=pltpu.CompilerParams(
            dimension_semantics=("parallel", "arbitrary")),
    )(*inputs)
    return out, attn


# ----------------------------------------------------------------------------
# Parameter preparation (hoisted out of the hot path: transposes / splits /
# scale folding / bf16 casts done once on the host)
# ----------------------------------------------------------------------------

def prepare_layer_params(p, nhead):
    E = p["norm1_g"].shape[0]
    Dh = E // nhead
    scale = 1.0 / (Dh ** 0.5)
    sa, ca = p["self_attn"], p["cross_attn"]
    mx, f32 = MXU_DTYPE, jnp.float32
    row = lambda v: v.reshape(1, -1).astype(f32)

    def in_proj_parts(mha):
        W, b = mha["in_proj_weight"], mha["in_proj_bias"]     # (3E, E), (3E,)
        wq, wk, wv = W[:E].T, W[E:2 * E].T, W[2 * E:].T        # x @ w layout
        bq, bk, bv = b[:E], b[E:2 * E], b[2 * E:]
        # fold 1/sqrt(Dh) into the Q projection (weight AND bias)
        return (wq * scale).astype(mx), wk.astype(mx), wv.astype(mx), \
               row(bq * scale), row(bk), row(bv)

    def out_proj3(mha):
        # (E_in, E_out) -> (H, Dh, E_out): enables batched per-head out-proj
        return mha["out_proj_weight"].T.reshape(nhead, Dh, E).astype(mx)

    wq_s, wk_s, wv_s, bq_s, bk_s, bv_s = in_proj_parts(sa)
    wq_c, wk_c, wv_c, bq_c, bk_c, bv_c = in_proj_parts(ca)
    return {
        "wq_s": wq_s, "wk_s": wk_s, "wv_s": wv_s,
        "bq_s": bq_s, "bk_s": bk_s, "bv_s": bv_s,
        "wo_s": out_proj3(sa), "bo_s": row(sa["out_proj_bias"]),
        "wq_c": wq_c, "wk_c": wk_c, "wv_c": wv_c,
        "bq_c": bq_c, "bk_c": bk_c, "bv_c": bv_c,
        "wo_c": out_proj3(ca), "bo_c": row(ca["out_proj_bias"]),
        "w1": p["linear1_w"].T.astype(mx), "b1": row(p["linear1_b"]),
        "w2": p["linear2_w"].T.astype(mx), "b2": row(p["linear2_b"]),
        "g1": row(p["norm1_g"]), "be1": row(p["norm1_b"]),
        "g2": row(p["norm2_g"]), "be2": row(p["norm2_b"]),
        "g3": row(p["norm3_g"]), "be3": row(p["norm3_b"]),
    }


# ----------------------------------------------------------------------------
# BaseDecoder forward
# ----------------------------------------------------------------------------

def base_decoder(tgt, memory, tgt_mask, layer_params, num_layers, norm_params,
                 nhead, memory_mask=None, tgt_key_padding_mask=None,
                 memory_key_padding_mask=None, g_encoder=None):
    # TODO(synk): key-padding masks and g_encoder are accepted for API parity but
    # unused (None in this setup; g_encoder has no defined semantics here).
    T, B, E = tgt.shape
    pp = prepare_layer_params(layer_params, nhead)      # once, host-side
    x = tgt.transpose(1, 0, 2)                          # (B, T, E) batch-major
    mem = memory.transpose(1, 0, 2)                     # (B, S, E)
    out, attn_weights = decoder_stack(x, mem, pp, nhead, num_layers,
                                      tgt_mask=tgt_mask, memory_mask=memory_mask,
                                      final_norm=norm_params)
    output = out.transpose(1, 0, 2)                     # back to (seq, batch, E)
    return output, attn_weights


# ----------------------------------------------------------------------------
# Deterministic parameter init (PyTorch-style layout; shared across layers,
# matching _get_clones(deepcopy) at init)
# ----------------------------------------------------------------------------

def init_params(key, d_model, nhead, dim_ff):
    ks = jax.random.split(key, 8)
    scale = 0.1

    def mha_params(k1, k2):
        return {
            "in_proj_weight": scale * jax.random.normal(k1, (3 * d_model, d_model), jnp.float32),
            "in_proj_bias": jnp.zeros((3 * d_model,), jnp.float32),
            "out_proj_weight": scale * jax.random.normal(k2, (d_model, d_model), jnp.float32),
            "out_proj_bias": jnp.zeros((d_model,), jnp.float32),
        }

    layer = {
        "self_attn": mha_params(ks[0], ks[1]),
        "cross_attn": mha_params(ks[2], ks[3]),
        "linear1_w": scale * jax.random.normal(ks[4], (dim_ff, d_model), jnp.float32),
        "linear1_b": jnp.zeros((dim_ff,), jnp.float32),
        "linear2_w": scale * jax.random.normal(ks[5], (d_model, dim_ff), jnp.float32),
        "linear2_b": jnp.zeros((d_model,), jnp.float32),
        "norm1_g": jnp.ones((d_model,), jnp.float32),
        "norm1_b": jnp.zeros((d_model,), jnp.float32),
        "norm2_g": jnp.ones((d_model,), jnp.float32),
        "norm2_b": jnp.zeros((d_model,), jnp.float32),
        "norm3_g": jnp.ones((d_model,), jnp.float32),
        "norm3_b": jnp.zeros((d_model,), jnp.float32),
    }
    final_norm = {"g": jnp.ones((d_model,), jnp.float32),
                  "b": jnp.zeros((d_model,), jnp.float32)}
    data_keys = ks[6], ks[7]
    return layer, final_norm, data_keys


# ----------------------------------------------------------------------------
# Main
# ----------------------------------------------------------------------------

if __name__ == "__main__":
    T, S, B = 8, 16, 2          # tgt seq, memory seq, batch
    d_model, nhead, dim_ff = 32, 4, 64
    num_layers = 2

    key = jax.random.PRNGKey(0)
    layer_params, norm_params, (k_tgt, k_mem) = init_params(key, d_model, nhead, dim_ff)

    tgt = jax.random.normal(k_tgt, (T, B, d_model), jnp.float32)
    memory = jax.random.normal(k_mem, (S, B, d_model), jnp.float32)

    # causal additive tgt_mask (like nn.Transformer.generate_square_subsequent_mask)
    causal = jnp.triu(jnp.ones((T, T), jnp.float32), k=1)
    tgt_mask = jnp.where(causal > 0, -1e30, 0.0).astype(jnp.float32)

    out, attn_w = base_decoder(tgt, memory, tgt_mask, layer_params, num_layers,
                               norm_params, nhead)
    out = jax.block_until_ready(out)
    attn_w = jax.block_until_ready(attn_w)

    assert out.shape == (T, B, d_model)
    assert attn_w.shape == (B, T, S)
    assert bool(jnp.all(jnp.isfinite(out))) and bool(jnp.all(jnp.isfinite(attn_w)))
    print("KERNEL_OK")
</pallas_src>

<mosaic_0001>
module attributes {stable_mosaic.version = 11 : i64} {
  func.func @_decoder_stack_kernel(%arg0: i32, %arg1: i32, %arg2: memref<1x8x32xf32, #tpu.memory_space<vmem>>, %arg3: memref<1x16x32xf32, #tpu.memory_space<vmem>>, %arg4: memref<8x8xf32, #tpu.memory_space<vmem>>, %arg5: memref<32x32xbf16, #tpu.memory_space<vmem>>, %arg6: memref<32x32xbf16, #tpu.memory_space<vmem>>, %arg7: memref<32x32xbf16, #tpu.memory_space<vmem>>, %arg8: memref<1x32xf32, #tpu.memory_space<vmem>>, %arg9: memref<1x32xf32, #tpu.memory_space<vmem>>, %arg10: memref<1x32xf32, #tpu.memory_space<vmem>>, %arg11: memref<4x8x32xbf16, #tpu.memory_space<vmem>>, %arg12: memref<1x32xf32, #tpu.memory_space<vmem>>, %arg13: memref<32x32xbf16, #tpu.memory_space<vmem>>, %arg14: memref<32x32xbf16, #tpu.memory_space<vmem>>, %arg15: memref<32x32xbf16, #tpu.memory_space<vmem>>, %arg16: memref<1x32xf32, #tpu.memory_space<vmem>>, %arg17: memref<1x32xf32, #tpu.memory_space<vmem>>, %arg18: memref<1x32xf32, #tpu.memory_space<vmem>>, %arg19: memref<4x8x32xbf16, #tpu.memory_space<vmem>>, %arg20: memref<1x32xf32, #tpu.memory_space<vmem>>, %arg21: memref<32x64xbf16, #tpu.memory_space<vmem>>, %arg22: memref<1x64xf32, #tpu.memory_space<vmem>>, %arg23: memref<64x32xbf16, #tpu.memory_space<vmem>>, %arg24: memref<1x32xf32, #tpu.memory_space<vmem>>, %arg25: memref<1x32xf32, #tpu.memory_space<vmem>>, %arg26: memref<1x32xf32, #tpu.memory_space<vmem>>, %arg27: memref<1x32xf32, #tpu.memory_space<vmem>>, %arg28: memref<1x32xf32, #tpu.memory_space<vmem>>, %arg29: memref<1x32xf32, #tpu.memory_space<vmem>>, %arg30: memref<1x32xf32, #tpu.memory_space<vmem>>, %arg31: memref<1x32xf32, #tpu.memory_space<vmem>>, %arg32: memref<1x32xf32, #tpu.memory_space<vmem>>, %arg33: memref<1x8x32xf32, #tpu.memory_space<vmem>>, %arg34: memref<1x8x16xf32, #tpu.memory_space<vmem>>, %arg35: memref<16x32xf32, #tpu.memory_space<vmem>>, %arg36: memref<16x32xf32, #tpu.memory_space<vmem>>) attributes {dimension_semantics = [#tpu.dimension_semantics<parallel>, #tpu.dimension_semantics<arbitrary>], iteration_bounds = array<i64: 2, 2>, scalar_prefetch = 0 : i64, scratch_operands = 2 : i64, tpu.core_type = #tpu.core_type<tc>, window_params = [{transform_indices = @transform_0, window_bounds = array<i64: 1, 8, 32>}, {transform_indices = @transform_1, window_bounds = array<i64: 1, 16, 32>}, {pipeline_mode = #tpu.pipeline_mode<synchronous>, transform_indices = @transform_2, window_bounds = array<i64: 8, 8>}, {pipeline_mode = #tpu.pipeline_mode<synchronous>, transform_indices = @transform_3, window_bounds = array<i64: 32, 32>}, {pipeline_mode = #tpu.pipeline_mode<synchronous>, transform_indices = @transform_4, window_bounds = array<i64: 32, 32>}, {pipeline_mode = #tpu.pipeline_mode<synchronous>, transform_indices = @transform_5, window_bounds = array<i64: 32, 32>}, {pipeline_mode = #tpu.pipeline_mode<synchronous>, transform_indices = @transform_6, window_bounds = array<i64: 1, 32>}, {pipeline_mode = #tpu.pipeline_mode<synchronous>, transform_indices = @transform_7, window_bounds = array<i64: 1, 32>}, {pipeline_mode = #tpu.pipeline_mode<synchronous>, transform_indices = @transform_8, window_bounds = array<i64: 1, 32>}, {pipeline_mode = #tpu.pipeline_mode<synchronous>, transform_indices = @transform_9, window_bounds = array<i64: 4, 8, 32>}, {pipeline_mode = #tpu.pipeline_mode<synchronous>, transform_indices = @transform_10, window_bounds = array<i64: 1, 32>}, {pipeline_mode = #tpu.pipeline_mode<synchronous>, transform_indices = @transform_11, window_bounds = array<i64: 32, 32>}, {pipeline_mode = #tpu.pipeline_mode<synchronous>, transform_indices = @transform_12, window_bounds = array<i64: 32, 32>}, {pipeline_mode = #tpu.pipeline_mode<synchronous>, transform_indices = @transform_13, window_bounds = array<i64: 32, 32>}, {pipeline_mode = #tpu.pipeline_mode<synchronous>, transform_indices = @transform_14, window_bounds = array<i64: 1, 32>}, {pipeline_mode = #tpu.pipeline_mode<synchronous>, transform_indices = @transform_15, window_bounds = array<i64: 1, 32>}, {pipeline_mode = #tpu.pipeline_mode<synchronous>, transform_indices = @transform_16, window_bounds = array<i64: 1, 32>}, {pipeline_mode = #tpu.pipeline_mode<synchronous>, transform_indices = @transform_17, window_bounds = array<i64: 4, 8, 32>}, {pipeline_mode = #tpu.pipeline_mode<synchronous>, transform_indices = @transform_18, window_bounds = array<i64: 1, 32>}, {pipeline_mode = #tpu.pipeline_mode<synchronous>, transform_indices = @transform_19, window_bounds = array<i64: 32, 64>}, {pipeline_mode = #tpu.pipeline_mode<synchronous>, transform_indices = @transform_20, window_bounds = array<i64: 1, 64>}, {pipeline_mode = #tpu.pipeline_mode<synchronous>, transform_indices = @transform_21, window_bounds = array<i64: 64, 32>}, {pipeline_mode = #tpu.pipeline_mode<synchronous>, transform_indices = @transform_22, window_bounds = array<i64: 1, 32>}, {pipeline_mode = #tpu.pipeline_mode<synchronous>, transform_indices = @transform_23, window_bounds = array<i64: 1, 32>}, {pipeline_mode = #tpu.pipeline_mode<synchronous>, transform_indices = @transform_24, window_bounds = array<i64: 1, 32>}, {pipeline_mode = #tpu.pipeline_mode<synchronous>, transform_indices = @transform_25, window_bounds = array<i64: 1, 32>}, {pipeline_mode = #tpu.pipeline_mode<synchronous>, transform_indices = @transform_26, window_bounds = array<i64: 1, 32>}, {pipeline_mode = #tpu.pipeline_mode<synchronous>, transform_indices = @transform_27, window_bounds = array<i64: 1, 32>}, {pipeline_mode = #tpu.pipeline_mode<synchronous>, transform_indices = @transform_28, window_bounds = array<i64: 1, 32>}, {pipeline_mode = #tpu.pipeline_mode<synchronous>, transform_indices = @transform_29, window_bounds = array<i64: 1, 32>}, {pipeline_mode = #tpu.pipeline_mode<synchronous>, transform_indices = @transform_30, window_bounds = array<i64: 1, 32>}, {transform_indices = @transform_31, window_bounds = array<i64: 1, 8, 32>}, {transform_indices = @transform_32, window_bounds = array<i64: 1, 8, 16>}]} {
    %c0_i32 = arith.constant 0 : i32
    %0 = arith.cmpi eq, %arg1, %c0_i32 : i32
    %1 = arith.extui %0 : i1 to i32
    %c0_i32_0 = arith.constant 0 : i32
    %2 = arith.cmpi ne, %1, %c0_i32_0 : i32
    scf.if %2 {
      %c0_97 = arith.constant 0 : index
      %c0_98 = arith.constant 0 : index
      %c0_99 = arith.constant 0 : index
      %180 = vector.load %arg2[%c0_97, %c0_98, %c0_99] : memref<1x8x32xf32, #tpu.memory_space<vmem>>, vector<1x8x32xf32>
      %181 = vector.shape_cast %180 : vector<1x8x32xf32> to vector<8x32xf32>
      %c0_100 = arith.constant 0 : index
      %c0_101 = arith.constant 0 : index
      %c0_102 = arith.constant 0 : index
      %182 = vector.load %arg33[%c0_100, %c0_101, %c0_102] : memref<1x8x32xf32, #tpu.memory_space<vmem>>, vector<1x8x32xf32>
      %183 = vector.shape_cast %182 : vector<1x8x32xf32> to vector<8x32xf32>
      %184 = vector.shape_cast %181 : vector<8x32xf32> to vector<1x8x32xf32>
      tpu.vector_store %arg33[%c0_100, %c0_101, %c0_102], %184 {strides = array<i32>} : memref<1x8x32xf32, #tpu.memory_space<vmem>>, vector<1x8x32xf32>,
      %c0_103 = arith.constant 0 : index
      %c0_104 = arith.constant 0 : index
      %c0_105 = arith.constant 0 : index
      %185 = vector.load %arg3[%c0_103, %c0_104, %c0_105] : memref<1x16x32xf32, #tpu.memory_space<vmem>>, vector<1x16x32xf32>
      %186 = vector.shape_cast %185 : vector<1x16x32xf32> to vector<16x32xf32>
      %187 = arith.truncf %186 : vector<16x32xf32> to vector<16x32xbf16>
      %c0_106 = arith.constant 0 : index
      %c0_107 = arith.constant 0 : index
      %188 = vector.load %arg14[%c0_106, %c0_107] : memref<32x32xbf16, #tpu.memory_space<vmem>>, vector<32x32xbf16>
      %cst_108 = arith.constant dense<0.000000e+00> : vector<16x32xf32>
      %189 = tpu.matmul %187, %188, %cst_108 {dimension_numbers = #tpu.dot_dimension_numbers<[1], [0], [0], [1], [0, 0, 1, 1], [], []>} : vector<16x32xbf16>, vector<32x32xbf16>, vector<16x32xf32> -> vector<16x32xf32>
      %c0_109 = arith.constant 0 : index
      %c0_110 = arith.constant 0 : index
      %190 = vector.load %arg17[%c0_109, %c0_110] : memref<1x32xf32, #tpu.memory_space<vmem>>, vector<1x32xf32>
      %191 = vector.broadcast %190 : vector<1x32xf32> to vector<16x32xf32>
      %192 = arith.addf %189, %191 : vector<16x32xf32>
      %c0_111 = arith.constant 0 : index
      %c0_112 = arith.constant 0 : index
      %193 = vector.load %arg15[%c0_111, %c0_112] : memref<32x32xbf16, #tpu.memory_space<vmem>>, vector<32x32xbf16>
      %cst_113 = arith.constant dense<0.000000e+00> : vector<16x32xf32>
      %194 = tpu.matmul %187, %193, %cst_113 {dimension_numbers = #tpu.dot_dimension_numbers<[1], [0], [0], [1], [0, 0, 1, 1], [], []>} : vector<16x32xbf16>, vector<32x32xbf16>, vector<16x32xf32> -> vector<16x32xf32>
      %c0_114 = arith.constant 0 : index
      %c0_115 = arith.constant 0 : index
      %195 = vector.load %arg18[%c0_114, %c0_115] : memref<1x32xf32, #tpu.memory_space<vmem>>, vector<1x32xf32>
      %196 = vector.broadcast %195 : vector<1x32xf32> to vector<16x32xf32>
      %197 = arith.addf %194, %196 : vector<16x32xf32>
      %c0_116 = arith.constant 0 : index
      %c0_117 = arith.constant 0 : index
      %198 = vector.load %arg35[%c0_116, %c0_117] : memref<16x32xf32, #tpu.memory_space<vmem>>, vector<16x32xf32>
      tpu.vector_store %arg35[%c0_116, %c0_117], %192 {strides = array<i32>} : memref<16x32xf32, #tpu.memory_space<vmem>>, vector<16x32xf32>,
      %c0_118 = arith.constant 0 : index
      %c0_119 = arith.constant 0 : index
      %199 = vector.load %arg36[%c0_118, %c0_119] : memref<16x32xf32, #tpu.memory_space<vmem>>, vector<16x32xf32>
      tpu.vector_store %arg36[%c0_118, %c0_119], %197 {strides = array<i32>} : memref<16x32xf32, #tpu.memory_space<vmem>>, vector<16x32xf32>,
    } else {
    }
    %c0 = arith.constant 0 : index
    %c0_1 = arith.constant 0 : index
    %c0_2 = arith.constant 0 : index
    %3 = vector.load %arg33[%c0, %c0_1, %c0_2] : memref<1x8x32xf32, #tpu.memory_space<vmem>>, vector<1x8x32xf32>
    %4 = vector.shape_cast %3 : vector<1x8x32xf32> to vector<8x32xf32>
    %5 = arith.truncf %4 : vector<8x32xf32> to vector<8x32xbf16>
    %c0_3 = arith.constant 0 : index
    %c0_4 = arith.constant 0 : index
    %6 = vector.load %arg5[%c0_3, %c0_4] : memref<32x32xbf16, #tpu.memory_space<vmem>>, vector<32x32xbf16>
    %cst = arith.constant dense<0.000000e+00> : vector<8x32xf32>
    %7 = tpu.matmul %5, %6, %cst {dimension_numbers = #tpu.dot_dimension_numbers<[1], [0], [0], [1], [0, 0, 1, 1], [], []>} : vector<8x32xbf16>, vector<32x32xbf16>, vector<8x32xf32> -> vector<8x32xf32>
    %c0_5 = arith.constant 0 : index
    %c0_6 = arith.constant 0 : index
    %8 = vector.load %arg8[%c0_5, %c0_6] : memref<1x32xf32, #tpu.memory_space<vmem>>, vector<1x32xf32>
    %9 = vector.broadcast %8 : vector<1x32xf32> to vector<8x32xf32>
    %10 = arith.addf %7, %9 : vector<8x32xf32>
    %c0_7 = arith.constant 0 : index
    %c0_8 = arith.constant 0 : index
    %11 = vector.load %arg6[%c0_7, %c0_8] : memref<32x32xbf16, #tpu.memory_space<vmem>>, vector<32x32xbf16>
    %cst_9 = arith.constant dense<0.000000e+00> : vector<8x32xf32>
    %12 = tpu.matmul %5, %11, %cst_9 {dimension_numbers = #tpu.dot_dimension_numbers<[1], [0], [0], [1], [0, 0, 1, 1], [], []>} : vector<8x32xbf16>, vector<32x32xbf16>, vector<8x32xf32> -> vector<8x32xf32>
    %c0_10 = arith.constant 0 : index
    %c0_11 = arith.constant 0 : index
    %13 = vector.load %arg9[%c0_10, %c0_11] : memref<1x32xf32, #tpu.memory_space<vmem>>, vector<1x32xf32>
    %14 = vector.broadcast %13 : vector<1x32xf32> to vector<8x32xf32>
    %15 = arith.addf %12, %14 : vector<8x32xf32>
    %c0_12 = arith.constant 0 : index
    %c0_13 = arith.constant 0 : index
    %16 = vector.load %arg7[%c0_12, %c0_13] : memref<32x32xbf16, #tpu.memory_space<vmem>>, vector<32x32xbf16>
    %cst_14 = arith.constant dense<0.000000e+00> : vector<8x32xf32>
    %17 = tpu.matmul %5, %16, %cst_14 {dimension_numbers = #tpu.dot_dimension_numbers<[1], [0], [0], [1], [0, 0, 1, 1], [], []>} : vector<8x32xbf16>, vector<32x32xbf16>, vector<8x32xf32> -> vector<8x32xf32>
    %c0_15 = arith.constant 0 : index
    %c0_16 = arith.constant 0 : index
    %18 = vector.load %arg10[%c0_15, %c0_16] : memref<1x32xf32, #tpu.memory_space<vmem>>, vector<1x32xf32>
    %19 = vector.broadcast %18 : vector<1x32xf32> to vector<8x32xf32>
    %20 = arith.addf %17, %19 : vector<8x32xf32>
    %21 = vector.shape_cast %10 : vector<8x32xf32> to vector<8x4x8xf32>
    %22 = arith.truncf %21 : vector<8x4x8xf32> to vector<8x4x8xbf16>
    %23 = vector.shape_cast %15 : vector<8x32xf32> to vector<8x4x8xf32>
    %24 = arith.truncf %23 : vector<8x4x8xf32> to vector<8x4x8xbf16>
    %25 = vector.shape_cast %20 : vector<8x32xf32> to vector<8x4x8xf32>
    %26 = arith.truncf %25 : vector<8x4x8xf32> to vector<8x4x8xbf16>
    "tpu.trace_start"() <{level = 10 : i32, message = "qhd,khd->hqk"}> : () -> ()
    %cst_17 = arith.constant dense<0.000000e+00> : vector<4x8x8xf32>
    %27 = tpu.matmul %22, %24, %cst_17 {dimension_numbers = #tpu.dot_dimension_numbers<[2], [2], [0], [0], [0, 1, 0, 0, 1, 0], [1], [1]>} : vector<8x4x8xbf16>, vector<8x4x8xbf16>, vector<4x8x8xf32> -> vector<4x8x8xf32>
    "tpu.trace_stop"() : () -> ()
    %c0_18 = arith.constant 0 : index
    %c0_19 = arith.constant 0 : index
    %28 = vector.load %arg4[%c0_18, %c0_19] : memref<8x8xf32, #tpu.memory_space<vmem>>, vector<8x8xf32>
    %29 = vector.shape_cast %28 : vector<8x8xf32> to vector<1x8x8xf32>
    %30 = vector.broadcast %29 : vector<1x8x8xf32> to vector<4x8x8xf32>
    %31 = arith.addf %27, %30 : vector<4x8x8xf32>
    %cst_20 = arith.constant dense<0xFF800000> : vector<4x8xf32>
    %32 = vector.multi_reduction <maximumf>, %31, %cst_20 [2] : vector<4x8x8xf32> to vector<4x8xf32>
    %33 = vector.shape_cast %32 : vector<4x8xf32> to vector<4x8x1xf32>
    %34 = vector.broadcast %33 : vector<4x8x1xf32> to vector<4x8x8xf32>
    %35 = arith.subf %31, %34 : vector<4x8x8xf32>
    %36 = math.exp %35 : vector<4x8x8xf32>
    %cst_21 = arith.constant dense<0.000000e+00> : vector<4x8xf32>
    %37 = vector.multi_reduction <add>, %36, %cst_21 [2] : vector<4x8x8xf32> to vector<4x8xf32>
    %38 = vector.shape_cast %37 : vector<4x8xf32> to vector<4x8x1xf32>
    %39 = tpu.reciprocal %38 {approx = true} : vector<4x8x1xf32> -> vector<4x8x1xf32>
    %40 = vector.broadcast %39 : vector<4x8x1xf32> to vector<4x8x8xf32>
    %41 = arith.mulf %36, %40 : vector<4x8x8xf32>
    %42 = arith.truncf %41 : vector<4x8x8xf32> to vector<4x8x8xbf16>
    "tpu.trace_start"() <{level = 10 : i32, message = "hqk,khd->hqd"}> : () -> ()
    %cst_22 = arith.constant dense<0.000000e+00> : vector<4x8x8xf32>
    %43 = tpu.matmul %42, %26, %cst_22 {dimension_numbers = #tpu.dot_dimension_numbers<[2], [0], [1], [2], [0, 0, 0, 1, 1, 2], [0], [1]>} : vector<4x8x8xbf16>, vector<8x4x8xbf16>, vector<4x8x8xf32> -> vector<4x8x8xf32>
    "tpu.trace_stop"() : () -> ()
    %44 = arith.truncf %43 : vector<4x8x8xf32> to vector<4x8x8xbf16>
    %c0_23 = arith.constant 0 : index
    %c0_24 = arith.constant 0 : index
    %c0_25 = arith.constant 0 : index
    %45 = vector.load %arg11[%c0_23, %c0_24, %c0_25] : memref<4x8x32xbf16, #tpu.memory_space<vmem>>, vector<4x8x32xbf16>
    "tpu.trace_start"() <{level = 10 : i32, message = "hqd,hde->hqe"}> : () -> ()
    %cst_26 = arith.constant dense<0.000000e+00> : vector<4x8x32xf32>
    %46 = tpu.matmul %44, %45, %cst_26 {dimension_numbers = #tpu.dot_dimension_numbers<[2], [1], [1], [2], [0, 0, 0, 1, 1, 2], [0], [0]>} : vector<4x8x8xbf16>, vector<4x8x32xbf16>, vector<4x8x32xf32> -> vector<4x8x32xf32>
    "tpu.trace_stop"() : () -> ()
    %cst_27 = arith.constant dense<0.000000e+00> : vector<8x32xf32>
    %47 = vector.multi_reduction <add>, %46, %cst_27 [0] : vector<4x8x32xf32> to vector<8x32xf32>
    %c0_28 = arith.constant 0 : index
    %c0_29 = arith.constant 0 : index
    %48 = vector.load %arg12[%c0_28, %c0_29] : memref<1x32xf32, #tpu.memory_space<vmem>>, vector<1x32xf32>
    %49 = vector.broadcast %48 : vector<1x32xf32> to vector<8x32xf32>
    %50 = arith.addf %47, %49 : vector<8x32xf32>
    %51 = arith.addf %4, %50 : vector<8x32xf32>
    %cst_30 = arith.constant dense<0.000000e+00> : vector<8xf32>
    %52 = vector.multi_reduction <add>, %51, %cst_30 [1] : vector<8x32xf32> to vector<8xf32>
    %53 = vector.shape_cast %52 : vector<8xf32> to vector<8x1xf32>
    %cst_31 = arith.constant 3.200000e+01 : f32
    %54 = vector.broadcast %cst_31 : f32 to vector<8x1xf32>
    %55 = arith.divf %53, %54 : vector<8x1xf32>
    %56 = vector.broadcast %55 : vector<8x1xf32> to vector<8x32xf32>
    %57 = arith.subf %51, %56 : vector<8x32xf32>
    %58 = arith.mulf %57, %57 : vector<8x32xf32>
    %cst_32 = arith.constant dense<0.000000e+00> : vector<8xf32>
    %59 = vector.multi_reduction <add>, %58, %cst_32 [1] : vector<8x32xf32> to vector<8xf32>
    %60 = vector.shape_cast %59 : vector<8xf32> to vector<8x1xf32>
    %cst_33 = arith.constant 3.200000e+01 : f32
    %61 = vector.broadcast %cst_33 : f32 to vector<8x1xf32>
    %62 = arith.divf %60, %61 : vector<8x1xf32>
    %cst_34 = arith.constant 9.99999974E-6 : f32
    %63 = vector.broadcast %cst_34 : f32 to vector<8x1xf32>
    %64 = arith.addf %62, %63 : vector<8x1xf32>
    %65 = math.rsqrt %64 : vector<8x1xf32>
    %66 = vector.broadcast %65 : vector<8x1xf32> to vector<8x32xf32>
    %67 = arith.mulf %57, %66 : vector<8x32xf32>
    %c0_35 = arith.constant 0 : index
    %c0_36 = arith.constant 0 : index
    %68 = vector.load %arg25[%c0_35, %c0_36] : memref<1x32xf32, #tpu.memory_space<vmem>>, vector<1x32xf32>
    %69 = vector.broadcast %68 : vector<1x32xf32> to vector<8x32xf32>
    %70 = arith.mulf %67, %69 : vector<8x32xf32>
    %c0_37 = arith.constant 0 : index
    %c0_38 = arith.constant 0 : index
    %71 = vector.load %arg26[%c0_37, %c0_38] : memref<1x32xf32, #tpu.memory_space<vmem>>, vector<1x32xf32>
    %72 = vector.broadcast %71 : vector<1x32xf32> to vector<8x32xf32>
    %73 = arith.addf %70, %72 : vector<8x32xf32>
    %74 = arith.truncf %73 : vector<8x32xf32> to vector<8x32xbf16>
    %c0_39 = arith.constant 0 : index
    %c0_40 = arith.constant 0 : index
    %75 = vector.load %arg13[%c0_39, %c0_40] : memref<32x32xbf16, #tpu.memory_space<vmem>>, vector<32x32xbf16>
    %cst_41 = arith.constant dense<0.000000e+00> : vector<8x32xf32>
    %76 = tpu.matmul %74, %75, %cst_41 {dimension_numbers = #tpu.dot_dimension_numbers<[1], [0], [0], [1], [0, 0, 1, 1], [], []>} : vector<8x32xbf16>, vector<32x32xbf16>, vector<8x32xf32> -> vector<8x32xf32>
    %c0_42 = arith.constant 0 : index
    %c0_43 = arith.constant 0 : index
    %77 = vector.load %arg16[%c0_42, %c0_43] : memref<1x32xf32, #tpu.memory_space<vmem>>, vector<1x32xf32>
    %78 = vector.broadcast %77 : vector<1x32xf32> to vector<8x32xf32>
    %79 = arith.addf %76, %78 : vector<8x32xf32>
    %c0_44 = arith.constant 0 : index
    %c0_45 = arith.constant 0 : index
    %80 = vector.load %arg35[%c0_44, %c0_45] : memref<16x32xf32, #tpu.memory_space<vmem>>, vector<16x32xf32>
    %c0_46 = arith.constant 0 : index
    %c0_47 = arith.constant 0 : index
    %81 = vector.load %arg36[%c0_46, %c0_47] : memref<16x32xf32, #tpu.memory_space<vmem>>, vector<16x32xf32>
    %82 = vector.shape_cast %79 : vector<8x32xf32> to vector<8x4x8xf32>
    %83 = arith.truncf %82 : vector<8x4x8xf32> to vector<8x4x8xbf16>
    %84 = vector.shape_cast %80 : vector<16x32xf32> to vector<16x4x8xf32>
    %85 = arith.truncf %84 : vector<16x4x8xf32> to vector<16x4x8xbf16>
    %86 = vector.shape_cast %81 : vector<16x32xf32> to vector<16x4x8xf32>
    %87 = arith.truncf %86 : vector<16x4x8xf32> to vector<16x4x8xbf16>
    "tpu.trace_start"() <{level = 10 : i32, message = "qhd,khd->hqk"}> : () -> ()
    %cst_48 = arith.constant dense<0.000000e+00> : vector<4x8x16xf32>
    %88 = tpu.matmul %83, %85, %cst_48 {dimension_numbers = #tpu.dot_dimension_numbers<[2], [2], [0], [0], [0, 1, 0, 0, 1, 0], [1], [1]>} : vector<8x4x8xbf16>, vector<16x4x8xbf16>, vector<4x8x16xf32> -> vector<4x8x16xf32>
    "tpu.trace_stop"() : () -> ()
    %cst_49 = arith.constant dense<0xFF800000> : vector<4x8xf32>
    %89 = vector.multi_reduction <maximumf>, %88, %cst_49 [2] : vector<4x8x16xf32> to vector<4x8xf32>
    %90 = vector.shape_cast %89 : vector<4x8xf32> to vector<4x8x1xf32>
    %91 = vector.broadcast %90 : vector<4x8x1xf32> to vector<4x8x16xf32>
    %92 = arith.subf %88, %91 : vector<4x8x16xf32>
    %93 = math.exp %92 : vector<4x8x16xf32>
    %cst_50 = arith.constant dense<0.000000e+00> : vector<4x8xf32>
    %94 = vector.multi_reduction <add>, %93, %cst_50 [2] : vector<4x8x16xf32> to vector<4x8xf32>
    %95 = vector.shape_cast %94 : vector<4x8xf32> to vector<4x8x1xf32>
    %96 = tpu.reciprocal %95 {approx = true} : vector<4x8x1xf32> -> vector<4x8x1xf32>
    %97 = vector.broadcast %96 : vector<4x8x1xf32> to vector<4x8x16xf32>
    %98 = arith.mulf %93, %97 : vector<4x8x16xf32>
    %99 = arith.truncf %98 : vector<4x8x16xf32> to vector<4x8x16xbf16>
    "tpu.trace_start"() <{level = 10 : i32, message = "hqk,khd->hqd"}> : () -> ()
    %cst_51 = arith.constant dense<0.000000e+00> : vector<4x8x8xf32>
    %100 = tpu.matmul %99, %87, %cst_51 {dimension_numbers = #tpu.dot_dimension_numbers<[2], [0], [1], [2], [0, 0, 0, 1, 1, 2], [0], [1]>} : vector<4x8x16xbf16>, vector<16x4x8xbf16>, vector<4x8x8xf32> -> vector<4x8x8xf32>
    "tpu.trace_stop"() : () -> ()
    %101 = arith.truncf %100 : vector<4x8x8xf32> to vector<4x8x8xbf16>
    %c0_52 = arith.constant 0 : index
    %c0_53 = arith.constant 0 : index
    %c0_54 = arith.constant 0 : index
    %102 = vector.load %arg19[%c0_52, %c0_53, %c0_54] : memref<4x8x32xbf16, #tpu.memory_space<vmem>>, vector<4x8x32xbf16>
    "tpu.trace_start"() <{level = 10 : i32, message = "hqd,hde->hqe"}> : () -> ()
    %cst_55 = arith.constant dense<0.000000e+00> : vector<4x8x32xf32>
    %103 = tpu.matmul %101, %102, %cst_55 {dimension_numbers = #tpu.dot_dimension_numbers<[2], [1], [1], [2], [0, 0, 0, 1, 1, 2], [0], [0]>} : vector<4x8x8xbf16>, vector<4x8x32xbf16>, vector<4x8x32xf32> -> vector<4x8x32xf32>
    "tpu.trace_stop"() : () -> ()
    %cst_56 = arith.constant dense<0.000000e+00> : vector<8x32xf32>
    %104 = vector.multi_reduction <add>, %103, %cst_56 [0] : vector<4x8x32xf32> to vector<8x32xf32>
    %c0_57 = arith.constant 0 : index
    %c0_58 = arith.constant 0 : index
    %105 = vector.load %arg20[%c0_57, %c0_58] : memref<1x32xf32, #tpu.memory_space<vmem>>, vector<1x32xf32>
    %106 = vector.broadcast %105 : vector<1x32xf32> to vector<8x32xf32>
    %107 = arith.addf %104, %106 : vector<8x32xf32>
    %cst_59 = arith.constant dense<0.000000e+00> : vector<8x16xf32>
    %108 = vector.multi_reduction <add>, %98, %cst_59 [0] : vector<4x8x16xf32> to vector<8x16xf32>
    %cst_60 = arith.constant 2.500000e-01 : f32
    %109 = vector.broadcast %cst_60 : f32 to vector<8x16xf32>
    %110 = arith.mulf %108, %109 : vector<8x16xf32>
    %111 = arith.addf %73, %107 : vector<8x32xf32>
    %cst_61 = arith.constant dense<0.000000e+00> : vector<8xf32>
    %112 = vector.multi_reduction <add>, %111, %cst_61 [1] : vector<8x32xf32> to vector<8xf32>
    %113 = vector.shape_cast %112 : vector<8xf32> to vector<8x1xf32>
    %cst_62 = arith.constant 3.200000e+01 : f32
    %114 = vector.broadcast %cst_62 : f32 to vector<8x1xf32>
    %115 = arith.divf %113, %114 : vector<8x1xf32>
    %116 = vector.broadcast %115 : vector<8x1xf32> to vector<8x32xf32>
    %117 = arith.subf %111, %116 : vector<8x32xf32>
    %118 = arith.mulf %117, %117 : vector<8x32xf32>
    %cst_63 = arith.constant dense<0.000000e+00> : vector<8xf32>
    %119 = vector.multi_reduction <add>, %118, %cst_63 [1] : vector<8x32xf32> to vector<8xf32>
    %120 = vector.shape_cast %119 : vector<8xf32> to vector<8x1xf32>
    %cst_64 = arith.constant 3.200000e+01 : f32
    %121 = vector.broadcast %cst_64 : f32 to vector<8x1xf32>
    %122 = arith.divf %120, %121 : vector<8x1xf32>
    %cst_65 = arith.constant 9.99999974E-6 : f32
    %123 = vector.broadcast %cst_65 : f32 to vector<8x1xf32>
    %124 = arith.addf %122, %123 : vector<8x1xf32>
    %125 = math.rsqrt %124 : vector<8x1xf32>
    %126 = vector.broadcast %125 : vector<8x1xf32> to vector<8x32xf32>
    %127 = arith.mulf %117, %126 : vector<8x32xf32>
    %c0_66 = arith.constant 0 : index
    %c0_67 = arith.constant 0 : index
    %128 = vector.load %arg27[%c0_66, %c0_67] : memref<1x32xf32, #tpu.memory_space<vmem>>, vector<1x32xf32>
    %129 = vector.broadcast %128 : vector<1x32xf32> to vector<8x32xf32>
    %130 = arith.mulf %127, %129 : vector<8x32xf32>
    %c0_68 = arith.constant 0 : index
    %c0_69 = arith.constant 0 : index
    %131 = vector.load %arg28[%c0_68, %c0_69] : memref<1x32xf32, #tpu.memory_space<vmem>>, vector<1x32xf32>
    %132 = vector.broadcast %131 : vector<1x32xf32> to vector<8x32xf32>
    %133 = arith.addf %130, %132 : vector<8x32xf32>
    %134 = arith.truncf %133 : vector<8x32xf32> to vector<8x32xbf16>
    %c0_70 = arith.constant 0 : index
    %c0_71 = arith.constant 0 : index
    %135 = vector.load %arg21[%c0_70, %c0_71] : memref<32x64xbf16, #tpu.memory_space<vmem>>, vector<32x64xbf16>
    %cst_72 = arith.constant dense<0.000000e+00> : vector<8x64xf32>
    %136 = tpu.matmul %134, %135, %cst_72 {dimension_numbers = #tpu.dot_dimension_numbers<[1], [0], [0], [1], [0, 0, 1, 1], [], []>} : vector<8x32xbf16>, vector<32x64xbf16>, vector<8x64xf32> -> vector<8x64xf32>
    %c0_73 = arith.constant 0 : index
    %c0_74 = arith.constant 0 : index
    %137 = vector.load %arg22[%c0_73, %c0_74] : memref<1x64xf32, #tpu.memory_space<vmem>>, vector<1x64xf32>
    %138 = vector.broadcast %137 : vector<1x64xf32> to vector<8x64xf32>
    %139 = arith.addf %136, %138 : vector<8x64xf32>
    %cst_75 = arith.constant 0.000000e+00 : f32
    %140 = vector.broadcast %cst_75 : f32 to vector<8x64xf32>
    %141 = arith.maximumf %139, %140 : vector<8x64xf32>
    %142 = arith.truncf %141 : vector<8x64xf32> to vector<8x64xbf16>
    %c0_76 = arith.constant 0 : index
    %c0_77 = arith.constant 0 : index
    %143 = vector.load %arg23[%c0_76, %c0_77] : memref<64x32xbf16, #tpu.memory_space<vmem>>, vector<64x32xbf16>
    %cst_78 = arith.constant dense<0.000000e+00> : vector<8x32xf32>
    %144 = tpu.matmul %142, %143, %cst_78 {dimension_numbers = #tpu.dot_dimension_numbers<[1], [0], [0], [1], [0, 0, 1, 1], [], []>} : vector<8x64xbf16>, vector<64x32xbf16>, vector<8x32xf32> -> vector<8x32xf32>
    %c0_79 = arith.constant 0 : index
    %c0_80 = arith.constant 0 : index
    %145 = vector.load %arg24[%c0_79, %c0_80] : memref<1x32xf32, #tpu.memory_space<vmem>>, vector<1x32xf32>
    %146 = vector.broadcast %145 : vector<1x32xf32> to vector<8x32xf32>
    %147 = arith.addf %144, %146 : vector<8x32xf32>
    %148 = arith.addf %133, %147 : vector<8x32xf32>
    %cst_81 = arith.constant dense<0.000000e+00> : vector<8xf32>
    %149 = vector.multi_reduction <add>, %148, %cst_81 [1] : vector<8x32xf32> to vector<8xf32>
    %150 = vector.shape_cast %149 : vector<8xf32> to vector<8x1xf32>
    %cst_82 = arith.constant 3.200000e+01 : f32
    %151 = vector.broadcast %cst_82 : f32 to vector<8x1xf32>
    %152 = arith.divf %150, %151 : vector<8x1xf32>
    %153 = vector.broadcast %152 : vector<8x1xf32> to vector<8x32xf32>
    %154 = arith.subf %148, %153 : vector<8x32xf32>
    %155 = arith.mulf %154, %154 : vector<8x32xf32>
    %cst_83 = arith.constant dense<0.000000e+00> : vector<8xf32>
    %156 = vector.multi_reduction <add>, %155, %cst_83 [1] : vector<8x32xf32> to vector<8xf32>
    %157 = vector.shape_cast %156 : vector<8xf32> to vector<8x1xf32>
    %cst_84 = arith.constant 3.200000e+01 : f32
    %158 = vector.broadcast %cst_84 : f32 to vector<8x1xf32>
    %159 = arith.divf %157, %158 : vector<8x1xf32>
    %cst_85 = arith.constant 9.99999974E-6 : f32
    %160 = vector.broadcast %cst_85 : f32 to vector<8x1xf32>
    %161 = arith.addf %159, %160 : vector<8x1xf32>
    %162 = math.rsqrt %161 : vector<8x1xf32>
    %163 = vector.broadcast %162 : vector<8x1xf32> to vector<8x32xf32>
    %164 = arith.mulf %154, %163 : vector<8x32xf32>
    %c0_86 = arith.constant 0 : index
    %c0_87 = arith.constant 0 : index
    %165 = vector.load %arg29[%c0_86, %c0_87] : memref<1x32xf32, #tpu.memory_space<vmem>>, vector<1x32xf32>
    %166 = vector.broadcast %165 : vector<1x32xf32> to vector<8x32xf32>
    %167 = arith.mulf %164, %166 : vector<8x32xf32>
    %c0_88 = arith.constant 0 : index
    %c0_89 = arith.constant 0 : index
    %168 = vector.load %arg30[%c0_88, %c0_89] : memref<1x32xf32, #tpu.memory_space<vmem>>, vector<1x32xf32>
    %169 = vector.broadcast %168 : vector<1x32xf32> to vector<8x32xf32>
    %170 = arith.addf %167, %169 : vector<8x32xf32>
    %c0_90 = arith.constant 0 : index
    %c0_91 = arith.constant 0 : index
    %c0_92 = arith.constant 0 : index
    %171 = vector.load %arg33[%c0_90, %c0_91, %c0_92] : memref<1x8x32xf32, #tpu.memory_space<vmem>>, vector<1x8x32xf32>
    %172 = vector.shape_cast %171 : vector<1x8x32xf32> to vector<8x32xf32>
    %173 = vector.shape_cast %170 : vector<8x32xf32> to vector<1x8x32xf32>
    tpu.vector_store %arg33[%c0_90, %c0_91, %c0_92], %173 {strides = array<i32>} : memref<1x8x32xf32, #tpu.memory_space<vmem>>, vector<1x8x32xf32>,
    %c0_93 = arith.constant 0 : index
    %c0_94 = arith.constant 0 : index
    %c0_95 = arith.constant 0 : index
    %174 = vector.load %arg34[%c0_93, %c0_94, %c0_95] : memref<1x8x16xf32, #tpu.memory_space<vmem>>, vector<1x8x16xf32>
    %175 = vector.shape_cast %174 : vector<1x8x16xf32> to vector<8x16xf32>
    %176 = vector.shape_cast %110 : vector<8x16xf32> to vector<1x8x16xf32>
    tpu.vector_store %arg34[%c0_93, %c0_94, %c0_95], %176 {strides = array<i32>} : memref<1x8x16xf32, #tpu.memory_space<vmem>>, vector<1x8x16xf32>,
    %c1_i32 = arith.constant 1 : i32
    %177 = arith.cmpi eq, %arg1, %c1_i32 : i32
    %178 = arith.extui %177 : i1 to i32
    %c0_i32_96 = arith.constant 0 : i32
    %179 = arith.cmpi ne, %178, %c0_i32_96 : i32
    scf.if %179 {
      %cst_97 = arith.constant dense<0.000000e+00> : vector<8xf32>
      %180 = vector.multi_reduction <add>, %170, %cst_97 [1] : vector<8x32xf32> to vector<8xf32>
      %181 = vector.shape_cast %180 : vector<8xf32> to vector<8x1xf32>
      %cst_98 = arith.constant 3.200000e+01 : f32
      %182 = vector.broadcast %cst_98 : f32 to vector<8x1xf32>
      %183 = arith.divf %181, %182 : vector<8x1xf32>
      %184 = vector.broadcast %183 : vector<8x1xf32> to vector<8x32xf32>
      %185 = arith.subf %170, %184 : vector<8x32xf32>
      %186 = arith.mulf %185, %185 : vector<8x32xf32>
      %cst_99 = arith.constant dense<0.000000e+00> : vector<8xf32>
      %187 = vector.multi_reduction <add>, %186, %cst_99 [1] : vector<8x32xf32> to vector<8xf32>
      %188 = vector.shape_cast %187 : vector<8xf32> to vector<8x1xf32>
      %cst_100 = arith.constant 3.200000e+01 : f32
      %189 = vector.broadcast %cst_100 : f32 to vector<8x1xf32>
      %190 = arith.divf %188, %189 : vector<8x1xf32>
      %cst_101 = arith.constant 9.99999974E-6 : f32
      %191 = vector.broadcast %cst_101 : f32 to vector<8x1xf32>
      %192 = arith.addf %190, %191 : vector<8x1xf32>
      %193 = math.rsqrt %192 : vector<8x1xf32>
      %194 = vector.broadcast %193 : vector<8x1xf32> to vector<8x32xf32>
      %195 = arith.mulf %185, %194 : vector<8x32xf32>
      %c0_102 = arith.constant 0 : index
      %c0_103 = arith.constant 0 : index
      %196 = vector.load %arg31[%c0_102, %c0_103] : memref<1x32xf32, #tpu.memory_space<vmem>>, vector<1x32xf32>
      %197 = vector.broadcast %196 : vector<1x32xf32> to vector<8x32xf32>
      %198 = arith.mulf %195, %197 : vector<8x32xf32>
      %c0_104 = arith.constant 0 : index
      %c0_105 = arith.constant 0 : index
      %199 = vector.load %arg32[%c0_104, %c0_105] : memref<1x32xf32, #tpu.memory_space<vmem>>, vector<1x32xf32>
      %200 = vector.broadcast %199 : vector<1x32xf32> to vector<8x32xf32>
      %201 = arith.addf %198, %200 : vector<8x32xf32>
      %c0_106 = arith.constant 0 : index
      %c0_107 = arith.constant 0 : index
      %c0_108 = arith.constant 0 : index
      %202 = vector.load %arg33[%c0_106, %c0_107, %c0_108] : memref<1x8x32xf32, #tpu.memory_space<vmem>>, vector<1x8x32xf32>
      %203 = vector.shape_cast %202 : vector<1x8x32xf32> to vector<8x32xf32>
      %204 = vector.shape_cast %201 : vector<8x32xf32> to vector<1x8x32xf32>
      tpu.vector_store %arg33[%c0_106, %c0_107, %c0_108], %204 {strides = array<i32>} : memref<1x8x32xf32, #tpu.memory_space<vmem>>, vector<1x8x32xf32>,
    } else {
    }
    return
  }
  func.func @transform_0(%arg0: i32, %arg1: i32) -> (i32, i32, i32) {
    %c0_i32 = arith.constant 0 : i32
    %c0_i32_0 = arith.constant 0 : i32
    %c0_i32_1 = arith.constant 0 : i32
    return %arg0, %c0_i32, %c0_i32_0 : i32, i32, i32
  }
  func.func @transform_1(%arg0: i32, %arg1: i32) -> (i32, i32, i32) {
    %c0_i32 = arith.constant 0 : i32
    %c0_i32_0 = arith.constant 0 : i32
    %c0_i32_1 = arith.constant 0 : i32
    return %arg0, %c0_i32, %c0_i32_0 : i32, i32, i32
  }
  func.func @transform_2(%arg0: i32, %arg1: i32) -> (i32, i32) {
    %c0_i32 = arith.constant 0 : i32
    %c0_i32_0 = arith.constant 0 : i32
    %c0_i32_1 = arith.constant 0 : i32
    return %c0_i32, %c0_i32_0 : i32, i32
  }
  func.func @transform_3(%arg0: i32, %arg1: i32) -> (i32, i32) {
    %c0_i32 = arith.constant 0 : i32
    %c0_i32_0 = arith.constant 0 : i32
    %c0_i32_1 = arith.constant 0 : i32
    return %c0_i32, %c0_i32_0 : i32, i32
  }
  func.func @transform_4(%arg0: i32, %arg1: i32) -> (i32, i32) {
    %c0_i32 = arith.constant 0 : i32
    %c0_i32_0 = arith.constant 0 : i32
    %c0_i32_1 = arith.constant 0 : i32
    return %c0_i32, %c0_i32_0 : i32, i32
  }
  func.func @transform_5(%arg0: i32, %arg1: i32) -> (i32, i32) {
    %c0_i32 = arith.constant 0 : i32
    %c0_i32_0 = arith.constant 0 : i32
    %c0_i32_1 = arith.constant 0 : i32
    return %c0_i32, %c0_i32_0 : i32, i32
  }
  func.func @transform_6(%arg0: i32, %arg1: i32) -> (i32, i32) {
    %c0_i32 = arith.constant 0 : i32
    %c0_i32_0 = arith.constant 0 : i32
    %c0_i32_1 = arith.constant 0 : i32
    return %c0_i32, %c0_i32_0 : i32, i32
  }
  func.func @transform_7(%arg0: i32, %arg1: i32) -> (i32, i32) {
    %c0_i32 = arith.constant 0 : i32
    %c0_i32_0 = arith.constant 0 : i32
    %c0_i32_1 = arith.constant 0 : i32
    return %c0_i32, %c0_i32_0 : i32, i32
  }
  func.func @transform_8(%arg0: i32, %arg1: i32) -> (i32, i32) {
    %c0_i32 = arith.constant 0 : i32
    %c0_i32_0 = arith.constant 0 : i32
    %c0_i32_1 = arith.constant 0 : i32
    return %c0_i32, %c0_i32_0 : i32, i32
  }
  func.func @transform_9(%arg0: i32, %arg1: i32) -> (i32, i32, i32) {
    %c0_i32 = arith.constant 0 : i32
    %c0_i32_0 = arith.constant 0 : i32
    %c0_i32_1 = arith.constant 0 : i32
    %c0_i32_2 = arith.constant 0 : i32
    return %c0_i32, %c0_i32_0, %c0_i32_1 : i32, i32, i32
  }
  func.func @transform_10(%arg0: i32, %arg1: i32) -> (i32, i32) {
    %c0_i32 = arith.constant 0 : i32
    %c0_i32_0 = arith.constant 0 : i32
    %c0_i32_1 = arith.constant 0 : i32
    return %c0_i32, %c0_i32_0 : i32, i32
  }
  func.func @transform_11(%arg0: i32, %arg1: i32) -> (i32, i32) {
    %c0_i32 = arith.constant 0 : i32
    %c0_i32_0 = arith.constant 0 : i32
    %c0_i32_1 = arith.constant 0 : i32
    return %c0_i32, %c0_i32_0 : i32, i32
  }
  func.func @transform_12(%arg0: i32, %arg1: i32) -> (i32, i32) {
    %c0_i32 = arith.constant 0 : i32
    %c0_i32_0 = arith.constant 0 : i32
    %c0_i32_1 = arith.constant 0 : i32
    return %c0_i32, %c0_i32_0 : i32, i32
  }
  func.func @transform_13(%arg0: i32, %arg1: i32) -> (i32, i32) {
    %c0_i32 = arith.constant 0 : i32
    %c0_i32_0 = arith.constant 0 : i32
    %c0_i32_1 = arith.constant 0 : i32
    return %c0_i32, %c0_i32_0 : i32, i32
  }
  func.func @transform_14(%arg0: i32, %arg1: i32) -> (i32, i32) {
    %c0_i32 = arith.constant 0 : i32
    %c0_i32_0 = arith.constant 0 : i32
    %c0_i32_1 = arith.constant 0 : i32
    return %c0_i32, %c0_i32_0 : i32, i32
  }
  func.func @transform_15(%arg0: i32, %arg1: i32) -> (i32, i32) {
    %c0_i32 = arith.constant 0 : i32
    %c0_i32_0 = arith.constant 0 : i32
    %c0_i32_1 = arith.constant 0 : i32
    return %c0_i32, %c0_i32_0 : i32, i32
  }
  func.func @transform_16(%arg0: i32, %arg1: i32) -> (i32, i32) {
    %c0_i32 = arith.constant 0 : i32
    %c0_i32_0 = arith.constant 0 : i32
    %c0_i32_1 = arith.constant 0 : i32
    return %c0_i32, %c0_i32_0 : i32, i32
  }
  func.func @transform_17(%arg0: i32, %arg1: i32) -> (i32, i32, i32) {
    %c0_i32 = arith.constant 0 : i32
    %c0_i32_0 = arith.constant 0 : i32
    %c0_i32_1 = arith.constant 0 : i32
    %c0_i32_2 = arith.constant 0 : i32
    return %c0_i32, %c0_i32_0, %c0_i32_1 : i32, i32, i32
  }
  func.func @transform_18(%arg0: i32, %arg1: i32) -> (i32, i32) {
    %c0_i32 = arith.constant 0 : i32
    %c0_i32_0 = arith.constant 0 : i32
    %c0_i32_1 = arith.constant 0 : i32
    return %c0_i32, %c0_i32_0 : i32, i32
  }
  func.func @transform_19(%arg0: i32, %arg1: i32) -> (i32, i32) {
    %c0_i32 = arith.constant 0 : i32
    %c0_i32_0 = arith.constant 0 : i32
    %c0_i32_1 = arith.constant 0 : i32
    return %c0_i32, %c0_i32_0 : i32, i32
  }
  func.func @transform_20(%arg0: i32, %arg1: i32) -> (i32, i32) {
    %c0_i32 = arith.constant 0 : i32
    %c0_i32_0 = arith.constant 0 : i32
    %c0_i32_1 = arith.constant 0 : i32
    return %c0_i32, %c0_i32_0 : i32, i32
  }
  func.func @transform_21(%arg0: i32, %arg1: i32) -> (i32, i32) {
    %c0_i32 = arith.constant 0 : i32
    %c0_i32_0 = arith.constant 0 : i32
    %c0_i32_1 = arith.constant 0 : i32
    return %c0_i32, %c0_i32_0 : i32, i32
  }
  func.func @transform_22(%arg0: i32, %arg1: i32) -> (i32, i32) {
    %c0_i32 = arith.constant 0 : i32
    %c0_i32_0 = arith.constant 0 : i32
    %c0_i32_1 = arith.constant 0 : i32
    return %c0_i32, %c0_i32_0 : i32, i32
  }
  func.func @transform_23(%arg0: i32, %arg1: i32) -> (i32, i32) {
    %c0_i32 = arith.constant 0 : i32
    %c0_i32_0 = arith.constant 0 : i32
    %c0_i32_1 = arith.constant 0 : i32
    return %c0_i32, %c0_i32_0 : i32, i32
  }
  func.func @transform_24(%arg0: i32, %arg1: i32) -> (i32, i32) {
    %c0_i32 = arith.constant 0 : i32
    %c0_i32_0 = arith.constant 0 : i32
    %c0_i32_1 = arith.constant 0 : i32
    return %c0_i32, %c0_i32_0 : i32, i32
  }
  func.func @transform_25(%arg0: i32, %arg1: i32) -> (i32, i32) {
    %c0_i32 = arith.constant 0 : i32
    %c0_i32_0 = arith.constant 0 : i32
    %c0_i32_1 = arith.constant 0 : i32
    return %c0_i32, %c0_i32_0 : i32, i32
  }
  func.func @transform_26(%arg0: i32, %arg1: i32) -> (i32, i32) {
    %c0_i32 = arith.constant 0 : i32
    %c0_i32_0 = arith.constant 0 : i32
    %c0_i32_1 = arith.constant 0 : i32
    return %c0_i32, %c0_i32_0 : i32, i32
  }
  func.func @transform_27(%arg0: i32, %arg1: i32) -> (i32, i32) {
    %c0_i32 = arith.constant 0 : i32
    %c0_i32_0 = arith.constant 0 : i32
    %c0_i32_1 = arith.constant 0 : i32
    return %c0_i32, %c0_i32_0 : i32, i32
  }
  func.func @transform_28(%arg0: i32, %arg1: i32) -> (i32, i32) {
    %c0_i32 = arith.constant 0 : i32
    %c0_i32_0 = arith.constant 0 : i32
    %c0_i32_1 = arith.constant 0 : i32
    return %c0_i32, %c0_i32_0 : i32, i32
  }
  func.func @transform_29(%arg0: i32, %arg1: i32) -> (i32, i32) {
    %c0_i32 = arith.constant 0 : i32
    %c0_i32_0 = arith.constant 0 : i32
    %c0_i32_1 = arith.constant 0 : i32
    return %c0_i32, %c0_i32_0 : i32, i32
  }
  func.func @transform_30(%arg0: i32, %arg1: i32) -> (i32, i32) {
    %c0_i32 = arith.constant 0 : i32
    %c0_i32_0 = arith.constant 0 : i32
    %c0_i32_1 = arith.constant 0 : i32
    return %c0_i32, %c0_i32_0 : i32, i32
  }
  func.func @transform_31(%arg0: i32, %arg1: i32) -> (i32, i32, i32) {
    %c0_i32 = arith.constant 0 : i32
    %c0_i32_0 = arith.constant 0 : i32
    %c0_i32_1 = arith.constant 0 : i32
    return %arg0, %c0_i32, %c0_i32_0 : i32, i32, i32
  }
  func.func @transform_32(%arg0: i32, %arg1: i32) -> (i32, i32, i32) {
    %c0_i32 = arith.constant 0 : i32
    %c0_i32_0 = arith.constant 0 : i32
    %c0_i32_1 = arith.constant 0 : i32
    return %arg0, %c0_i32, %c0_i32_0 : i32, i32, i32
  }
}

</mosaic_0001>

<bundles_post_ra>
// kernel: tpu_custom_call.1
= control target key start
LH: loop header
LB: loop body
LE: loop exit
PB: predicated region body
PF: predicated region fallthrough
CT: control target
= control target key end

     0   :  { %s6778_s6 = smov 1   ;;  %s6779_s10 = smov 2   ;;  %s7884_s0 = inlined_call_operand.smem [shape: u32[33], index: -1, kind: input, shape index: {}] }
   0x1   :  { %s6846_s5 = sld [smem:[%s7884_s0]]   ;;  %s6780_s14 = smov 3  }
   0x2   :  { %s6851_s9 = sld [smem:[%s7884_s0 + %s6778_s6]]   ;;  %s6781_s18 = smov 4  }
   0x3   :  { %s6856_s13 = sld [smem:[%s7884_s0 + %s6779_s10]]   ;;  %s6782_s22 = smov 5  }
   0x4   :  { %s6861_s17 = sld [smem:[%s7884_s0 + %s6780_s14]]   ;;  %s6783_s26 = smov 6  }
   0x5   :  { %s6866_s21 = sld [smem:[%s7884_s0 + %s6781_s18]]   ;;  %s6784_s30 = smov 7  }
   0x6   :  { %s6871_s25 = sld [smem:[%s7884_s0 + %s6782_s22]]   ;;  %s6785_s4 = smov 8  }
   0x7   :  { %7914 = sst [smem:[#allocation40_spill]] %s6846_s5  ;;  %s6786_s10 = smov 9  }
   0x8   :  { %7915 = sst [smem:[#allocation41_spill]] %s6851_s9  ;;  %s6787_s15 = smov 10  }
   0x9   :  { %s6876_s29 = sld [smem:[%s7884_s0 + %s6783_s26]]   ;;  %s6788_s20 = smov 11  }
   0xa   :  { %s6881_s3 = sld [smem:[%s7884_s0 + %s6784_s30]]   ;;  %s6789_s26 = smov 12  }
   0xb   :  { %s6886_s8 = sld [smem:[%s7884_s0 + %s6785_s4]]   ;;  %s6790_s1 = smov 13  }
   0xc   :  { %s6891_s14 = sld [smem:[%s7884_s0 + %s6786_s10]]   ;;  %s6791_s7 = smov 14  }
   0xd   :  { %s6896_s19 = sld [smem:[%s7884_s0 + %s6787_s15]]   ;;  %s6792_s15 = smov 15  }
   0xe   :  { %s6901_s24 = sld [smem:[%s7884_s0 + %s6788_s20]]   ;;  %s6793_s22 = smov 16  }
   0xf   :  { %s6906_s30 = sld [smem:[%s7884_s0 + %s6789_s26]]   ;;  %s6794_s28 = smov 17  }
  0x10   :  { %7916 = sst [smem:[#allocation42_spill]] %s6881_s3 }
  0x11   :  { %7917 = sst [smem:[#allocation43_spill]] %s6886_s8 }
  0x12   :  { %7918 = sst [smem:[#allocation44_spill]] %s6891_s14 }
  0x13   :  { %s6911_s6 = sld [smem:[%s7884_s0 + %s6790_s1]]  }
  0x14   :  { %s6916_s12 = sld [smem:[%s7884_s0 + %s6791_s7]]   ;;  %s6795_s7 = smov 18  }
  0x15   :  { %s6921_s20 = sld [smem:[%s7884_s0 + %s6792_s15]]   ;;  %s6796_s15 = smov 19  }
  0x16   :  { %s6926_s27 = sld [smem:[%s7884_s0 + %s6793_s22]]   ;;  %s6797_s22 = smov 20  }
  0x17   :  { %s6931_s4 = sld [smem:[%s7884_s0 + %s6794_s28]]   ;;  %s6798_s28 = smov 21  }
  0x18   :  { %s6936_s14 = sld [smem:[%s7884_s0 + %s6795_s7]]   ;;  %s6799_s7 = smov 22  }
  0x19   :  { %7919 = sst [smem:[#allocation45_spill]] %s6911_s6 }
  0x1a   :  { %7920 = sst [smem:[#allocation46_spill]] %s6916_s12 }
  0x1b   :  { %s6941_s6 = sld [smem:[%s7884_s0 + %s6796_s15]]   ;;  %s6800_s15 = smov 23  }
  0x1c   :  { %s6946_s9 = sld [smem:[%s7884_s0 + %s6797_s22]]   ;;  %s6801_s22 = smov 24  }
  0x1d   :  { %7921 = sst [smem:[#allocation47_spill]] %s6931_s4 }
  0x1e   :  { %7922 = sst [smem:[#allocation48_spill]] %s6936_s14 }
  0x1f   :  { %s6951_s4 = sld [smem:[%s7884_s0 + %s6798_s28]]   ;;  %s6802_s28 = smov 25  }
  0x20   :  { %s6956_s14 = sld [smem:[%s7884_s0 + %s6799_s7]]   ;;  %s6803_s7 = smov 26  }
  0x21   :  { %7923 = sst [smem:[#allocation49_spill]] %s6941_s6 }
  0x22   :  { %7924 = sst [smem:[#allocation50_spill]] %s6946_s9 }
  0x23   :  { %s6961_s5 = sld [smem:[%s7884_s0 + %s6800_s15]]   ;;  %s6804_s15 = smov 27  }
  0x24   :  { %s6966_s9 = sld [smem:[%s7884_s0 + %s6801_s22]]   ;;  %s6805_s22 = smov 28  }
  0x25   :  { %7925 = sst [smem:[#allocation51_spill]] %s6951_s4 }
  0x26   :  { %7926 = sst [smem:[#allocation52_spill]] %s6956_s14 }
  0x27   :  { %s6971_s4 = sld [smem:[%s7884_s0 + %s6802_s28]]   ;;  %s6806_s28 = smov 29  }
  0x28   :  { %s6976_s14 = sld [smem:[%s7884_s0 + %s6803_s7]]   ;;  %s6807_s7 = smov 30  }
  0x29   :  { %7927 = sst [smem:[#allocation53_spill]] %s6961_s5 }
  0x2a   :  { %7928 = sst [smem:[#allocation54_spill]] %s6966_s9 }
  0x2b   :  { %s6981_s5 = sld [smem:[%s7884_s0 + %s6804_s15]]   ;;  %s6808_s15 = smov 31  }
  0x2c   :  { %s6986_s9 = sld [smem:[%s7884_s0 + %s6805_s22]]   ;;  %s6809_s22 = smov 32  }
  0x2d   :  { %7929 = sst [smem:[#allocation55_spill]] %s6971_s4 }
  0x2e   :  { %7930 = sst [smem:[#allocation56_spill]] %s6976_s14 }
  0x2f   :  { %s6991_s4 = sld [smem:[%s7884_s0 + %s6806_s28]]  }
  0x30   :  { %s6996_s14 = sld [smem:[%s7884_s0 + %s6807_s7]]  }
  0x31   :  { %7931 = sst [smem:[#allocation57_spill]] %s6981_s5 }
  0x32   :  { %7932 = sst [smem:[#allocation58_spill]] %s6986_s9 }
  0x33   :  { %s7001_s5 = sld [smem:[%s7884_s0 + %s6808_s15]]  }
  0x34   :  { %s7006_s9 = sld [smem:[%s7884_s0 + %s6809_s22]]  }
  0x35   :  { %7933 = sst [smem:[#allocation59_spill]] %s6991_s4 }
  0x36   :  { %7934 = sst [smem:[#allocation60_spill]] %s6996_s14 }
  0x39   :  { %7935 = sst [smem:[#allocation61_spill]] %s7001_s5 }
  0x3a   :  { %7936 = sst [smem:[#allocation62_spill]] %s7006_s9 }
  0x3b   :  { %71 = vsyncpa [#allocation5], 0 }
  0x3c   :  { %72 = vsyncpa [#allocation8], 0 }
  0x3d   :  { %73 = vsyncpa [#allocation11], 0 }
  0x3e   :  { %74 = vsyncpa [#allocation14], 0 }
  0x3f   :  { %75 = vsyncpa [#allocation17], 0 }
  0x40   :  { %76 = vsyncpa [#allocation20], 0 }
  0x41   :  { %77 = vsyncpa [#allocation23], 0 }
  0x42   :  { %78 = vsyncpa [#allocation26], 0 }
  0x43   :  { %79 = vsyncpa [#allocation6], 0 }
  0x44   :  { %81 = vsyncpa [#allocation6 + $0x1], 0 }
  0x45   :  { %82 = vsyncpa [#allocation29], 0 }
  0x46   :  { %84 = vsyncpa [#allocation29 + $0x1], 0  ;;  %s7008_s28 = smov 0   ;;  %s7010_s1 = smov 0  }
  0x47   :  { %s7012_s2 = smov 0   ;;  %s7014_s0 = smov 0  }
  0x48   :  { %s7016_s7 = smov 0   ;;  %s7018_s10 = smov 0  }
  0x49   :  { %s7020_s11 = smov 0   ;;  %s7022_s15 = smov 0  }
  0x4a LB: > { %s7937_s12 = sld [smem:[#allocation46_spill]]  ;;  %s7938_s8 = sld [smem:[#allocation43_spill]]  ;;  %s6760_s0 = sphi %s7014_s0, %s7990_s0   ;;  %s6756_s2 = sphi %s7012_s2, %s7989_s2   ;;  %s6752_s1 = sphi %s7010_s1, %s7995_s1   ;;  %s6748_s28 = sphi %s7008_s28, %s7994_s28   ;;  %s6776_s15 = sphi %s7022_s15, %s90_s15   ;;  %s6772_s11 = sphi %s7020_s11, %s7993_s11   ;;  %s6768_s10 = sphi %s7018_s10, %s7992_s10   ;;  %s6764_s7 = sphi %s7016_s7, %s7991_s7  }
  0x4b   : > { %s7939_s6 = sld [smem:[#allocation49_spill]]  ;;  %s7940_s3 = sld [smem:[#allocation42_spill]] }
  0x4c   : > { %7941 = sst [smem:[#allocation63_spill]] %s6748_s28  ;;  %s5486_s16 = sadd.s32 4294967295, %s6776_s15  }
  0x4d   : > { %7942 = sst [smem:[#allocation64_spill]] %s6756_s2  ;;  %s5487_s18 = sadd.s32 4294967294, %s6776_s15  }
  0x4e   : > { %7943 = sst [smem:[#allocation65_spill]] %s6768_s10  ;;  %s99_s22 = sadd.s32 1, %s6768_s10 }
  0x4f   : > { %7944 = sst [smem:[#allocation66_spill]] %s6772_s11  ;;  %s102_s23 = sadd.s32 1, %s6772_s11 }
  0x50   : > { %7945 = sst [smem:[#allocation67_spill]] %s6776_s15  ;;  %p100_p0 = scmp.ge.s32.totalorder %s99_s22, 2 }
  0x51   : > { %s770_s26 = sadd.s32 1, %s6756_s2  ;;  %p780_p1 = scmp.ne.s32.totalorder %s6756_s2, %s6752_s1 }
  0x52   : > { %p781_p2 = scmp.eq.s32.totalorder %s5486_s16, 3  ;;  %s7997_s22 = smov (%p100_p0, %s99_s22), 0 }
  0x53   : > { %7946 = sst [smem:[#allocation68_spill]] %s7997_s22  ;;  %s7999_s23 = smov (!%p100_p0, %s102_s23), %s6772_s11 }
  0x54   : > { %p7058_p3 = por %p781_p2, %p780_p1  ;;  %p786_p4 = scmp.ne.s32.totalorder %s6752_s1, %s6748_s28 }
  0x55   : > { %p104_p5 = scmp.ge.s32.totalorder %s7999_s23, 2  ;;  %p787_p6 = scmp.eq.s32.totalorder %s5487_s18, 3 }
  0x56   : > { %s7947_s9 = scalar_select %p7058_p3, 1, 0 }
  0x57   : > { %p5488_p7 = scmp.ge.s32.totalorder %s6776_s15, 1  ;;  %p820_p8 = scmp.lt.s32.totalorder %s6776_s15, 5 }
  0x58   : > { %7948 = sst [smem:[#allocation69_spill]] %s7947_s9  ;;  %s8001_s23 = smov (%p104_p5, %s7999_s23), 0 }
  0x59   : > { %7949 = sst [smem:[#allocation70_spill]] %s8001_s23  ;;  %p7068_p9 = por %p787_p6, %p786_p4 }
  0x5a   : > { %p7072_p10 = pnand %p5488_p7, %p820_p8  ;;  %s767_s28 = ssub.s32 %s6772_s11, %s8001_s23 }
  0x5b   : > { %s7950_s10 = scalar_select %p7068_p9, 1, 0 }
  0x5c   : > { %s7952_s22 = scalar_select %p7072_p10, 1, 0 }
  0x5d   : > { %7951 = sst [smem:[#allocation71_spill]] %s7950_s10  ;;  %p768_p11 = scmp.eq.s32.totalorder %s767_s28, 0 }
  0x5e   : > { %p5967_p12 = pneg %p7072_p10  ;;  %p7080_p13 = scmp.eq.s32.totalorder %s5486_s16, 0 }
  0x5f   : > { %s7085_s15 = scalar_select %p768_p11, %s6756_s2, %s770_s26  }
  0x60   : > { %s7953_s18 = scalar_select %p7080_p13, 1, 0 }
  0x61   : > { %7954 = sst [smem:[#allocation72_spill]] %s7085_s15  ;;  %p7089_p0 = pnand %p7080_p13, %p5967_p12 }
  0x62   : > { %s6810_s9 = smov [#allocation7]   ;;  %s6226_s23 = scalar_lea.hbm %s6861_s17, 256 }
  0x63   : > { %s843_s5 = sshll.u32 %s6810_s9, 4  ;;  %p6227_p1 = scmp.ne.s32.totalorder %s6861_s17, %s6226_s23  ;;  %s844_s5 = int_to_ptr.vmem [resolvable:$true] %s843_s5 }
  0x64   : > { %p7097_p2 = pneg %p7089_p0  ;;  %p6233_p6 = scmp.lt.u32.totalorder %s6226_s23, %s6861_s17 }
  0x66   : > { %p6229_p4 = pnand %p7097_p2, %p6227_p1 }
  0x68   : > { %p6230_p5 = pneg %p6229_p4 }
  0x6a   : > { %p6235_p7 = pnand %p6233_p6, %p6230_p5 }
  0x6c   : > { %6238 = shalt.err (!%p6235_p7)
}
  0x6d   : > { %s6239_s16 = scalar_lea.vmem %s844_s5, 256  ;;  %p6247_p9 = scmp.lt.s32.totalorder %s844_s5, %s844_s5 }
  0x6e   : > { %p6240_p8 = scmp.ne.s32.totalorder %s844_s5, %s6239_s16  ;;  %p6248_p3 = scmp.lt.s32.totalorder %s6239_s16, %s6239_s16 }
  0x70   : > { %p6242_p11 = pnand %p6240_p8, %p7097_p2  ;;  %p6249_p13 = por %p6248_p3, %p6247_p9 }
  0x72   : > { %p6243_p12 = pneg %p6242_p11 }
  0x74   : > { %p6250_p10 = pnand %p6249_p13, %p6243_p12 }
  0x76   : > { %6253 = shalt.err (!%p6250_p10)
}
  0x77   : > { %s7905_s9 = smov 64   ;;  %s7907_s23 = smov 4  }
  0x78   : > { %5973 = dma.hbm_to_vmem [thread:$0]  (!%p7089_p0), %s6861_s17, 256, %s844_s5, [#allocation8], %s7905_s9, %s7905_s9, %s7907_s23  }
  0x79   : > { %s6813_s26 = smov [#allocation10]   ;;  %s6814_s15 = smov [#allocation13]  }
  0x7a   : > { %s869_s11 = sshll.u32 %s6813_s26, 4  ;;  %s894_s16 = sshll.u32 %s6814_s15, 4  ;;  %s870_s11 = int_to_ptr.vmem [resolvable:$true] %s869_s11  ;;  %s7112_s16 = int_to_ptr.vmem [resolvable:$true] %s894_s16 }
  0x7b   : > { %s6254_s2 = scalar_lea.hbm %s6871_s25, 256 }
  0x7c   : > { %p6255_p3 = scmp.ne.s32.totalorder %s6871_s25, %s6254_s2  ;;  %p6261_p13 = scmp.lt.u32.totalorder %s6254_s2, %s6871_s25 }
  0x7e   : > { %p6257_p9 = pnand %p6255_p3, %p7097_p2 }
  0x80   : > { %p6258_p10 = pneg %p6257_p9 }
  0x82   : > { %p6263_p1 = pnand %p6261_p13, %p6258_p10 }
  0x84   : > { %6266 = shalt.err (!%p6263_p1)
}
  0x85   : > { %s6267_s14 = scalar_lea.vmem %s870_s11, 256  ;;  %p6275_p7 = scmp.lt.s32.totalorder %s870_s11, %s870_s11 }
  0x86   : > { %p6268_p4 = scmp.ne.s32.totalorder %s870_s11, %s6267_s14  ;;  %p6276_p8 = scmp.lt.s32.totalorder %s6267_s14, %s6267_s14 }
  0x88   : > { %p6270_p5 = pnand %p6268_p4, %p7097_p2  ;;  %p6277_p11 = por %p6276_p8, %p6275_p7 }
  0x8a   : > { %p6271_p6 = pneg %p6270_p5 }
  0x8c   : > { %p6278_p12 = pnand %p6277_p11, %p6271_p6 }
  0x8e   : > { %6281 = shalt.err (!%p6278_p12)
}
  0x8f   : > { %5979 = dma.hbm_to_vmem [thread:$0]  (!%p7089_p0), %s6871_s25, 256, %s870_s11, [#allocation11], %s7905_s9, %s7905_s9, %s7907_s23  }
  0x90   : > { %s6282_s5 = scalar_lea.hbm %s7940_s3, 16 }
  0x91   : > { %p6283_p3 = scmp.ne.s32.totalorder %s7940_s3, %s6282_s5  ;;  %p6289_p13 = scmp.lt.u32.totalorder %s6282_s5, %s7940_s3 }
  0x93   : > { %p6285_p9 = pnand %p6283_p3, %p7097_p2 }
  0x95   : > { %p6286_p10 = pneg %p6285_p9 }
  0x97   : > { %p6291_p1 = pnand %p6289_p13, %p6286_p10 }
  0x99   : > { %6294 = shalt.err (!%p6291_p1)
}
  0x9a   : > { %s6295_s14 = scalar_lea.vmem %s7112_s16, 16  ;;  %s6302_s2 = scalar_lea.vmem %s7112_s16, 32 }
  0x9b   : > { %p6296_p4 = scmp.ne.s32.totalorder %s7112_s16, %s6295_s14  ;;  %p6303_p7 = scmp.lt.s32.totalorder %s7112_s16, %s7112_s16 }
  0x9c   : > { %p6304_p8 = scmp.lt.s32.totalorder %s6302_s2, %s6295_s14 }
  0x9d   : > { %p6298_p5 = pnand %p6296_p4, %p7097_p2 }
  0x9e   : > { %p6305_p11 = por %p6304_p8, %p6303_p7 }
  0x9f   : > { %p6299_p6 = pneg %p6298_p5 }
  0xa1   : > { %p6306_p12 = pnand %p6305_p11, %p6299_p6 }
  0xa3   : > { %6309 = shalt.err (!%p6306_p12)
}
  0xa4   : > { %5985 = dma.hbm_to_vmem [thread:$0]  (!%p7089_p0), %s7940_s3, 16, %s7112_s16, [#allocation14]  }
  0xa5   : > { %s6815_s11 = smov [#allocation16]   ;;  %s6816_s26 = smov [#allocation19]  }
  0xa6   : > { %s919_s15 = sshll.u32 %s6815_s11, 4  ;;  %s942_s5 = sshll.u32 %s6816_s26, 4  ;;  %s920_s15 = int_to_ptr.vmem [resolvable:$true] %s919_s15  ;;  %s7143_s5 = int_to_ptr.vmem [resolvable:$true] %s942_s5 }
  0xa7   : > { %s6310_s14 = scalar_lea.hbm %s6896_s19, 16 }
  0xa8   : > { %p6311_p3 = scmp.ne.s32.totalorder %s6896_s19, %s6310_s14  ;;  %p6317_p13 = scmp.lt.u32.totalorder %s6310_s14, %s6896_s19 }
  0xaa   : > { %p6313_p9 = pnand %p6311_p3, %p7097_p2 }
  0xac   : > { %p6314_p10 = pneg %p6313_p9 }
  0xae   : > { %p6319_p1 = pnand %p6317_p13, %p6314_p10 }
  0xb0   : > { %6322 = shalt.err (!%p6319_p1)
}
  0xb1   : > { %s6323_s2 = scalar_lea.vmem %s920_s15, 16  ;;  %s6330_s16 = scalar_lea.vmem %s920_s15, 32 }
  0xb2   : > { %p6324_p4 = scmp.ne.s32.totalorder %s920_s15, %s6323_s2  ;;  %p6331_p7 = scmp.lt.s32.totalorder %s920_s15, %s920_s15 }
  0xb3   : > { %p6332_p8 = scmp.lt.s32.totalorder %s6330_s16, %s6323_s2 }
  0xb4   : > { %p6326_p5 = pnand %p6324_p4, %p7097_p2 }
  0xb5   : > { %p6333_p11 = por %p6332_p8, %p6331_p7 }
  0xb6   : > { %p6327_p6 = pneg %p6326_p5 }
  0xb8   : > { %p6334_p12 = pnand %p6333_p11, %p6327_p6 }
  0xba   : > { %6337 = shalt.err (!%p6334_p12)
}
  0xbb   : > { %5991 = dma.hbm_to_vmem [thread:$0]  (!%p7089_p0), %s6896_s19, 16, %s920_s15, [#allocation17]  }
  0xbc   : > { %s6338_s11 = scalar_lea.hbm %s6906_s30, 256 }
  0xbd   : > { %p6339_p3 = scmp.ne.s32.totalorder %s6906_s30, %s6338_s11  ;;  %p6345_p13 = scmp.lt.u32.totalorder %s6338_s11, %s6906_s30 }
  0xbf   : > { %p6341_p9 = pnand %p6339_p3, %p7097_p2 }
  0xc1   : > { %p6342_p10 = pneg %p6341_p9 }
  0xc3   : > { %p6347_p1 = pnand %p6345_p13, %p6342_p10 }
  0xc5   : > { %6350 = shalt.err (!%p6347_p1)
}
  0xc6   : > { %s6351_s26 = scalar_lea.vmem %s7143_s5, 256  ;;  %p6359_p7 = scmp.lt.s32.totalorder %s7143_s5, %s7143_s5 }
  0xc7   : > { %p6352_p4 = scmp.ne.s32.totalorder %s7143_s5, %s6351_s26  ;;  %p6360_p8 = scmp.lt.s32.totalorder %s6351_s26, %s6351_s26 }
  0xc9   : > { %p6354_p5 = pnand %p6352_p4, %p7097_p2  ;;  %p6361_p11 = por %p6360_p8, %p6359_p7 }
  0xcb   : > { %p6355_p6 = pneg %p6354_p5 }
  0xcd   : > { %p6362_p12 = pnand %p6361_p11, %p6355_p6 }
  0xcf   : > { %6365 = shalt.err (!%p6362_p12)
}
  0xd0   : > { %5997 = dma.hbm_to_vmem [thread:$0]  (!%p7089_p0), %s6906_s30, 256, %s7143_s5, [#allocation20], %s7905_s9, %s7905_s9, %s7907_s23  }
  0xd1   : > { %s6817_s15 = smov [#allocation22]   ;;  %s6366_s2 = scalar_lea.hbm %s6921_s20, 16 }
  0xd2   : > { %s970_s14 = sshll.u32 %s6817_s15, 4  ;;  %p6367_p3 = scmp.ne.s32.totalorder %s6921_s20, %s6366_s2  ;;  %s971_s14 = int_to_ptr.vmem [resolvable:$true] %s970_s14 }
  0xd3   : > { %p6373_p13 = scmp.lt.u32.totalorder %s6366_s2, %s6921_s20 }
  0xd4   : > { %p6369_p9 = pnand %p6367_p3, %p7097_p2 }
  0xd6   : > { %p6370_p10 = pneg %p6369_p9 }
  0xd8   : > { %p6375_p1 = pnand %p6373_p13, %p6370_p10 }
  0xda   : > { %6378 = shalt.err (!%p6375_p1)
}
  0xdb   : > { %s6379_s16 = scalar_lea.vmem %s971_s14, 16  ;;  %s6386_s11 = scalar_lea.vmem %s971_s14, 32 }
  0xdc   : > { %p6380_p4 = scmp.ne.s32.totalorder %s971_s14, %s6379_s16  ;;  %p6387_p7 = scmp.lt.s32.totalorder %s971_s14, %s971_s14 }
  0xdd   : > { %p6388_p8 = scmp.lt.s32.totalorder %s6386_s11, %s6379_s16 }
  0xde   : > { %p6382_p5 = pnand %p6380_p4, %p7097_p2 }
  0xdf   : > { %p6389_p11 = por %p6388_p8, %p6387_p7 }
  0xe0   : > { %p6383_p6 = pneg %p6382_p5 }
  0xe2   : > { %p6390_p12 = pnand %p6389_p11, %p6383_p6 }
  0xe4   : > { %6393 = shalt.err (!%p6390_p12)
}
  0xe5   : > { %6003 = dma.hbm_to_vmem [thread:$0]  (!%p7089_p0), %s6921_s20, 16, %s971_s14, [#allocation23]  }
  0xe6   : > { %s6818_s5 = smov [#allocation4]   ;;  %s6819_s15 = smov [#allocation9]  }
  0xe7   : > { %s833_s26 = sshll.u32 %s6818_s5, 4  ;;  %s856_s2 = sshll.u32 %s6819_s15, 4  ;;  %s834_s26 = int_to_ptr.vmem [resolvable:$true] %s833_s26  ;;  %s857_s2 = int_to_ptr.vmem [resolvable:$true] %s856_s2 }
  0xe8   : > { %s6394_s9 = scalar_lea.hbm %s6856_s13, 128 }
  0xe9   : > { %p6395_p3 = scmp.ne.s32.totalorder %s6856_s13, %s6394_s9  ;;  %p6401_p13 = scmp.lt.u32.totalorder %s6394_s9, %s6856_s13 }
  0xeb   : > { %p6397_p9 = pnand %p6395_p3, %p7097_p2 }
  0xed   : > { %p6398_p10 = pneg %p6397_p9 }
  0xef   : > { %p6403_p1 = pnand %p6401_p13, %p6398_p10 }
  0xf1   : > { %6406 = shalt.err (!%p6403_p1)
}
  0xf2   : > { %s6407_s16 = scalar_lea.vmem %s834_s26, 128  ;;  %p6415_p7 = scmp.lt.s32.totalorder %s834_s26, %s834_s26 }
  0xf3   : > { %p6408_p4 = scmp.ne.s32.totalorder %s834_s26, %s6407_s16  ;;  %p6416_p8 = scmp.lt.s32.totalorder %s6407_s16, %s6407_s16 }
  0xf5   : > { %p6410_p5 = pnand %p6408_p4, %p7097_p2  ;;  %p6417_p11 = por %p6416_p8, %p6415_p7 }
  0xf7   : > { %p6411_p6 = pneg %p6410_p5 }
  0xf9   : > { %p6418_p12 = pnand %p6417_p11, %p6411_p6 }
  0xfb   : > { %6421 = shalt.err (!%p6418_p12)
}
  0xfc   : > { %5970 = dma.hbm_to_vmem [thread:$0]  (!%p7089_p0), %s6856_s13, 128, %s834_s26, [#allocation5]  }
  0xfd   : > { %s6422_s9 = scalar_lea.hbm %s6866_s21, 256 }
  0xfe   : > { %p6423_p3 = scmp.ne.s32.totalorder %s6866_s21, %s6422_s9  ;;  %p6429_p13 = scmp.lt.u32.totalorder %s6422_s9, %s6866_s21 }
 0x100   : > { %p6425_p9 = pnand %p6423_p3, %p7097_p2 }
 0x102   : > { %p6426_p10 = pneg %p6425_p9 }
 0x104   : > { %p6431_p1 = pnand %p6429_p13, %p6426_p10 }
 0x106   : > { %6434 = shalt.err (!%p6431_p1)
}
 0x107   : > { %s6435_s14 = scalar_lea.vmem %s857_s2, 256  ;;  %p6443_p7 = scmp.lt.s32.totalorder %s857_s2, %s857_s2 }
 0x108   : > { %p6436_p4 = scmp.ne.s32.totalorder %s857_s2, %s6435_s14  ;;  %p6444_p8 = scmp.lt.s32.totalorder %s6435_s14, %s6435_s14 }
 0x10a   : > { %p6438_p5 = pnand %p6436_p4, %p7097_p2  ;;  %p6445_p11 = por %p6444_p8, %p6443_p7 }
 0x10c   : > { %p6439_p6 = pneg %p6438_p5 }
 0x10e   : > { %p6446_p12 = pnand %p6445_p11, %p6439_p6 }
 0x110   : > { %6449 = shalt.err (!%p6446_p12)
}
 0x111   : > { %s7957_s11 = smov 64   ;;  %s6820_s5 = smov [#allocation12]  }
 0x112   : > { %5976 = dma.hbm_to_vmem [thread:$0]  (!%p7089_p0), %s6866_s21, 256, %s857_s2, [#allocation8], %s7957_s11, %s7957_s11, %s7907_s23  }
 0x113   : > { %s883_s26 = sshll.u32 %s6820_s5, 4  ;;  %s6821_s15 = smov [#allocation15]   ;;  %s884_s26 = int_to_ptr.vmem [resolvable:$true] %s883_s26 }
 0x114   : > { %s905_s16 = sshll.u32 %s6821_s15, 4  ;;  %s6450_s9 = scalar_lea.hbm %s6876_s29, 16  ;;  %s906_s16 = int_to_ptr.vmem [resolvable:$true] %s905_s16 }
 0x115   : > { %p6451_p3 = scmp.ne.s32.totalorder %s6876_s29, %s6450_s9  ;;  %p6457_p13 = scmp.lt.u32.totalorder %s6450_s9, %s6876_s29 }
 0x117   : > { %p6453_p9 = pnand %p6451_p3, %p7097_p2 }
 0x119   : > { %p6454_p10 = pneg %p6453_p9 }
 0x11b   : > { %p6459_p1 = pnand %p6457_p13, %p6454_p10 }
 0x11d   : > { %6462 = shalt.err (!%p6459_p1)
}
 0x11e   : > { %s6463_s14 = scalar_lea.vmem %s884_s26, 16  ;;  %s6470_s2 = scalar_lea.vmem %s884_s26, 32 }
 0x11f   : > { %p6464_p4 = scmp.ne.s32.totalorder %s884_s26, %s6463_s14  ;;  %p6471_p7 = scmp.lt.s32.totalorder %s884_s26, %s884_s26 }
 0x120   : > { %p6472_p8 = scmp.lt.s32.totalorder %s6470_s2, %s6463_s14 }
 0x121   : > { %p6466_p5 = pnand %p6464_p4, %p7097_p2 }
 0x122   : > { %p6473_p11 = por %p6472_p8, %p6471_p7 }
 0x123   : > { %p6467_p6 = pneg %p6466_p5 }
 0x125   : > { %p6474_p12 = pnand %p6473_p11, %p6467_p6 }
 0x127   : > { %6477 = shalt.err (!%p6474_p12)
}
 0x128   : > { %5982 = dma.hbm_to_vmem [thread:$0]  (!%p7089_p0), %s6876_s29, 16, %s884_s26, [#allocation11]  }
 0x129   : > { %s6478_s5 = scalar_lea.hbm %s7938_s8, 16 }
 0x12a   : > { %p6479_p3 = scmp.ne.s32.totalorder %s7938_s8, %s6478_s5  ;;  %p6485_p13 = scmp.lt.u32.totalorder %s6478_s5, %s7938_s8 }
 0x12c   : > { %p6481_p9 = pnand %p6479_p3, %p7097_p2 }
 0x12e   : > { %p6482_p10 = pneg %p6481_p9 }
 0x130   : > { %p6487_p1 = pnand %p6485_p13, %p6482_p10 }
 0x132   : > { %6490 = shalt.err (!%p6487_p1)
}
 0x133   : > { %s6491_s15 = scalar_lea.vmem %s906_s16, 16  ;;  %s6498_s9 = scalar_lea.vmem %s906_s16, 32 }
 0x134   : > { %p6492_p4 = scmp.ne.s32.totalorder %s906_s16, %s6491_s15  ;;  %p6499_p7 = scmp.lt.s32.totalorder %s906_s16, %s906_s16 }
 0x135   : > { %p6500_p8 = scmp.lt.s32.totalorder %s6498_s9, %s6491_s15 }
 0x136   : > { %p6494_p5 = pnand %p6492_p4, %p7097_p2 }
 0x137   : > { %p6501_p11 = por %p6500_p8, %p6499_p7 }
 0x138   : > { %p6495_p6 = pneg %p6494_p5 }
 0x13a   : > { %p6502_p12 = pnand %p6501_p11, %p6495_p6 }
 0x13c   : > { %6505 = shalt.err (!%p6502_p12)
}
 0x13d   : > { %5988 = dma.hbm_to_vmem [thread:$0]  (!%p7089_p0), %s7938_s8, 16, %s906_s16, [#allocation14]  }
 0x13e   : > { %s6822_s26 = smov [#allocation18]   ;;  %s6823_s2 = smov [#allocation21]  }
 0x13f   : > { %s929_s14 = sshll.u32 %s6822_s26, 4  ;;  %s959_s5 = sshll.u32 %s6823_s2, 4  ;;  %s930_s14 = int_to_ptr.vmem [resolvable:$true] %s929_s14  ;;  %s960_s5 = int_to_ptr.vmem [resolvable:$true] %s959_s5 }
 0x140   : > { %s6506_s23 = scalar_lea.hbm %s6901_s24, 256 }
 0x141   : > { %p6507_p3 = scmp.ne.s32.totalorder %s6901_s24, %s6506_s23  ;;  %p6513_p13 = scmp.lt.u32.totalorder %s6506_s23, %s6901_s24 }
 0x143   : > { %p6509_p9 = pnand %p6507_p3, %p7097_p2 }
 0x145   : > { %p6510_p10 = pneg %p6509_p9 }
 0x147   : > { %p6515_p1 = pnand %p6513_p13, %p6510_p10 }
 0x149   : > { %6518 = shalt.err (!%p6515_p1)
}
 0x14a   : > { %s6519_s15 = scalar_lea.vmem %s930_s14, 256  ;;  %p6527_p7 = scmp.lt.s32.totalorder %s930_s14, %s930_s14 }
 0x14b   : > { %p6520_p4 = scmp.ne.s32.totalorder %s930_s14, %s6519_s15  ;;  %p6528_p8 = scmp.lt.s32.totalorder %s6519_s15, %s6519_s15 }
 0x14d   : > { %p6522_p5 = pnand %p6520_p4, %p7097_p2  ;;  %p6529_p11 = por %p6528_p8, %p6527_p7 }
 0x14f   : > { %p6523_p6 = pneg %p6522_p5 }
 0x151   : > { %p6530_p12 = pnand %p6529_p11, %p6523_p6 }
 0x153   : > { %6533 = shalt.err (!%p6530_p12)
}
 0x154   : > { %s7958_s16 = smov 4   ;;  %s6534_s23 = scalar_lea.hbm %s7937_s12, 16 }
 0x155   : > { %5994 = dma.hbm_to_vmem [thread:$0]  (!%p7089_p0), %s6901_s24, 256, %s930_s14, [#allocation17], %s7957_s11, %s7957_s11, %s7958_s16  }
 0x156   : > { %p6535_p3 = scmp.ne.s32.totalorder %s7937_s12, %s6534_s23  ;;  %p6541_p13 = scmp.lt.u32.totalorder %s6534_s23, %s7937_s12 }
 0x158   : > { %p6537_p9 = pnand %p6535_p3, %p7097_p2 }
 0x15a   : > { %p6538_p10 = pneg %p6537_p9 }
 0x15c   : > { %p6543_p1 = pnand %p6541_p13, %p6538_p10 }
 0x15e   : > { %6546 = shalt.err (!%p6543_p1)
}
 0x15f   : > { %s6547_s9 = scalar_lea.vmem %s960_s5, 16  ;;  %s6554_s26 = scalar_lea.vmem %s960_s5, 32 }
 0x160   : > { %p6548_p4 = scmp.ne.s32.totalorder %s960_s5, %s6547_s9  ;;  %p6555_p7 = scmp.lt.s32.totalorder %s960_s5, %s960_s5 }
 0x161   : > { %p6556_p8 = scmp.lt.s32.totalorder %s6554_s26, %s6547_s9 }
 0x162   : > { %p6550_p5 = pnand %p6548_p4, %p7097_p2 }
 0x163   : > { %p6557_p11 = por %p6556_p8, %p6555_p7 }
 0x164   : > { %p6551_p6 = pneg %p6550_p5 }
 0x166   : > { %p6558_p12 = pnand %p6557_p11, %p6551_p6 }
 0x168   : > { %6561 = shalt.err (!%p6558_p12)
}
 0x169   : > { %6000 = dma.hbm_to_vmem [thread:$0]  (!%p7089_p0), %s7937_s12, 16, %s960_s5, [#allocation20]  }
 0x16a   : > { %s6824_s14 = smov [#allocation24]   ;;  %s6825_s15 = smov [#allocation25]  }
 0x16b   : > { %s981_s2 = sshll.u32 %s6824_s14, 4  ;;  %s997_s23 = sshll.u32 %s6825_s15, 4  ;;  %s982_s2 = int_to_ptr.vmem [resolvable:$true] %s981_s2  ;;  %s998_s23 = int_to_ptr.vmem [resolvable:$true] %s997_s23 }
 0x16c   : > { %s6562_s3 = scalar_lea.hbm %s6926_s27, 16 }
 0x16d   : > { %p6563_p3 = scmp.ne.s32.totalorder %s6926_s27, %s6562_s3  ;;  %p6569_p13 = scmp.lt.u32.totalorder %s6562_s3, %s6926_s27 }
 0x16f   : > { %p6565_p9 = pnand %p6563_p3, %p7097_p2 }
 0x171   : > { %p6566_p10 = pneg %p6565_p9 }
 0x173   : > { %p6571_p1 = pnand %p6569_p13, %p6566_p10 }
 0x175   : > { %6574 = shalt.err (!%p6571_p1)
}
 0x176   : > { %s6575_s9 = scalar_lea.vmem %s982_s2, 16  ;;  %s6582_s5 = scalar_lea.vmem %s982_s2, 32 }
 0x177   : > { %p6576_p4 = scmp.ne.s32.totalorder %s982_s2, %s6575_s9  ;;  %p6583_p7 = scmp.lt.s32.totalorder %s982_s2, %s982_s2 }
 0x178   : > { %p6584_p8 = scmp.lt.s32.totalorder %s6582_s5, %s6575_s9 }
 0x179   : > { %p6578_p5 = pnand %p6576_p4, %p7097_p2 }
 0x17a   : > { %p6585_p11 = por %p6584_p8, %p6583_p7 }
 0x17b   : > { %p6579_p6 = pneg %p6578_p5 }
 0x17d   : > { %p6586_p12 = pnand %p6585_p11, %p6579_p6 }
 0x17f   : > { %6589 = shalt.err (!%p6586_p12)
}
 0x180   : > { %6006 = dma.hbm_to_vmem [thread:$0]  (!%p7089_p0), %s6926_s27, 16, %s982_s2, [#allocation23]  }
 0x181   : > { %s6590_s3 = scalar_lea.hbm %s7939_s6, 256 }
 0x182   : > { %p6591_p3 = scmp.ne.s32.totalorder %s7939_s6, %s6590_s3  ;;  %p6597_p13 = scmp.lt.u32.totalorder %s6590_s3, %s7939_s6 }
 0x184   : > { %p6593_p9 = pnand %p6591_p3, %p7097_p2 }
 0x186   : > { %p6594_p10 = pneg %p6593_p9 }
 0x188   : > { %p6599_p1 = pnand %p6597_p13, %p6594_p10 }
 0x18a   : > { %6602 = shalt.err (!%p6599_p1)
}
 0x18b   : > { %s6603_s26 = scalar_lea.vmem %s998_s23, 256  ;;  %p6611_p7 = scmp.lt.s32.totalorder %s998_s23, %s998_s23 }
 0x18c   : > { %p6604_p4 = scmp.ne.s32.totalorder %s998_s23, %s6603_s26  ;;  %p6612_p8 = scmp.lt.s32.totalorder %s6603_s26, %s6603_s26 }
 0x18e   : > { %p6606_p5 = pnand %p6604_p4, %p7097_p2  ;;  %p6613_p11 = por %p6612_p8, %p6611_p7 }
 0x190   : > { %p6607_p6 = pneg %p6606_p5 }
 0x192   : > { %p6614_p12 = pnand %p6613_p11, %p6607_p6 }
 0x194   : > { %6617 = shalt.err (!%p6614_p12)
}
 0x195   : > { %6009 = dma.hbm_to_vmem [thread:$0]  (!%p7089_p0), %s7939_s6, 256, %s998_s23, [#allocation26], %s7957_s11, %s7957_s11, %s7958_s16  }
 0x196   : > { %p7959_p3 = scmp.ne.s32.totalorder %s7952_s22, 0 }
 0x197   : > { %p7960_p9 = scmp.ne.s32.totalorder (!%p7959_p3), %s7953_s18, 0 }
 0x198   : > { %1061 = sbr.rel (%p7959_p3) target bundleno = 5428 (0x1534), region = 144 }
 0x19f   : > { %6707 = dma.done.wait (%p7960_p9), [#allocation5], 128  }
 0x1a0   : > { %6709 = vsyncadd (%p7960_p9), [#allocation5], 4294967168 }
 0x1a1   : > { %6711 = dma.done.wait (%p7960_p9), [#allocation8], 512  }
 0x1a2   : > { %6713 = vsyncadd (%p7960_p9), [#allocation8], 4294966784 }
 0x1a3   : > { %6715 = dma.done.wait (%p7960_p9), [#allocation11], 272  }
 0x1a4   : > { %6717 = vsyncadd (%p7960_p9), [#allocation11], 4294967024 }
 0x1a5   : > { %6719 = dma.done.wait (%p7960_p9), [#allocation14], 32  }
 0x1a6   : > { %6721 = vsyncadd (%p7960_p9), [#allocation14], 4294967264 }
 0x1a7   : > { %6723 = dma.done.wait (%p7960_p9), [#allocation17], 272  }
 0x1a8   : > { %6725 = vsyncadd (%p7960_p9), [#allocation17], 4294967024 }
 0x1a9   : > { %6727 = dma.done.wait (%p7960_p9), [#allocation20], 272  }
 0x1aa   : > { %6729 = vsyncadd (%p7960_p9), [#allocation20], 4294967024 }
 0x1ab   : > { %6731 = dma.done.wait (%p7960_p9), [#allocation23], 32  }
 0x1ac   : > { %6733 = vsyncadd (%p7960_p9), [#allocation23], 4294967264 }
 0x1ad   : > { %6735 = dma.done.wait (%p7960_p9), [#allocation26], 256  }
 0x1ae   : > { %6737 = vsyncadd (%p7960_p9), [#allocation26], 4294967040  ;;  %s7961_s10 = sld [smem:[#allocation40_spill]]  ;;  %s7962_s22 = sld [smem:[#allocation41_spill]] }
 0x1af   : > { %s7307_s28 = sand.u32 1, %s6752_s1   ;;  %p1204_p0 = scmp.lt.s32.totalorder %s6764_s7, 1 }
 0x1b0   : > { %s5519_s11 = sshll.u32 %s7307_s28, 3  ;;  %p5524_p2 = scmp.ne.s32.totalorder %s6760_s0, 0 }
 0x1b1   : > { %s1205_s16 = scalar_select %p1204_p0, %s6764_s7, 1 }
 0x1b2   : > { %s7314_s9 = scalar_lea.vmem [#allocation27], %s5519_s11  ;;  %s7316_s5 = scalar_lea.vmem [#allocation28], %s5519_s11  ;;  %v6168_v0 = vld [vmem:[#allocation19] sm:$0xff] (!%p5524_p2)   ;;  %v6826_v1 = vmov (!%p5524_p2), 0.0   ;;  %v6170_v3 = vld [vmem:[#allocation19 + $0x8] sm:$0xff] (!%p5524_p2)   ;;  %vm6827_vm0 = vmmov (!%p5524_p2), 0  }
 0x1b3   : > { %s5521_s14 = sshll.u32 %s1205_s16, 3  ;;  %s5620_s2 = sshll.u32 %s1205_s16, 4  ;;  %5695 = vmatprep.subr.bf16.mxu0 (!%p5524_p2), %v6826_v1  ;;  %5703 = vmatprep.subr.bf16.mxu1 (!%p5524_p2), %v6826_v1  ;;  %vm1219_vm1 = vcmask (!%p5524_p2), 261120   ;;  %v5525_v9 = vld [vmem:[#allocation22] ss:$0 sm:$0xff] (!%p5524_p2) }
 0x1b4   : > { %s1207_s15 = scalar_lea.vmem %s7961_s10, %s5521_s14  ;;  %s1212_s23 = scalar_lea.vmem %s7962_s22, %s5620_s2  ;;  %5696 = vmatpush3.bf16.msra.mxu0 (!%p5524_p2), %v6168_v0  ;;  %5699 = vmatprep.mubr.msk.bf16.mxu0 (!%p5524_p2), %vm6827_vm0, %v6826_v1  ;;  %v5529_v10 = vld [vmem:[#allocation24] ss:$0 sm:$0xff] (!%p5524_p2) }
 0x1b5   : > { %1217 = sbr.rel (%p5524_p2) target bundleno = 668 (0x29c), region = 204  ;;  %s7963_s18 = sld [smem:[#allocation45_spill]] (!%p5524_p2)  ;;  %5697 = vmatprep.subr.bf16.mxu0 (!%p5524_p2), %v6826_v1  ;;  %5707 = vmatprep.mubr.msk.bf16.mxu1 (!%p5524_p2), %vm6827_vm0, %v6826_v1  ;;  %v1218_v5 = vld [vmem:[%s1207_s15] sm:$0xff] (!%p5524_p2)  ;;  %v1222_v7 = vld [vmem:[%s1212_s23 + $0x8] sm:$0xff] (!%p5524_p2) }
 0x1b6   : > { %v1221_v6 = vld [vmem:[%s1212_s23] sm:$0xff] (!%p5524_p2)  ;;  %1220 = vst.msk [vmem:[%s7314_s9] sm:$0xff] (!%p5524_p2), %vm1219_vm1, %v1218_v5 }
 0x1b7   : > { %v1223_v8 = vpack.c.bf16 (!%p5524_p2), %v1222_v7, %v1221_v6 }
 0x1b8   : > { %5698 = vmatpush3.bf16.msra.mxu0 (!%p5524_p2), %v6170_v3 }
 0x1bb   : > { %v6169_v2 = vld [vmem:[%s7963_s18] sm:$0xff] (!%p5524_p2)   ;;  %v6171_v4 = vld [vmem:[%s7963_s18 + $0x8] sm:$0xff] (!%p5524_p2)   ;;  %5700 = vmatmul.mubr.msk.bf16.vlgmr.msra.gmra.mrb[0].mxu0 (!%p5524_p2), %vm1219_vm1, %v1223_v8 }
 0x1bc   : > { %5704 = vmatpush3.bf16.msra.mxu1 %v6169_v2 }
 0x1bd   : > { %5705 = vmatprep.subr.bf16.mxu1 %v6826_v1 }
 0x1c0   : > { %5706 = vmatpush3.bf16.msra.mxu1 %v6171_v4 }
 0x1c3   : > { %5708 = vmatmul.mubr.msk.bf16.vlgmr.msra.gmra.mrb[0].mxu1 %vm1219_vm1, %v1223_v8 }
 0x28e   : > { %v1284_v11 = vpop.f32.mrb[0].mxu0 }
 0x28f   : > { %v1285_v12 = vadd.f32 %v5525_v9, %v1284_v11  ;;  %v5701_v14 = vpop.f32.mrb[1].mxu0 }
 0x290   : > { %v1287_v17 = vpop.f32.mrb[2].mxu0 }
 0x291   : > { %1355 = vst.msk [vmem:[#allocation2] sm:$0xff] %vm1219_vm1, %v1285_v12  ;;  %v1288_v18 = vadd.f32 %v5525_v9, %v1287_v17  ;;  %v5702_v20 = vpop.f32.mrb[3].mxu0 }
 0x293   : > { %1356 = vst.msk [vmem:[#allocation2 + $0x8] sm:$0xff] %vm1219_vm1, %v1288_v18 }
 0x296   : > { %v1348_v13 = vpop.f32.mrb[0].mxu1 }
 0x297   : > { %v1349_v15 = vadd.f32 %v5529_v10, %v1348_v13  ;;  %v5709_v16 = vpop.f32.mrb[1].mxu1 }
 0x298   : > { %v1351_v19 = vpop.f32.mrb[2].mxu1 }
 0x299   : > { %1357 = vst.msk [vmem:[#allocation3] sm:$0xff] %vm1219_vm1, %v1349_v15  ;;  %v1352_v21 = vadd.f32 %v5529_v10, %v1351_v19  ;;  %v5710_v22 = vpop.f32.mrb[3].mxu1 }
 0x29b   : > { %1358 = vst.msk [vmem:[#allocation3 + $0x8] sm:$0xff] %vm1219_vm1, %v1352_v21 }
 0x29c PF: > { %v6172_v23 = vld [vmem:[#allocation9] sm:$0xff]   ;;  %v6828_v24 = vmov 0.0   ;;  %v6173_v25 = vld [vmem:[#allocation9 + $0x8] sm:$0xff]   ;;  %vm6829_vm2 = vmmov 0   ;;  %v6174_v27 = vld [vmem:[#allocation7] sm:$0xff]   ;;  %vm1384_vm3 = vcmask 261120   ;;  %v1569_v42 = vlaneseq }
 0x29d   : > { %5719 = vmatprep.subr.bf16.mxu1 %v6828_v24  ;;  %5711 = vmatprep.subr.bf16.mxu0 %v6828_v24  ;;  %v7334_v26 = vld [vmem:[%s7314_s9] sm:$0xff]  ;;  %s6830_s3 = smov 104   ;;  %s6831_s26 = smov 120   ;;  %v6833_v40 = vmov 1983009808   ;;  %vm2297_vm4 = vcmask 1043456  }
 0x29e   : > { %5720 = vmatpush3.bf16.msra.mxu1 %v6172_v23  ;;  %5723 = vmatprep.mubr.msk.bf16.mxu1 %vm6829_vm2, %v6828_v24  ;;  %v6175_v28 = vld [vmem:[#allocation7 + $0x8] sm:$0xff]   ;;  %v7341_v29 = vpack.c.bf16 %v7334_v26, %v7334_v26  ;;  %v5537_v30 = vld [vmem:[#allocation13] ss:$0 sm:$0xff]  ;;  %s6832_s10 = smov 112   ;;  %v1567_v41 = vunpack.c.l.s4 %v6833_v40  ;;  %v6834_v43 = vmov 1934713408  }
 0x29f   : > { %5721 = vmatprep.subr.bf16.mxu1 %v6828_v24  ;;  %5715 = vmatprep.mubr.msk.bf16.mxu0 %vm6829_vm2, %v6828_v24  ;;  %v1599_v44 = vunpack.c.l.s4 %v6834_v43  ;;  %v1570_v46 = vshrl.u32 %v1569_v42, 7  ;;  %v5533_v15 = vld [vmem:[#allocation12] ss:$0 sm:$0xff]  ;;  %vm2293_vm5 = vcmask 64512   ;;  %s7964_s22 = sld [smem:[#allocation44_spill]]  ;;  %s7965_s11 = sld [smem:[#allocation53_spill]] }
 0x2a0   : > { %5712 = vmatpush3.bf16.msra.mxu0 %v6174_v27  ;;  %v1568_v45 = vunpack.c.0.s8 %v1567_v41  ;;  %v6177_v41 = vld [vmem:[#allocation10 + $0x8] sm:$0xff]   ;;  %s7966_s16 = sld [smem:[#allocation54_spill]]  ;;  %vm4372_vm6 = vcmask 130048   ;;  %s7967_s14 = sld [smem:[#allocation47_spill]]  ;;  %vm5062_vm7 = vcmask 523264  }
 0x2a1   : > { %5713 = vmatprep.subr.bf16.mxu0 %v6828_v24  ;;  %v1600_v49 = vunpack.c.0.s8 %v1599_v44  ;;  %s7968_s2 = sld [smem:[#allocation48_spill]]  ;;  %s7969_s15 = sld [smem:[#allocation51_spill]] }
 0x2a2   : > { %5722 = vmatpush3.bf16.msra.mxu1 %v6173_v25  ;;  %v7357_v50 = vsub.s32 %v1568_v45, %v1570_v46  ;;  %p5611_p10 = scmp.ne.s32.totalorder %s6760_s0, 1 }
 0x2a3   : > { %5735 = vmatprep.subr.bf16.mxu1 %v6828_v24  ;;  %v7359_v56 = vsub.s32 %v1600_v49, %v1570_v46  ;;  %s7977_s4 = sld [smem:[#allocation59_spill]] (!%p5611_p10) }
 0x2a4   : > { %5714 = vmatpush3.bf16.msra.mxu0 %v6175_v28 }
 0x2a5   : > { %5724 = vmatmul.mubr.msk.bf16.vlgmr.msra.gmra.mrb[0].mxu1 %vm1384_vm3, %v7341_v29  ;;  %5727 = vmatprep.subr.bf16.mxu0 %v6828_v24 }
 0x2a6   : > { %5737 = vmatprep.mubr.msk.bf16.mxu1 %vm6829_vm2, %v6828_v24 }
 0x2a7   : > { %5716 = vmatmul.mubr.msk.bf16.vlgmr.msra.gmra.mrb[0].mxu0 %vm1384_vm3, %v7341_v29  ;;  %s7970_s23 = smov %s7969_s15 }
 0x2a8   : > { %5731 = vmatprep.mubr.msk.bf16.mxu0 %vm6829_vm2, %v6828_v24 }
 0x378   : > { %v1485_v31 = vpop.f32.mrb[0].mxu1 }
 0x379   : > { %v1486_v32 = vadd.f32 %v5537_v30, %v1485_v31  ;;  %v5725_v33 = vpop.f32.mrb[1].mxu1  ;;  %v6176_v31 = vld [vmem:[#allocation10] sm:$0xff]  }
 0x37a   : > { %v1488_v34 = vpop.f32.mrb[2].mxu1  ;;  %v1422_v36 = vpop.f32.mrb[0].mxu0  ;;  %5728 = vmatpush3.bf16.msra.mxu0 %v6176_v31 }
 0x37b   : > { %1647 = vrot.lane.b32.xlu1 %v1486_v32, %s6830_s3  ;;  %1641 = vrot.lane.b32.xlu0 %v1486_v32, %s6831_s26  ;;  %v5726_v35 = vpop.f32.mrb[3].mxu1  ;;  %v5717_v37 = vpop.f32.mrb[1].mxu0  ;;  %v7373_v18 = vadd.f32 %v5533_v15, %v1422_v36 }
 0x37c   : > { %v1425_v38 = vpop.f32.mrb[2].mxu0  ;;  %5729 = vmatprep.subr.bf16.mxu0 %v6828_v24 }
 0x37d   : > { %v5718_v39 = vpop.f32.mrb[3].mxu0 }
 0x37e   : > { %5730 = vmatpush3.bf16.msra.mxu0 %v6177_v41 }
 0x37f   : > { %1644 = vrot.lane.b32.xlu0 %v1486_v32, %s6832_s10  ;;  %5741 = vmatprep.subr.bf16.mxu0 %v6828_v24 }
 0x381   : > { %5732 = vmatmul.mubr.msk.bf16.vlgmr.msra.gmra.mrb[4].mxu0 %vm1384_vm3, %v7341_v29 }
 0x382   : > { %5743 = vmatprep.mubr.msk.bf16.mxu0 %vm6829_vm2, %v6828_v24 }
 0x3ed   : > { %v1648_v47 = vpop.permute.xlu1 %1647  ;;  %v1642_v48 = vpop.permute.xlu0 %1641 }
 0x3ee   : > { %v1666_v51 = vcombine.low %v1642_v48, %v1648_v47  ;;  %v1667_v52 = vcombine.high %v1642_v48, %v1648_v47 }
 0x3f0   : > { %v1674_v57 = vrot.slane %v1666_v51, %v7357_v50  ;;  %v1681_v58 = vrot.slane %v1667_v52, %v7357_v50  ;;  %v6835_v52 = vmov 0  }
 0x3f1   : > { %v1645_v53 = vpop.permute.xlu0 %1644 }
 0x3f2   : > { %v1650_v54 = vcombine.low %v1486_v32, %v1645_v53  ;;  %v1651_v55 = vcombine.high %v1486_v32, %v1645_v53 }
 0x3f4   : > { %v1658_v59 = vrot.slane %v1650_v54, %v7357_v50  ;;  %v1665_v60 = vrot.slane %v1651_v55, %v7357_v50 }
 0x3f6   : > { %v1683_v61 = vcombine.high %v1658_v59, %v1674_v57  ;;  %v1682_v62 = vcombine.low %v1658_v59, %v1674_v57  ;;  %v1698_v63 = vcombine.low %v1665_v60, %v1681_v58  ;;  %v1699_v2 = vcombine.high %v1665_v60, %v1681_v58 }
 0x3f8   : > { %v1697_v0 = vrot.slane %v1683_v61, %v7359_v56  ;;  %v1690_v1 = vrot.slane %v1682_v62, %v7359_v56  ;;  %v1706_v5 = vrot.slane %v1698_v63, %v7359_v56  ;;  %v1713_v9 = vrot.slane %v1699_v2, %v7359_v56 }
 0x3fa   : > { %v1720_v3 = vpack.c.bf16 %v1697_v0, %v1697_v0  ;;  %v1718_v4 = vpack.c.bf16 %v1690_v1, %v1690_v1  ;;  %v1715_v6 = vcombine.high %v1697_v0, %v6828_v24  ;;  %v1722_v7 = vpack.c.bf16 %v1706_v5, %v1706_v5 }
 0x3fb   : > { %v1716_v10 = vcombine.high %v1706_v5, %v6828_v24  ;;  %v1724_v11 = vpack.c.bf16 %v1713_v9, %v1713_v9  ;;  %v1717_v13 = vcombine.high %v1713_v9, %v6828_v24  ;;  %v1714_v14 = vcombine.high %v1690_v1, %v6828_v24 }
 0x3fc   : > { %1907 = vxpose.xlu0.c.b16.start.end [1/1] (short) (narrow) %v1720_v3, 16  ;;  %1875 = vxpose.xlu1.c.b16.start.end [1/1] (short) (narrow) %v1718_v4, 16  ;;  %v1721_v8 = vpack.c.bf16 %v1715_v6, %v1715_v6 }
 0x3fd   : > { %v1723_v12 = vpack.c.bf16 %v1716_v10, %v1716_v10  ;;  %v1725_v16 = vpack.c.bf16 %v1717_v13, %v1717_v13  ;;  %v1719_v17 = vpack.c.bf16 %v1714_v14, %v1714_v14 }
 0x400   : > { %1939 = vxpose.xlu0.c.b16.start.end [1/1] (short) (narrow) %v1722_v7, 16  ;;  %1923 = vxpose.xlu1.c.b16.start.end [1/1] (short) (narrow) %v1721_v8, 16 }
 0x404   : > { %1971 = vxpose.xlu0.c.b16.start.end [1/1] (short) (narrow) %v1724_v11, 16  ;;  %1955 = vxpose.xlu1.c.b16.start.end [1/1] (short) (narrow) %v1723_v12, 16 }
 0x408   : > { %1987 = vxpose.xlu1.c.b16.start.end [1/1] (short) (narrow) %v1725_v16, 16  ;;  %1891 = vxpose.xlu0.c.b16.start.end [1/1] (short) (narrow) %v1719_v17, 16 }
 0x40c   : > { %1558 = vrot.lane.b32.xlu1 %v7373_v18, %s6832_s10 }
 0x410   : > { %1561 = vrot.lane.b32.xlu1 %v7373_v18, %s6830_s3 }
 0x411   : > { %1555 = vrot.lane.b32.xlu0 %v7373_v18, %s6831_s26 }
 0x462   : > { %v1915_v19 = vpop.trf.xlu0  ;;  %v1883_v20 = vpop.trf.xlu1 }
 0x466   : > { %v1947_v21 = vpop.trf.xlu0  ;;  %v1931_v22 = vpop.trf.xlu1 }
 0x467   : > { %v2003_v27 = vcombine.low %v1883_v20, %v1947_v21 }
 0x469   : > { %v2010_v34 = vrot.slane %v2003_v27, %v7357_v50 }
 0x46a   : > { %v1979_v23 = vpop.trf.xlu0  ;;  %v1963_v25 = vpop.trf.xlu1 }
 0x46b   : > { %v2011_v28 = vcombine.low %v1915_v19, %v1979_v23 }
 0x46d   : > { %v2018_v30 = vrot.slane %v2011_v28, %v7357_v50 }
 0x46e   : > { %v1995_v32 = vpop.trf.xlu1  ;;  %v1899_v33 = vpop.trf.xlu0 }
 0x46f   : > { %v2045_v35 = vcombine.low %v1931_v22, %v1995_v32  ;;  %v2037_v36 = vcombine.low %v1899_v33, %v1963_v25  ;;  %v2019_v37 = vcombine.low %v2010_v34, %v2018_v30  ;;  %v2020_v38 = vcombine.high %v2010_v34, %v2018_v30 }
 0x471   : > { %v2052_v39 = vrot.slane %v2045_v35, %v7357_v50  ;;  %v2044_v40 = vrot.slane %v2037_v36, %v7357_v50  ;;  %v2027_v44 = vrot.slane %v2019_v37, %v7359_v56  ;;  %v2034_v45 = vrot.slane %v2020_v38, %v7359_v56 }
 0x473   : > { %v2053_v42 = vcombine.low %v2044_v40, %v2052_v39  ;;  %v2054_v43 = vcombine.high %v2044_v40, %v2052_v39  ;;  %v2075_v54 = vshrl.u32 %v2027_v44, 16  ;;  %v2035_v55 = vcombine.high %v2027_v44, %v6835_v52 }
 0x474   : > { %v2036_v29 = vcombine.high %v2034_v45, %v6835_v52  ;;  %v2091_v61 = vshrl.u32 %v2034_v45, 16 }
 0x475   : > { %v2061_v46 = vrot.slane %v2053_v42, %v7359_v56  ;;  %v2068_v47 = vrot.slane %v2054_v43, %v7359_v56  ;;  %v2083_v1 = vshrl.u32 %v2035_v55, 16 }
 0x476   : > { %v2099_v4 = vshrl.u32 %v2036_v29, 16 }
 0x477   : > { %v2089_v48 = vpack.i.b16 %v2068_v47, %v2034_v45  ;;  %v2073_v49 = vpack.i.b16 %v2061_v46, %v2027_v44  ;;  %v2076_v51 = vshrl.u32 %v2061_v46, 16  ;;  %v2069_v53 = vcombine.high %v2061_v46, %v6835_v52 }
 0x478   : > { %v2070_v59 = vcombine.high %v2068_v47, %v6835_v52  ;;  %v2092_v60 = vshrl.u32 %v2068_v47, 16 }
 0x479   : > { %2167 = vxpose.xlu1.c.b16.start.end [1/1] (short) (narrow) %v2089_v48, 16  ;;  %2103 = vxpose.xlu0.c.b16.start.end [1/1] (short) (narrow) %v2073_v49, 16  ;;  %v2077_v57 = vpack.i.b16 %v2076_v51, %v2075_v54  ;;  %v2081_v58 = vpack.i.b16 %v2069_v53, %v2035_v55  ;;  %v2084_v0 = vshrl.u32 %v2069_v53, 16 }
 0x47a   : > { %v2097_v62 = vpack.i.b16 %v2070_v59, %v2036_v29  ;;  %v2093_v63 = vpack.i.b16 %v2092_v60, %v2091_v61  ;;  %v2100_v3 = vshrl.u32 %v2070_v59, 16 }
 0x47b   : > { %v2085_v2 = vpack.i.b16 %v2084_v0, %v2083_v1 }
 0x47c   : > { %v2101_v5 = vpack.i.b16 %v2100_v3, %v2099_v4 }
 0x47d   : > { %2119 = vxpose.xlu1.c.b16.start.end [1/1] (short) (narrow) %v2077_v57, 16  ;;  %2135 = vxpose.xlu0.c.b16.start.end [1/1] (short) (narrow) %v2081_v58, 16 }
 0x47e   : > { %v1559_v6 = vpop.permute.xlu1 %1558 }
 0x47f   : > { %v1564_v11 = vcombine.low %v7373_v18, %v1559_v6  ;;  %v1565_v12 = vcombine.high %v7373_v18, %v1559_v6 }
 0x481   : > { %2199 = vxpose.xlu1.c.b16.start.end [1/1] (short) (narrow) %v2097_v62, 16  ;;  %2183 = vxpose.xlu0.c.b16.start.end [1/1] (short) (narrow) %v2093_v63, 16  ;;  %v1572_v15 = vrot.slane %v1564_v11, %v7357_v50  ;;  %v1579_v16 = vrot.slane %v1565_v12, %v7357_v50 }
 0x482   : > { %v1562_v7 = vpop.permute.xlu1 %1561 }
 0x483   : > { %v1556_v8 = vpop.permute.xlu0 %1555 }
 0x484   : > { %v1580_v9 = vcombine.low %v1556_v8, %v1562_v7  ;;  %v1581_v10 = vcombine.high %v1556_v8, %v1562_v7 }
 0x485   : > { %2151 = vxpose.xlu0.c.b16.start.end [1/1] (short) (narrow) %v2085_v2, 16 }
 0x486   : > { %v1588_v13 = vrot.slane %v1580_v9, %v7357_v50  ;;  %v1595_v14 = vrot.slane %v1581_v10, %v7357_v50 }
 0x488   : > { %v1596_v17 = vcombine.low %v1572_v15, %v1588_v13  ;;  %v1597_v19 = vcombine.high %v1572_v15, %v1588_v13  ;;  %v1612_v20 = vcombine.low %v1579_v16, %v1595_v14  ;;  %v1613_v21 = vcombine.high %v1579_v16, %v1595_v14 }
 0x489   : > { %2215 = vxpose.xlu0.c.b16.start.end [1/1] (short) (narrow) %v2101_v5, 16 }
 0x48a   : > { %v1604_v25 = vrot.slane %v1596_v17, %v7359_v56  ;;  %v1611_v27 = vrot.slane %v1597_v19, %v7359_v56  ;;  %v1620_v18 = vrot.slane %v1612_v20, %v7359_v56  ;;  %v1627_v28 = vrot.slane %v1613_v21, %v7359_v56 }
 0x48c   : > { %v1628_v32 = vcombine.high %v1604_v25, %v6828_v24  ;;  %v1629_v33 = vcombine.high %v1611_v27, %v6828_v24  ;;  %v1630_v34 = vcombine.high %v1620_v18, %v6828_v24  ;;  %v1631_v35 = vcombine.high %v1627_v28, %v6828_v24 }
 0x48d   : > { %v5545_v43 = vpack.c.bf16 %v1620_v18, %v1604_v25  ;;  %v5546_v44 = vpack.c.bf16 %v1627_v28, %v1611_v27  ;;  %v1548_v28 = vpop.f32.mrb[4].mxu0 }
 0x48e   : > { %v5547_v40 = vpack.c.bf16 %v1630_v34, %v1628_v32  ;;  %v5548_v41 = vpack.c.bf16 %v1631_v35, %v1629_v33  ;;  %v1812_v33 = vld [vmem:[#allocation4] sm:$0xff] }
 0x48f   : > { %v1820_v53 = vrot.slane %v5545_v43, %v7357_v50  ;;  %v1828_v54 = vrot.slane %v5546_v44, %v7357_v50 }
 0x490   : > { %v1845_v47 = vrot.slane %v5547_v40, %v7357_v50  ;;  %v1853_v48 = vrot.slane %v5548_v41, %v7357_v50 }
 0x491   : > { %v1829_v61 = vcombine.low %v1820_v53, %v1828_v54 }
 0x492   : > { %v1854_v58 = vcombine.low %v1845_v47, %v1853_v48 }
 0x493   : > { %v1836_v2 = vrot.slane %v1829_v61, %v7359_v56 }
 0x494   : > { %v1861_v63 = vrot.slane %v1854_v58, %v7359_v56 }
 0x495   : > { %v1866_v15 = vshrl.u32 %v1836_v2, 16 }
 0x496   : > { %v1867_v7 = vshrl.u32 %v1861_v63, 16  ;;  %v1865_v14 = vpack.i.b16 %v1861_v63, %v1836_v2  ;;  %v1862_v20 = vcombine.high %v1861_v63, %v6835_v52 }
 0x498   : > { %v1868_v19 = vpack.i.b16 %v1867_v7, %v1866_v15 }
 0x4df   : > { %v2175_v22 = vpop.trf.xlu1  ;;  %v2111_v23 = vpop.trf.xlu0 }
 0x4e0   : > { %v2231_v36 = vcombine.low %v2111_v23, %v2175_v22  ;;  %v1837_v22 = vcombine.high %v1836_v2, %v6835_v52  ;;  %v1873_v23 = vshrl.u32 %v1862_v20, 16 }
 0x4e2   : > { %v2238_v45 = vrot.slane %v2231_v36, %v7357_v50  ;;  %v1871_v25 = vpack.i.b16 %v1862_v20, %v1837_v22  ;;  %v1872_v27 = vshrl.u32 %v1837_v22, 16 }
 0x4e3   : > { %v2127_v30 = vpop.trf.xlu1  ;;  %v2143_v31 = vpop.trf.xlu0 }
 0x4e4   : > { %v1874_v18 = vpack.i.b16 %v1873_v23, %v1872_v27 }
 0x4e7   : > { %v2207_v37 = vpop.trf.xlu1  ;;  %v2191_v38 = vpop.trf.xlu0 }
 0x4e8   : > { %v2239_v39 = vcombine.low %v2143_v31, %v2207_v37  ;;  %v2256_v51 = vcombine.low %v2127_v30, %v2191_v38  ;;  %v5733_v30 = vpop.f32.mrb[5].mxu0 }
 0x4e9   : > { %v1551_v31 = vpop.f32.mrb[6].mxu0 }
 0x4ea   : > { %v2246_v42 = vrot.slane %v2239_v39, %v7357_v50  ;;  %v2263_v60 = vrot.slane %v2256_v51, %v7357_v50  ;;  %v5734_v32 = vpop.f32.mrb[7].mxu0 }
 0x4eb   : > { %v2159_v46 = vpop.trf.xlu0 }
 0x4ec   : > { %v2247_v49 = vcombine.low %v2238_v45, %v2246_v42 }
 0x4ee   : > { %v2254_v59 = vrot.slane %v2247_v49, %v7359_v56 }
 0x4ef   : > { %v2223_v55 = vpop.trf.xlu0 }
 0x4f0   : > { %v2264_v57 = vcombine.low %v2159_v46, %v2223_v55  ;;  %v2255_v0 = vcombine.high %v2254_v59, %v6835_v52  ;;  %v2284_v4 = vshrl.u32 %v2254_v59, 16 }
 0x4f2   : > { %v2271_v29 = vrot.slane %v2264_v57, %v7357_v50  ;;  %v2290_v8 = vshrl.u32 %v2255_v0, 16 }
 0x4f4   : > { %v2272_v62 = vcombine.low %v2263_v60, %v2271_v29  ;;  %v5541_v29 = vld [vmem:[#allocation15] ss:$0 sm:$0xff] }
 0x4f5   : > { %v1549_v61 = vadd.f32 %v5541_v29, %v1548_v28 }
 0x4f6   : > { %v2279_v1 = vrot.slane %v2272_v62, %v7359_v56 }
 0x4f8   : > { %v2283_v3 = vpack.i.b16 %v2279_v1, %v2254_v59  ;;  %v2285_v5 = vshrl.u32 %v2279_v1, 16  ;;  %v2280_v6 = vcombine.high %v2279_v1, %v6835_v52 }
 0x4fa   : > { %v2299_v9 = vsel %vm2297_vm4, %v2283_v3, 0  ;;  %v2286_v10 = vpack.i.b16 %v2285_v5, %v2284_v4  ;;  %v2289_v11 = vpack.i.b16 %v2280_v6, %v2255_v0  ;;  %v2291_v12 = vshrl.u32 %v2280_v6, 16 }
 0x4fb   : > { %5736 = vmatpush3.bf16.msra.mxu1 %v2299_v9 }
 0x4fc   : > { %v2345_v13 = vsel %vm2297_vm4, %v2286_v10, 0  ;;  %5747 = vmatprep.subr.bf16.mxu1 %v6828_v24  ;;  %v2292_v16 = vpack.i.b16 %v2291_v12, %v2290_v8  ;;  %v2391_v17 = vsel %vm2297_vm4, %v2289_v11, 0 }
 0x4fd   : > { %5742 = vmatpush3.bf16.msra.mxu0 %v2345_v13 }
 0x4fe   : > { %5738 = vmatmul.mubr.msk.bf16.vlgmr.msra.gmra.mrb[4].mxu1 %vm2293_vm5, %v1865_v14  ;;  %5753 = vmatprep.subr.bf16.mxu0 %v6828_v24  ;;  %v2437_v21 = vsel %vm2297_vm4, %v2292_v16, 0 }
 0x4ff   : > { %5748 = vmatpush3.bf16.msra.mxu1 %v2391_v17  ;;  %5749 = vmatprep.mubr.msk.bf16.mxu1 %vm6829_vm2, %v6828_v24 }
 0x500   : > { %5744 = vmatmul.mubr.msk.bf16.vlgmr.msra.gmra.mrb[8].mxu0 %vm2293_vm5, %v1868_v19  ;;  %5759 = vmatprep.subr.bf16.mxu1 %v6828_v24 }
 0x501   : > { %5754 = vmatpush3.bf16.msra.mxu0 %v2437_v21  ;;  %5755 = vmatprep.mubr.msk.bf16.mxu0 %vm6829_vm2, %v6828_v24 }
 0x502   : > { %5765 = vmatprep.subr.bf16.mxu0 %v6828_v24 }
 0x506   : > { %5750 = vmatmul.mubr.msk.bf16.vlgmr.msra.gmra.mrb[8].mxu1 %vm2293_vm5, %v1871_v25 }
 0x507   : > { %5761 = vmatprep.mubr.msk.bf16.mxu1 %vm6829_vm2, %v6828_v24 }
 0x508   : > { %5756 = vmatmul.mubr.msk.bf16.vlgmr.msra.gmra.mrb[12].mxu0 %vm2293_vm5, %v1874_v18 }
 0x509   : > { %5767 = vmatprep.mubr.msk.bf16.mxu0 %vm6829_vm2, %v6828_v24 }
 0x5d1   : > { %v2335_v34 = vpop.f32.mrb[4].mxu1 }
 0x5d2   : > { %v2336_v35 = vadd.f32 %v2335_v34, %v1812_v33  ;;  %v5739_v36 = vpop.f32.mrb[5].mxu1 }
 0x5d3   : > { %v2338_v37 = vpop.f32.mrb[6].mxu1  ;;  %v2381_v38 = vpop.f32.mrb[8].mxu0 }
 0x5d4   : > { %v2382_v39 = vadd.f32 %v2381_v38, %v1812_v33  ;;  %v5740_v40 = vpop.f32.mrb[7].mxu1  ;;  %v5745_v41 = vpop.f32.mrb[9].mxu0  ;;  %v2479_v42 = vsel %vm2293_vm5, %v2336_v35, -inf }
 0x5d5   : > { %2480 = vmax.xlane.f32.xlu1 %v2479_v42  ;;  %v2384_v43 = vpop.f32.mrb[10].mxu0 }
 0x5d6   : > { %v5746_v44 = vpop.f32.mrb[11].mxu0  ;;  %v2482_v45 = vsel %vm2293_vm5, %v2382_v39, -inf }
 0x5d7   : > { %2483 = vmax.xlane.f32.xlu0 %v2482_v45 }
 0x5d9   : > { %v2427_v46 = vpop.f32.mrb[8].mxu1 }
 0x5da   : > { %v2428_v47 = vadd.f32 %v2427_v46, %v1812_v33  ;;  %v5751_v48 = vpop.f32.mrb[9].mxu1 }
 0x5db   : > { %v2430_v49 = vpop.f32.mrb[10].mxu1  ;;  %v2473_v51 = vpop.f32.mrb[12].mxu0 }
 0x5dc   : > { %v2474_v53 = vadd.f32 %v2473_v51, %v1812_v33  ;;  %v5752_v54 = vpop.f32.mrb[11].mxu1  ;;  %v5757_v55 = vpop.f32.mrb[13].mxu0  ;;  %v2485_v57 = vsel %vm2293_vm5, %v2428_v47, -inf }
 0x5dd   : > { %2486 = vmax.xlane.f32.xlu1 %v2485_v57  ;;  %v2476_v58 = vpop.f32.mrb[14].mxu0 }
 0x5de   : > { %v5758_v59 = vpop.f32.mrb[15].mxu0  ;;  %v2488_v60 = vsel %vm2293_vm5, %v2474_v53, -inf }
 0x5df   : > { %2489 = vmax.xlane.f32.xlu0 %v2488_v60 }
 0x5ee   : > { %1727 = vrot.lane.b32.xlu1 %v1549_v61, %s6831_s26 }
 0x662   : > { %v2481_v62 = vpop.xlane.xlu1 %2480 }
 0x663   : > { %v2491_v63 = vsub.f32 %v2336_v35, %v2481_v62 }
 0x664   : > { %v2484_v0 = vpop.xlane.xlu0 %2483 }
 0x665   : > { %v2495_v1 = vmul.f32 1.442695, %v2491_v63  ;;  %v2492_v2 = vsub.f32 %v2382_v39, %v2484_v0 }
 0x667   : > { %6186 = vpow2.f32 %v2495_v1  ;;  %v2497_v3 = vmul.f32 1.442695, %v2492_v2 }
 0x669   : > { %6188 = vpow2.f32 %v2497_v3 }
 0x66a   : > { %v2487_v8 = vpop.xlane.xlu1 %2486 }
 0x66b   : > { %v2493_v10 = vsub.f32 %v2428_v47, %v2487_v8 }
 0x66c   : > { %v2490_v9 = vpop.xlane.xlu0 %2489 }
 0x66d   : > { %v2494_v11 = vsub.f32 %v2474_v53, %v2490_v9  ;;  %v2499_v12 = vmul.f32 1.442695, %v2493_v10 }
 0x66e   : > { %v1728_v19 = vpop.permute.xlu1 %1727 }
 0x66f   : > { %v2501_v13 = vmul.f32 1.442695, %v2494_v11  ;;  %6190 = vpow2.f32 %v2499_v12 }
 0x671   : > { %v7454_v4 = vpop.eup %6186  ;;  %6192 = vpow2.f32 %v2501_v13 }
 0x672   : > { %v2503_v5 = vsel %vm2293_vm5, %v7454_v4, 0.0 }
 0x673   : > { %v7458_v6 = vpop.eup %6188  ;;  %2504 = vadd.xlane.f32.xlu1 %v2503_v5 }
 0x674   : > { %v2506_v7 = vsel %vm2293_vm5, %v7458_v6, 0.0 }
 0x675   : > { %2507 = vadd.xlane.f32.xlu0 %v2506_v7 }
 0x679   : > { %v7464_v14 = vpop.eup %6190 }
 0x67a   : > { %v2509_v16 = vsel %vm2293_vm5, %v7464_v14, 0.0 }
 0x67b   : > { %v7466_v15 = vpop.eup %6192 }
 0x67c   : > { %v2512_v17 = vsel %vm2293_vm5, %v7466_v15, 0.0 }
 0x684   : > { %1733 = vrot.lane.b32.xlu1 %v1549_v61, %s6830_s3 }
 0x68b   : > { %1730 = vrot.lane.b32.xlu0 %v1549_v61, %s6832_s10 }
 0x6a8   : > { %2510 = vadd.xlane.f32.xlu1 %v2509_v16 }
 0x6aa   : > { %2513 = vadd.xlane.f32.xlu0 %v2512_v17 }
 0x700   : > { %v2505_v20 = vpop.xlane.xlu1 %2504 }
 0x701   : > { %6194 = vrcp.f32 %v2505_v20 }
 0x702   : > { %v2508_v21 = vpop.xlane.xlu0 %2507 }
 0x703   : > { %6196 = vrcp.f32 %v2508_v21 }
 0x704   : > { %v1734_v22 = vpop.permute.xlu1 %1733 }
 0x705   : > { %v1752_v23 = vcombine.low %v1728_v19, %v1734_v22  ;;  %v1753_v25 = vcombine.high %v1728_v19, %v1734_v22 }
 0x706   : > { %v1731_v27 = vpop.permute.xlu0 %1730 }
 0x707   : > { %v1736_v18 = vcombine.low %v1549_v61, %v1731_v27  ;;  %v1737_v28 = vcombine.high %v1549_v61, %v1731_v27  ;;  %v1760_v30 = vrot.slane %v1752_v23, %v7357_v50  ;;  %v1767_v31 = vrot.slane %v1753_v25, %v7357_v50 }
 0x709   : > { %v1744_v32 = vrot.slane %v1736_v18, %v7357_v50  ;;  %v1751_v33 = vrot.slane %v1737_v28, %v7357_v50  ;;  %v2777_v28 = vld [vmem:[%s7964_s22] sm:$0xf] }
 0x70b   : > { %v1768_v34 = vcombine.low %v1744_v32, %v1760_v30  ;;  %v1769_v35 = vcombine.high %v1744_v32, %v1760_v30  ;;  %v1784_v36 = vcombine.low %v1751_v33, %v1767_v31  ;;  %v1785_v37 = vcombine.high %v1751_v33, %v1767_v31  ;;  %v6195_v57 = vpop.eup %6194  ;;  %v2778_v30 = vld [vmem:[%s7964_s22 + $0x4] sm:$0xf]  ;;  %v2779_v31 = vld [vmem:[%s7964_s22 + $0x8] sm:$0xf]  ;;  %v2780_v33 = vld [vmem:[%s7964_s22 + $0xc] sm:$0xf] }
 0x70c   : > { %v2519_v62 = vmul.f32 %v6195_v57, %v7454_v4 }
 0x70d   : > { %v1776_v38 = vrot.slane %v1768_v34, %v7359_v56  ;;  %v1783_v39 = vrot.slane %v1769_v35, %v7359_v56  ;;  %v1792_v40 = vrot.slane %v1784_v36, %v7359_v56  ;;  %v1799_v41 = vrot.slane %v1785_v37, %v7359_v56  ;;  %v6197_v60 = vpop.eup %6196 }
 0x70e   : > { %v2520_v5 = vmul.f32 %v6197_v60, %v7458_v6  ;;  %v2523_v13 = vpack.c.bf16 %v2519_v62, %v2519_v62  ;;  %v2877_v36 = vsel %vm2297_vm4, %v2779_v31, 0 }
 0x70f   : > { %v1800_v42 = vcombine.high %v1776_v38, %v6828_v24  ;;  %v1801_v43 = vcombine.high %v1783_v39, %v6828_v24  ;;  %v1802_v44 = vcombine.high %v1792_v40, %v6828_v24  ;;  %v1803_v45 = vcombine.high %v1799_v41, %v6828_v24 }
 0x710   : > { %v5553_v46 = vpack.c.bf16 %v1792_v40, %v1776_v38  ;;  %v5554_v47 = vpack.c.bf16 %v1799_v41, %v1783_v39  ;;  %v2524_v17 = vpack.c.bf16 %v2520_v5, %v2520_v5 }
 0x711   : > { %v5555_v48 = vpack.c.bf16 %v1802_v44, %v1800_v42  ;;  %v5556_v49 = vpack.c.bf16 %v1803_v45, %v1801_v43  ;;  %v2923_v42 = vsel %vm2297_vm4, %v2780_v33, 0 }
 0x712   : > { %v2534_v51 = vrot.slane %v5553_v46, %v7357_v50  ;;  %v2542_v53 = vrot.slane %v5554_v47, %v7357_v50 }
 0x713   : > { %v2559_v54 = vrot.slane %v5555_v48, %v7357_v50  ;;  %v2567_v55 = vrot.slane %v5556_v49, %v7357_v50 }
 0x714   : > { %v2543_v58 = vcombine.low %v2534_v51, %v2542_v53 }
 0x715   : > { %v2568_v59 = vcombine.low %v2559_v54, %v2567_v55 }
 0x716   : > { %v2550_v29 = vrot.slane %v2543_v58, %v7359_v56 }
 0x717   : > { %v2575_v61 = vrot.slane %v2568_v59, %v7359_v56 }
 0x718   : > { %v2551_v63 = vcombine.high %v2550_v29, %v6835_v52  ;;  %v2580_v1 = vshrl.u32 %v2550_v29, 16 }
 0x719   : > { %v2579_v0 = vpack.i.b16 %v2575_v61, %v2550_v29  ;;  %v2581_v2 = vshrl.u32 %v2575_v61, 16  ;;  %v2576_v3 = vcombine.high %v2575_v61, %v6835_v52 }
 0x71a   : > { %v2586_v7 = vshrl.u32 %v2551_v63, 16 }
 0x71b   : > { %v2593_v8 = vsel %vm2297_vm4, %v2579_v0, 0  ;;  %v2582_v9 = vpack.i.b16 %v2581_v2, %v2580_v1  ;;  %v2585_v10 = vpack.i.b16 %v2576_v3, %v2551_v63  ;;  %v2587_v11 = vshrl.u32 %v2576_v3, 16 }
 0x71c   : > { %5760 = vmatpush3.bf16.msra.mxu1 %v2593_v8 }
 0x71d   : > { %v2639_v12 = vsel %vm2297_vm4, %v2582_v9, 0  ;;  %5771 = vmatprep.subr.bf16.mxu1 %v6828_v24  ;;  %v2588_v4 = vpack.i.b16 %v2587_v11, %v2586_v7  ;;  %v2685_v16 = vsel %vm2297_vm4, %v2585_v10, 0 }
 0x71e   : > { %5766 = vmatpush3.bf16.msra.mxu0 %v2639_v12 }
 0x71f   : > { %5762 = vmatmul.mubr.msk.bf16.vlgmr.msra.gmra.mrb[12].mxu1 %vm2293_vm5, %v2523_v13  ;;  %5777 = vmatprep.subr.bf16.mxu0 %v6828_v24  ;;  %v2731_v6 = vsel %vm2297_vm4, %v2588_v4, 0  ;;  %v5565_v13 = vld [vmem:[#allocation16] ss:$0 sm:$0xff] }
 0x720   : > { %5772 = vmatpush3.bf16.msra.mxu1 %v2685_v16  ;;  %5773 = vmatprep.mubr.msk.bf16.mxu1 %vm6829_vm2, %v6828_v24 }
 0x721   : > { %5768 = vmatmul.mubr.msk.bf16.vlgmr.msra.gmra.mrb[16].mxu0 %vm2293_vm5, %v2524_v17  ;;  %5783 = vmatprep.subr.bf16.mxu1 %v6828_v24 }
 0x722   : > { %5778 = vmatpush3.bf16.msra.mxu0 %v2731_v6  ;;  %5779 = vmatprep.mubr.msk.bf16.mxu0 %vm6829_vm2, %v6828_v24 }
 0x723   : > { %5789 = vmatprep.subr.bf16.mxu0 %v6828_v24 }
 0x735   : > { %v2511_v19 = vpop.xlane.xlu1 %2510 }
 0x736   : > { %6198 = vrcp.f32 %v2511_v19 }
 0x737   : > { %v2514_v20 = vpop.xlane.xlu0 %2513 }
 0x738   : > { %6200 = vrcp.f32 %v2514_v20 }
 0x740   : > { %v6199_v21 = vpop.eup %6198 }
 0x741   : > { %v2521_v22 = vmul.f32 %v6199_v21, %v7464_v14  ;;  %v2785_v14 = vsel %vm2297_vm4, %v2777_v28, 0 }
 0x742   : > { %v6201_v23 = vpop.eup %6200 }
 0x743   : > { %v2522_v25 = vmul.f32 %v6201_v23, %v7466_v15  ;;  %v2525_v27 = vpack.c.bf16 %v2521_v22, %v2521_v22  ;;  %v2831_v15 = vsel %vm2297_vm4, %v2778_v30, 0  ;;  %v3078_v23 = vld [vmem:[#allocation2] sm:$0xff] }
 0x744   : > { %v6178_v30 = vld [vmem:[#allocation18] sm:$0xff]  }
 0x745   : > { %5774 = vmatmul.mubr.msk.bf16.vlgmr.msra.gmra.mrb[16].mxu1 %vm2293_vm5, %v2525_v27  ;;  %v2526_v18 = vpack.c.bf16 %v2522_v25, %v2522_v25  ;;  %v7547_v25 = vld [vmem:[#allocation2 + $0x8] sm:$0xff] }
 0x746   : > { %5785 = vmatprep.mubr.msk.bf16.mxu1 %vm6829_vm2, %v6828_v24  ;;  %5784 = vmatpush3.bf16.msra.mxu1 %v2785_v14 }
 0x747   : > { %5780 = vmatmul.mubr.msk.bf16.vlgmr.msra.gmra.mrb[20].mxu0 %vm2293_vm5, %v2526_v18  ;;  %5795 = vmatprep.subr.bf16.mxu1 %v6828_v24 }
 0x748   : > { %5791 = vmatprep.mubr.msk.bf16.mxu0 %vm6829_vm2, %v6828_v24  ;;  %5790 = vmatpush3.bf16.msra.mxu0 %v2831_v15  ;;  %v6179_v15 = vld [vmem:[#allocation18 + $0x8] sm:$0xff]  }
 0x749   : > { %5801 = vmatprep.subr.bf16.mxu0 %v6828_v24 }
 0x7f2   : > { %v2629_v32 = vpop.f32.mrb[12].mxu1 }
 0x7f3   : > { %v2773_v34 = vpack.c.bf16 %v2629_v32, %v2629_v32  ;;  %v5763_v35 = vpop.f32.mrb[13].mxu1 }
 0x7f4   : > { %v2632_v37 = vpop.f32.mrb[14].mxu1  ;;  %v2675_v38 = vpop.f32.mrb[16].mxu0 }
 0x7f5   : > { %v2774_v39 = vpack.c.bf16 %v2675_v38, %v2675_v38  ;;  %v5764_v40 = vpop.f32.mrb[15].mxu1  ;;  %v5769_v41 = vpop.f32.mrb[17].mxu0  ;;  %5786 = vmatmul.mubr.msk.bf16.vlgmr.msra.gmra.mrb[20].mxu1 %vm2293_vm5, %v2773_v34 }
 0x7f6   : > { %v2678_v43 = vpop.f32.mrb[18].mxu0  ;;  %5796 = vmatpush3.bf16.msra.mxu1 %v2877_v36  ;;  %5797 = vmatprep.mubr.msk.bf16.mxu1 %vm6829_vm2, %v6828_v24 }
 0x7f7   : > { %v5770_v44 = vpop.f32.mrb[19].mxu0  ;;  %5792 = vmatmul.mubr.msk.bf16.vlgmr.msra.gmra.mrb[24].mxu0 %vm2293_vm5, %v2774_v39  ;;  %5807 = vmatprep.subr.bf16.mxu1 %v6828_v24 }
 0x7f8   : > { %5802 = vmatpush3.bf16.msra.mxu0 %v2923_v42  ;;  %5803 = vmatprep.mubr.msk.bf16.mxu0 %vm6829_vm2, %v6828_v24 }
 0x7f9   : > { %5815 = vmatprep.subr.bf16.mxu0 %v6828_v24 }
 0x818   : > { %v2721_v45 = vpop.f32.mrb[16].mxu1 }
 0x819   : > { %v2775_v46 = vpack.c.bf16 %v2721_v45, %v2721_v45  ;;  %v5775_v47 = vpop.f32.mrb[17].mxu1 }
 0x81a   : > { %v2724_v48 = vpop.f32.mrb[18].mxu1  ;;  %v2767_v49 = vpop.f32.mrb[20].mxu0 }
 0x81b   : > { %v2776_v51 = vpack.c.bf16 %v2767_v49, %v2767_v49  ;;  %v5776_v53 = vpop.f32.mrb[19].mxu1  ;;  %v5781_v54 = vpop.f32.mrb[21].mxu0  ;;  %5798 = vmatmul.mubr.msk.bf16.vlgmr.msra.gmra.mrb[24].mxu1 %vm2293_vm5, %v2775_v46  ;;  %v5566_v49 = vld [vmem:[%s7965_s11] ss:$0 sm:$0xff]  ;;  %s7974_s11 = sld [smem:[#allocation52_spill]] }
 0x81c   : > { %v2770_v55 = vpop.f32.mrb[22].mxu0  ;;  %5811 = vmatprep.mubr.msk.bf16.mxu1 %vm6829_vm2, %v6828_v24  ;;  %5808 = vmatpush3.bf16.msra.mxu1 %v6178_v30 }
 0x81d   : > { %v5782_v57 = vpop.f32.mrb[23].mxu0  ;;  %5804 = vmatmul.mubr.msk.bf16.vlgmr.msra.gmra.mrb[28].mxu0 %vm2293_vm5, %v2776_v51  ;;  %5809 = vmatprep.subr.bf16.mxu1 %v6828_v24  ;;  %v5567_v55 = vld [vmem:[%s7966_s16] ss:$0 sm:$0xff]  ;;  %s7975_s16 = sld [smem:[#allocation57_spill]] }
 0x81e   : > { %5817 = vmatprep.mubr.msk.bf16.mxu0 %vm6829_vm2, %v6828_v24 }
 0x820   : > { %5810 = vmatpush3.bf16.msra.mxu1 %v6179_v15 }
 0x821   : > { %5821 = vmatprep.subr.bf16.mxu1 %v6828_v24 }
 0x8c8   : > { %v2821_v58 = vpop.f32.mrb[20].mxu1 }
 0x8c9   : > { %v5787_v59 = vpop.f32.mrb[21].mxu1  ;;  %v2965_v61 = vsel %vm1384_vm3, %v2821_v58, 0.0 }
 0x8ca   : > { %v2824_v60 = vpop.f32.mrb[22].mxu1  ;;  %v2867_v29 = vpop.f32.mrb[24].mxu0 }
 0x8cb   : > { %v2966_v62 = vsel %vm1384_vm3, %v2867_v29, 0.0  ;;  %v5788_v63 = vpop.f32.mrb[23].mxu1  ;;  %v5793_v0 = vpop.f32.mrb[25].mxu0 }
 0x8cc   : > { %v2967_v1 = vadd.f32 %v2966_v62, %v2965_v61  ;;  %v2870_v2 = vpop.f32.mrb[26].mxu0 }
 0x8cd   : > { %v5794_v3 = vpop.f32.mrb[27].mxu0 }
 0x8ee   : > { %v2913_v5 = vpop.f32.mrb[24].mxu1 }
 0x8ef   : > { %v2968_v7 = vsel %vm1384_vm3, %v2913_v5, 0.0  ;;  %v5799_v8 = vpop.f32.mrb[25].mxu1 }
 0x8f0   : > { %v2969_v9 = vadd.f32 %v2968_v7, %v2967_v1  ;;  %v2916_v10 = vpop.f32.mrb[26].mxu1  ;;  %v2959_v11 = vpop.f32.mrb[28].mxu0 }
 0x8f1   : > { %v2970_v12 = vsel %vm1384_vm3, %v2959_v11, 0.0  ;;  %v5800_v4 = vpop.f32.mrb[27].mxu1  ;;  %v5805_v16 = vpop.f32.mrb[29].mxu0 }
 0x8f2   : > { %v2971_v17 = vadd.f32 %v2970_v12, %v2969_v9  ;;  %v2962_v6 = vpop.f32.mrb[30].mxu0 }
 0x8f3   : > { %v5806_v19 = vpop.f32.mrb[31].mxu0 }
 0x8f4   : > { %v2979_v20 = vadd.f32 %v5565_v13, %v2971_v17 }
 0x8f6   : > { %v2980_v21 = vadd.f32 %v2979_v20, %v7334_v26 }
 0x8f8   : > { %v2981_v22 = vsel %vm1384_vm3, %v2980_v21, 0.0 }
 0x8f9   : > { %2982 = vadd.xlane.f32.xlu0 %v2981_v22 }
 0x90f   : > { %3170 = vrot.lane.b32.xlu0 %v3078_v23, %s6831_s26 }
 0x913   : > { %3178 = vrot.lane.b32.xlu0 %v7547_v25, %s6832_s10 }
 0x917   : > { %3184 = vrot.lane.b32.xlu0 %v7547_v25, %s6830_s3 }
 0x986   : > { %v2983_v27 = vpop.xlane.xlu0 %2982 }
 0x987   : > { %v2985_v18 = vmul.f32 0.03125, %v2983_v27 }
 0x989   : > { %v2986_v28 = vsub.f32 %v2980_v21, %v2985_v18 }
 0x98a   : > { %v3171_v33 = vpop.permute.xlu0 %3170 }
 0x98b   : > { %v2987_v14 = vmul.f32 %v2986_v28, %v2986_v28 }
 0x98d   : > { %v2988_v26 = vsel %vm1384_vm3, %v2987_v14, 0.0 }
 0x98e   : > { %2989 = vadd.xlane.f32.xlu1 %v2988_v26  ;;  %v3179_v36 = vpop.permute.xlu0 %3178 }
 0x98f   : > { %v3256_v46 = vcombine.low %v7547_v25, %v3179_v36  ;;  %v3257_v9 = vcombine.high %v7547_v25, %v3179_v36 }
 0x991   : > { %v3264_v29 = vrot.slane %v3256_v46, %v7357_v50  ;;  %v3271_v6 = vrot.slane %v3257_v9, %v7357_v50 }
 0x992   : > { %v3185_v40 = vpop.permute.xlu0 %3184 }
 0x99f   : > { %3172 = vrot.lane.b32.xlu1 %v7547_v25, %s6831_s26 }
 0x9a3   : > { %3176 = vrot.lane.b32.xlu1 %v3078_v23, %s6832_s10 }
 0x9a7   : > { %3182 = vrot.lane.b32.xlu1 %v3078_v23, %s6830_s3 }
 0xa1b   : > { %v2990_v31 = vpop.xlane.xlu1 %2989 }
 0xa1c   : > { %v2991_v32 = vmul.f32 0.03125, %v2990_v31 }
 0xa1e   : > { %v2992_v34 = vadd.f32 1e-05, %v2991_v32 }
 0xa1f   : > { %v3173_v35 = vpop.permute.xlu1 %3172 }
 0xa20   : > { %6202 = vrsqrt.f32 %v2992_v34  ;;  %v3272_v47 = vcombine.low %v3173_v35, %v3185_v40  ;;  %v3273_v10 = vcombine.high %v3173_v35, %v3185_v40 }
 0xa22   : > { %v3280_v61 = vrot.slane %v3272_v47, %v7357_v50  ;;  %v3287_v19 = vrot.slane %v3273_v10, %v7357_v50 }
 0xa23   : > { %v3177_v37 = vpop.permute.xlu1 %3176 }
 0xa24   : > { %v3188_v38 = vcombine.low %v3078_v23, %v3177_v37  ;;  %v3189_v39 = vcombine.high %v3078_v23, %v3177_v37  ;;  %v3288_v11 = vcombine.low %v3264_v29, %v3280_v61  ;;  %v3289_v23 = vcombine.high %v3264_v29, %v3280_v61 }
 0xa25   : > { %v3304_v14 = vcombine.low %v3271_v6, %v3287_v19  ;;  %v3305_v32 = vcombine.high %v3271_v6, %v3287_v19 }
 0xa26   : > { %v3196_v42 = vrot.slane %v3188_v38, %v7357_v50  ;;  %v3203_v43 = vrot.slane %v3189_v39, %v7357_v50  ;;  %v3296_v22 = vrot.slane %v3288_v11, %v7359_v56 }
 0xa27   : > { %v3183_v41 = vpop.permute.xlu1 %3182  ;;  %v3312_v31 = vrot.slane %v3304_v14, %v7359_v56  ;;  %v3319_v36 = vrot.slane %v3305_v32, %v7359_v56 }
 0xa28   : > { %v3204_v44 = vcombine.low %v3171_v33, %v3183_v41  ;;  %v3205_v45 = vcombine.high %v3171_v33, %v3183_v41  ;;  %v3320_v18 = vcombine.high %v3296_v22, %v6828_v24  ;;  %v3332_v33 = vpack.c.bf16 %v3296_v22, %v3296_v22 }
 0xa29   : > { %v3322_v35 = vcombine.high %v3312_v31, %v6828_v24  ;;  %v3323_v39 = vcombine.high %v3319_v36, %v6828_v24  ;;  %v3336_v40 = vpack.c.bf16 %v3312_v31, %v3312_v31 }
 0xa2a   : > { %v6203_v48 = vpop.eup %6202  ;;  %v3212_v51 = vrot.slane %v3204_v44, %v7357_v50  ;;  %v3219_v53 = vrot.slane %v3205_v45, %v7357_v50  ;;  %v3333_v30 = vpack.c.bf16 %v3320_v18, %v3320_v18 }
 0xa2b   : > { %v2994_v54 = vmul.f32 %v6203_v48, %v2986_v28  ;;  %v3303_v28 = vrot.slane %v3289_v23, %v7359_v56  ;;  %v3337_v38 = vpack.c.bf16 %v3322_v35, %v3322_v35  ;;  %v3339_v41 = vpack.c.bf16 %v3323_v39, %v3323_v39 }
 0xa2c   : > { %v3220_v57 = vcombine.low %v3196_v42, %v3212_v51  ;;  %v3221_v58 = vcombine.high %v3196_v42, %v3212_v51  ;;  %v3236_v59 = vcombine.low %v3203_v43, %v3219_v53  ;;  %v3237_v62 = vcombine.high %v3203_v43, %v3219_v53 }
 0xa2d   : > { %v3002_v60 = vmul.f32 %v5566_v49, %v2994_v54  ;;  %v3321_v15 = vcombine.high %v3303_v28, %v6828_v24  ;;  %v3334_v37 = vpack.c.bf16 %v3303_v28, %v3303_v28  ;;  %v3338_v42 = vpack.c.bf16 %v3319_v36, %v3319_v36 }
 0xa2e   : > { %v3228_v63 = vrot.slane %v3220_v57, %v7359_v56  ;;  %v3235_v0 = vrot.slane %v3221_v58, %v7359_v56  ;;  %v3244_v1 = vrot.slane %v3236_v59, %v7359_v56  ;;  %v3251_v16 = vrot.slane %v3237_v62, %v7359_v56 }
 0xa2f   : > { %v7572_v2 = vadd.f32 %v5567_v55, %v3002_v60  ;;  %v3335_v34 = vpack.c.bf16 %v3321_v15, %v3321_v15 }
 0xa30   : > { %v3324_v3 = vpack.c.bf16 %v3228_v63, %v3228_v63  ;;  %v3252_v5 = vcombine.high %v3228_v63, %v6828_v24  ;;  %v3253_v7 = vcombine.high %v3235_v0, %v6828_v24  ;;  %v3254_v4 = vcombine.high %v3244_v1, %v6828_v24 }
 0xa31   : > { %v3011_v8 = vpack.c.bf16 %v7572_v2, %v7572_v2  ;;  %v3326_v17 = vpack.c.bf16 %v3235_v0, %v3235_v0  ;;  %v3255_v21 = vcombine.high %v3251_v16, %v6828_v24  ;;  %v3328_v25 = vpack.c.bf16 %v3244_v1, %v3244_v1 }
 0xa32   : > { %3574 = vxpose.xlu1.c.b16.start.end [1/1] (short) (narrow) %v3324_v3, 16  ;;  %v3325_v12 = vpack.c.bf16 %v3252_v5, %v3252_v5  ;;  %v3327_v13 = vpack.c.bf16 %v3253_v7, %v3253_v7  ;;  %v3329_v20 = vpack.c.bf16 %v3254_v4, %v3254_v4  ;;  %v3330_v26 = vpack.c.bf16 %v3251_v16, %v3251_v16 }
 0xa33   : > { %5812 = vmatmul.mubr.msk.bf16.vlgmr.msra.gmra.mrb[28].mxu1 %vm1384_vm3, %v3011_v8  ;;  %v3331_v27 = vpack.c.bf16 %v3255_v21, %v3255_v21 }
 0xa34   : > { %3590 = vxpose.xlu0.c.b16.start.end [1/1] (short) (narrow) %v3325_v12, 16  ;;  %5823 = vmatprep.mubr.msk.bf16.mxu1 %vm6829_vm2, %v6828_v24 }
 0xa36   : > { %3622 = vxpose.xlu1.c.b16.start.end [1/1] (short) (narrow) %v3327_v13, 16 }
 0xa38   : > { %3606 = vxpose.xlu0.c.b16.start.end [1/1] (short) (narrow) %v3326_v17, 16 }
 0xa3a   : > { %3654 = vxpose.xlu1.c.b16.start.end [1/1] (short) (narrow) %v3329_v20, 16 }
 0xa3c   : > { %3638 = vxpose.xlu0.c.b16.start.end [1/1] (short) (narrow) %v3328_v25, 16 }
 0xa3e   : > { %3686 = vxpose.xlu1.c.b16.start.end [1/1] (short) (narrow) %v3331_v27, 16 }
 0xa40   : > { %3670 = vxpose.xlu0.c.b16.start.end [1/1] (short) (narrow) %v3330_v26, 16 }
 0xa42   : > { %3718 = vxpose.xlu1.c.b16.start.end [1/1] (short) (narrow) %v3333_v30, 16 }
 0xa44   : > { %3702 = vxpose.xlu0.c.b16.start.end [1/1] (short) (narrow) %v3332_v33, 16 }
 0xa46   : > { %3750 = vxpose.xlu1.c.b16.start.end [1/1] (short) (narrow) %v3335_v34, 16 }
 0xa48   : > { %3734 = vxpose.xlu0.c.b16.start.end [1/1] (short) (narrow) %v3334_v37, 16 }
 0xa4a   : > { %3782 = vxpose.xlu1.c.b16.start.end [1/1] (short) (narrow) %v3337_v38, 16 }
 0xa4c   : > { %3766 = vxpose.xlu0.c.b16.start.end [1/1] (short) (narrow) %v3336_v40, 16 }
 0xa4e   : > { %3814 = vxpose.xlu1.c.b16.start.end [1/1] (short) (narrow) %v3339_v41, 16 }
 0xa50   : > { %3798 = vxpose.xlu0.c.b16.start.end [1/1] (short) (narrow) %v3338_v42, 16 }
 0xa98   : > { %v3582_v43 = vpop.trf.xlu1 }
 0xa9a   : > { %v3598_v44 = vpop.trf.xlu0 }
 0xa9c   : > { %v3630_v45 = vpop.trf.xlu1 }
 0xa9e   : > { %v3614_v46 = vpop.trf.xlu0 }
 0xaa0   : > { %v3662_v47 = vpop.trf.xlu1 }
 0xaa1   : > { %v3898_v57 = vcombine.low %v3598_v44, %v3662_v47 }
 0xaa2   : > { %v3646_v48 = vpop.trf.xlu0 }
 0xaa3   : > { %v3830_v59 = vcombine.low %v3582_v43, %v3646_v48  ;;  %v3905_v62 = vrot.slane %v3898_v57, %v7357_v50 }
 0xaa4   : > { %v3694_v49 = vpop.trf.xlu1 }
 0xaa5   : > { %v3906_v58 = vcombine.low %v3630_v45, %v3694_v49  ;;  %v3837_v1 = vrot.slane %v3830_v59, %v7357_v50  ;;  %v5568_v59 = vld [vmem:[#allocation21] ss:$0 sm:$0xff] }
 0xaa6   : > { %v3678_v51 = vpop.trf.xlu0 }
 0xaa7   : > { %v3838_v60 = vcombine.low %v3614_v46, %v3678_v51  ;;  %v3913_v63 = vrot.slane %v3906_v58, %v7357_v50 }
 0xaa8   : > { %v3726_v53 = vpop.trf.xlu1 }
 0xaa9   : > { %v3845_v3 = vrot.slane %v3838_v60, %v7357_v50  ;;  %v3930_v9 = vcombine.low %v3905_v62, %v3913_v63  ;;  %v3931_v12 = vcombine.high %v3905_v62, %v3913_v63 }
 0xaaa   : > { %v3710_v54 = vpop.trf.xlu0 }
 0xaab   : > { %v3862_v13 = vcombine.low %v3837_v1, %v3845_v3  ;;  %v3863_v19 = vcombine.high %v3837_v1, %v3845_v3  ;;  %v3938_v23 = vrot.slane %v3930_v9, %v7359_v56  ;;  %v3945_v27 = vrot.slane %v3931_v12, %v7359_v56 }
 0xaac   : > { %v3758_v55 = vpop.trf.xlu1 }
 0xaad   : > { %v3870_v25 = vrot.slane %v3862_v13, %v7359_v56  ;;  %v3877_v30 = vrot.slane %v3863_v19, %v7359_v56 }
 0xaae   : > { %v3742_v29 = vpop.trf.xlu0 }
 0xab0   : > { %v3790_v61 = vpop.trf.xlu1 }
 0xab1   : > { %v3914_v0 = vcombine.low %v3726_v53, %v3790_v61 }
 0xab2   : > { %v3774_v5 = vpop.trf.xlu0 }
 0xab3   : > { %v3846_v7 = vcombine.low %v3710_v54, %v3774_v5  ;;  %v3921_v10 = vrot.slane %v3914_v0, %v7357_v50  ;;  %v7614_v0 = vld [vmem:[#allocation3] sm:$0xff] }
 0xab4   : > { %v3822_v8 = vpop.trf.xlu1 }
 0xab5   : > { %v3922_v11 = vcombine.low %v3758_v55, %v3822_v8  ;;  %v3853_v16 = vrot.slane %v3846_v7, %v7357_v50 }
 0xab6   : > { %v3806_v4 = vpop.trf.xlu0 }
 0xab7   : > { %v3929_v17 = vrot.slane %v3922_v11, %v7357_v50  ;;  %v3854_v6 = vcombine.low %v3742_v29, %v3806_v4 }
 0xab9   : > { %v3946_v20 = vcombine.low %v3921_v10, %v3929_v17  ;;  %v3947_v21 = vcombine.high %v3921_v10, %v3929_v17  ;;  %v3861_v22 = vrot.slane %v3854_v6, %v7357_v50 }
 0xabb   : > { %v3878_v18 = vcombine.low %v3853_v16, %v3861_v22  ;;  %v3879_v28 = vcombine.high %v3853_v16, %v3861_v22  ;;  %v3954_v14 = vrot.slane %v3946_v20, %v7359_v56  ;;  %v3961_v26 = vrot.slane %v3947_v21, %v7359_v56 }
 0xabd   : > { %v3886_v15 = vrot.slane %v3878_v18, %v7359_v56  ;;  %v3962_v31 = vcombine.low %v3938_v23, %v3954_v14  ;;  %v3893_v32 = vrot.slane %v3879_v28, %v7359_v56  ;;  %v3965_v33 = vcombine.high %v3945_v27, %v3961_v26 }
 0xabe   : > { %v3963_v36 = vcombine.high %v3938_v23, %v3954_v14  ;;  %v3964_v43 = vcombine.low %v3945_v27, %v3961_v26 }
 0xabf   : > { %v3894_v34 = vcombine.low %v3870_v25, %v3886_v15  ;;  %v3895_v35 = vcombine.high %v3870_v25, %v3886_v15  ;;  %v3971_v37 = vshrl.u32 %v3962_v31, 16  ;;  %v3897_v38 = vcombine.high %v3877_v30, %v3893_v32 }
 0xac0   : > { %v3995_v39 = vshrl.u32 %v3965_v33, 16  ;;  %v3896_v42 = vcombine.low %v3877_v30, %v3893_v32  ;;  %v3979_v49 = vshrl.u32 %v3963_v36, 16  ;;  %v3987_v57 = vshrl.u32 %v3964_v43, 16 }
 0xac1   : > { %v3968_v40 = vpack.i.b16 %v3962_v31, %v3894_v34  ;;  %v3970_v41 = vshrl.u32 %v3894_v34, 16  ;;  %v3994_v44 = vshrl.u32 %v3897_v38, 16  ;;  %v3992_v45 = vpack.i.b16 %v3965_v33, %v3897_v38 }
 0xac2   : > { %v3976_v46 = vpack.i.b16 %v3963_v36, %v3895_v35  ;;  %v3978_v48 = vshrl.u32 %v3895_v35, 16  ;;  %v3984_v53 = vpack.i.b16 %v3964_v43, %v3896_v42  ;;  %v3986_v55 = vshrl.u32 %v3896_v42, 16 }
 0xac3   : > { %3998 = vxpose.xlu0.c.b16.start.end [1/1] (short) (narrow) %v3968_v40, 16  ;;  %v3972_v47 = vpack.i.b16 %v3971_v37, %v3970_v41  ;;  %v3996_v51 = vpack.i.b16 %v3995_v39, %v3994_v44 }
 0xac4   : > { %v3980_v54 = vpack.i.b16 %v3979_v49, %v3978_v48  ;;  %v3988_v58 = vpack.i.b16 %v3987_v57, %v3986_v55 }
 0xac5   : > { %4014 = vxpose.xlu1.c.b16.start.end [1/1] (short) (narrow) %v3972_v47, 16 }
 0xac7   : > { %4030 = vxpose.xlu0.c.b16.start.end [1/1] (short) (narrow) %v3976_v46, 16 }
 0xac9   : > { %4062 = vxpose.xlu1.c.b16.start.end [1/1] (short) (narrow) %v3984_v53, 16 }
 0xacb   : > { %4046 = vxpose.xlu0.c.b16.start.end [1/1] (short) (narrow) %v3980_v54, 16 }
 0xacf   : > { %4078 = vxpose.xlu0.c.b16.start.end [1/1] (short) (narrow) %v3988_v58, 16 }
 0xb06   : > { %v3072_v60 = vpop.f32.mrb[28].mxu1 }
 0xb07   : > { %v3073_v29 = vadd.f32 %v5568_v59, %v3072_v60  ;;  %v5813_v61 = vpop.f32.mrb[29].mxu1 }
 0xb08   : > { %v3075_v62 = vpop.f32.mrb[30].mxu1 }
 0xb09   : > { %v5814_v63 = vpop.f32.mrb[31].mxu1  ;;  %3086 = vrot.lane.b32.xlu1 %v3073_v29, %s6832_s10  ;;  %3083 = vrot.lane.b32.xlu0 %v3073_v29, %s6831_s26 }
 0xb0d   : > { %3089 = vrot.lane.b32.xlu1 %v3073_v29, %s6830_s3 }
 0xb27   : > { %4110 = vxpose.xlu0.c.b16.start.end [1/1] (short) (narrow) %v3996_v51, 16 }
 0xb29   : > { %v4006_v1 = vpop.trf.xlu0 }
 0xb2b   : > { %v4022_v5 = vpop.trf.xlu1 }
 0xb2d   : > { %v4038_v3 = vpop.trf.xlu0 }
 0xb2f   : > { %v4070_v8 = vpop.trf.xlu1 }
 0xb30   : > { %4094 = vxpose.xlu1.c.b16.start.end [1/1] (short) (narrow) %v3992_v45, 16  ;;  %v4126_v45 = vcombine.low %v4006_v1, %v4070_v8 }
 0xb31   : > { %v4054_v7 = vpop.trf.xlu0 }
 0xb32   : > { %v4133_v54 = vrot.slane %v4126_v45, %v7357_v50 }
 0xb34   : > { %3342 = vrot.lane.b32.xlu1 %v7614_v0, %s6831_s26 }
 0xb35   : > { %v4086_v9 = vpop.trf.xlu0 }
 0xb36   : > { %v4151_v34 = vcombine.low %v4022_v5, %v4086_v9 }
 0xb38   : > { %v4158_v39 = vrot.slane %v4151_v34, %v7357_v50 }
 0xb7b   : > { %v3087_v10 = vpop.permute.xlu1 %3086  ;;  %v3084_v13 = vpop.permute.xlu0 %3083 }
 0xb7c   : > { %v3092_v11 = vcombine.low %v3073_v29, %v3087_v10  ;;  %v3093_v12 = vcombine.high %v3073_v29, %v3087_v10 }
 0xb7e   : > { %v3100_v6 = vrot.slane %v3092_v11, %v7357_v50  ;;  %v3107_v19 = vrot.slane %v3093_v12, %v7357_v50 }
 0xb7f   : > { %v3090_v4 = vpop.permute.xlu1 %3089 }
 0xb80   : > { %v3108_v16 = vcombine.low %v3084_v13, %v3090_v4  ;;  %v3109_v17 = vcombine.high %v3084_v13, %v3090_v4 }
 0xb82   : > { %v3116_v20 = vrot.slane %v3108_v16, %v7357_v50  ;;  %v3123_v21 = vrot.slane %v3109_v17, %v7357_v50 }
 0xb84   : > { %v3124_v22 = vcombine.low %v3100_v6, %v3116_v20  ;;  %v3125_v23 = vcombine.high %v3100_v6, %v3116_v20  ;;  %v3140_v25 = vcombine.low %v3107_v19, %v3123_v21  ;;  %v3141_v27 = vcombine.high %v3107_v19, %v3123_v21 }
 0xb86   : > { %v3132_v18 = vrot.slane %v3124_v22, %v7359_v56  ;;  %v3139_v28 = vrot.slane %v3125_v23, %v7359_v56  ;;  %v3148_v14 = vrot.slane %v3140_v25, %v7359_v56  ;;  %v3155_v26 = vrot.slane %v3141_v27, %v7359_v56 }
 0xb88   : > { %v3156_v30 = vcombine.high %v3132_v18, %v6828_v24  ;;  %v3157_v15 = vcombine.high %v3139_v28, %v6828_v24  ;;  %v3158_v31 = vcombine.high %v3148_v14, %v6828_v24  ;;  %v3159_v32 = vcombine.high %v3155_v26, %v6828_v24 }
 0xb89   : > { %v5572_v40 = vpack.c.bf16 %v3148_v14, %v3132_v18  ;;  %v5573_v41 = vpack.c.bf16 %v3155_v26, %v3139_v28 }
 0xb8a   : > { %v5574_v36 = vpack.c.bf16 %v3158_v31, %v3156_v30  ;;  %v5575_v37 = vpack.c.bf16 %v3159_v32, %v3157_v15 }
 0xb8b   : > { %v3519_v46 = vrot.slane %v5572_v40, %v7357_v50  ;;  %v3527_v47 = vrot.slane %v5573_v41, %v7357_v50 }
 0xb8c   : > { %v3544_v42 = vrot.slane %v5574_v36, %v7357_v50  ;;  %v3552_v43 = vrot.slane %v5575_v37, %v7357_v50 }
 0xb8d   : > { %v4118_v33 = vpop.trf.xlu0  ;;  %v3528_v57 = vcombine.low %v3519_v46, %v3527_v47 }
 0xb8e   : > { %v4159_v35 = vcombine.low %v4054_v7, %v4118_v33  ;;  %v3553_v51 = vcombine.low %v3544_v42, %v3552_v43 }
 0xb8f   : > { %v3535_v61 = vrot.slane %v3528_v57, %v7359_v56 }
 0xb90   : > { %v4166_v38 = vrot.slane %v4159_v35, %v7357_v50  ;;  %v3560_v59 = vrot.slane %v3553_v51, %v7359_v56 }
 0xb91   : > { %v3565_v4 = vshrl.u32 %v3535_v61, 16  ;;  %v3536_v21 = vcombine.high %v3535_v61, %v6835_v52 }
 0xb92   : > { %v4167_v44 = vcombine.low %v4158_v39, %v4166_v38  ;;  %v3566_v5 = vshrl.u32 %v3560_v59, 16  ;;  %v3564_v13 = vpack.i.b16 %v3560_v59, %v3535_v61  ;;  %v3561_v19 = vcombine.high %v3560_v59, %v6835_v52 }
 0xb93   : > { %v3571_v25 = vshrl.u32 %v3536_v21, 16 }
 0xb94   : > { %v4174_v53 = vrot.slane %v4167_v44, %v7359_v56  ;;  %v3567_v6 = vpack.i.b16 %v3566_v5, %v3565_v4  ;;  %v3572_v22 = vshrl.u32 %v3561_v19, 16  ;;  %v3570_v23 = vpack.i.b16 %v3561_v19, %v3536_v21  ;;  %v3081_v44 = vld [vmem:[#allocation3 + $0x8] sm:$0xff] }
 0xb96   : > { %v4102_v48 = vpop.trf.xlu1  ;;  %v4175_v60 = vcombine.high %v4174_v53, %v6835_v52  ;;  %v4180_v1 = vshrl.u32 %v4174_v53, 16  ;;  %v3573_v27 = vpack.i.b16 %v3572_v22, %v3571_v25 }
 0xb97   : > { %v4134_v49 = vcombine.low %v4038_v3, %v4102_v48 }
 0xb98   : > { %v4186_v7 = vshrl.u32 %v4175_v60, 16 }
 0xb99   : > { %v4141_v55 = vrot.slane %v4134_v49, %v7357_v50 }
 0xb9b   : > { %v4142_v58 = vcombine.low %v4133_v54, %v4141_v55 }
 0xb9d   : > { %v4149_v29 = vrot.slane %v4142_v58, %v7359_v56 }
 0xb9f   : > { %v4178_v62 = vpack.i.b16 %v4174_v53, %v4149_v29  ;;  %v4179_v63 = vshrl.u32 %v4149_v29, 16  ;;  %v4150_v3 = vcombine.high %v4149_v29, %v6835_v52 }
 0xba1   : > { %v4192_v8 = vsel %vm2297_vm4, %v4178_v62, 0  ;;  %v4181_v9 = vpack.i.b16 %v4180_v1, %v4179_v63  ;;  %v4184_v10 = vpack.i.b16 %v4175_v60, %v4150_v3  ;;  %v4185_v11 = vshrl.u32 %v4150_v3, 16 }
 0xba2   : > { %5816 = vmatpush3.bf16.msra.mxu0 %v4192_v8 }
 0xba3   : > { %v4238_v12 = vsel %vm2297_vm4, %v4181_v9, 0  ;;  %5827 = vmatprep.subr.bf16.mxu0 %v6828_v24  ;;  %v4187_v16 = vpack.i.b16 %v4186_v7, %v4185_v11  ;;  %v4284_v17 = vsel %vm2297_vm4, %v4184_v10, 0 }
 0xba4   : > { %5822 = vmatpush3.bf16.msra.mxu1 %v4238_v12 }
 0xba5   : > { %5818 = vmatmul.mubr.msk.bf16.vlgmr.msra.gmra.mrb[32].mxu0 %vm2293_vm5, %v3564_v13  ;;  %5833 = vmatprep.subr.bf16.mxu1 %v6828_v24  ;;  %v4330_v20 = vsel %vm2297_vm4, %v4187_v16, 0 }
 0xba6   : > { %5828 = vmatpush3.bf16.msra.mxu0 %v4284_v17  ;;  %5829 = vmatprep.mubr.msk.bf16.mxu0 %vm6829_vm2, %v6828_v24  ;;  %v3343_v45 = vpop.permute.xlu1 %3342 }
 0xba7   : > { %5824 = vmatmul.mubr.msk.bf16.vlgmr.msra.gmra.mrb[32].mxu1 %vm2293_vm5, %v3567_v6  ;;  %5839 = vmatprep.subr.bf16.mxu0 %v6828_v24 }
 0xba8   : > { %5834 = vmatpush3.bf16.msra.mxu1 %v4330_v20  ;;  %5835 = vmatprep.mubr.msk.bf16.mxu1 %vm6829_vm2, %v6828_v24 }
 0xba9   : > { %5845 = vmatprep.subr.bf16.mxu1 %v6828_v24 }
 0xbad   : > { %5830 = vmatmul.mubr.msk.bf16.vlgmr.msra.gmra.mrb[36].mxu0 %vm2293_vm5, %v3570_v23 }
 0xbae   : > { %5841 = vmatprep.mubr.msk.bf16.mxu0 %vm6829_vm2, %v6828_v24 }
 0xbaf   : > { %5836 = vmatmul.mubr.msk.bf16.vlgmr.msra.gmra.mrb[36].mxu1 %vm2293_vm5, %v3573_v27 }
 0xbb0   : > { %5847 = vmatprep.mubr.msk.bf16.mxu1 %vm6829_vm2, %v6828_v24 }
 0xc78   : > { %v4228_v52 = vpop.f32.mrb[32].mxu0 }
 0xc79   : > { %v5819_v18 = vpop.f32.mrb[33].mxu0  ;;  %v4373_v28 = vsel %vm4372_vm6, %v4228_v52, -inf }
 0xc7a   : > { %v4274_v14 = vpop.f32.mrb[32].mxu1  ;;  %4374 = vmax.xlane.f32.xlu1 %v4373_v28  ;;  %v4231_v26 = vpop.f32.mrb[34].mxu0 }
 0xc7b   : > { %v5820_v30 = vpop.f32.mrb[35].mxu0  ;;  %v5825_v15 = vpop.f32.mrb[33].mxu1  ;;  %v4376_v31 = vsel %vm4372_vm6, %v4274_v14, -inf }
 0xc7c   : > { %4377 = vmax.xlane.f32.xlu0 %v4376_v31  ;;  %v4277_v32 = vpop.f32.mrb[34].mxu1 }
 0xc7d   : > { %v5826_v33 = vpop.f32.mrb[35].mxu1 }
 0xc80   : > { %v4320_v34 = vpop.f32.mrb[36].mxu0 }
 0xc81   : > { %v5831_v35 = vpop.f32.mrb[37].mxu0  ;;  %v4379_v36 = vsel %vm4372_vm6, %v4320_v34, -inf }
 0xc82   : > { %v4366_v37 = vpop.f32.mrb[36].mxu1  ;;  %4380 = vmax.xlane.f32.xlu1 %v4379_v36  ;;  %v4323_v38 = vpop.f32.mrb[38].mxu0 }
 0xc83   : > { %v5832_v39 = vpop.f32.mrb[39].mxu0  ;;  %v5837_v40 = vpop.f32.mrb[37].mxu1  ;;  %v4382_v41 = vsel %vm4372_vm6, %v4366_v37, -inf }
 0xc84   : > { %4383 = vmax.xlane.f32.xlu0 %v4382_v41  ;;  %v4369_v42 = vpop.f32.mrb[38].mxu1 }
 0xc85   : > { %v5838_v43 = vpop.f32.mrb[39].mxu1 }
 0xc93   : > { %3348 = vrot.lane.b32.xlu1 %v7614_v0, %s6832_s10 }
 0xc97   : > { %3350 = vrot.lane.b32.xlu1 %v3081_v44, %s6832_s10  ;;  %s7973_s10 = sld [smem:[#allocation50_spill]] }
 0xc9a   : > { %3344 = vrot.lane.b32.xlu0 %v3081_v44, %s6831_s26  ;;  %s7972_s26 = sld [smem:[#allocation56_spill]] }
 0xd07   : > { %v4375_v46 = vpop.xlane.xlu1 %4374 }
 0xd08   : > { %v4385_v47 = vsub.f32 %v4228_v52, %v4375_v46 }
 0xd09   : > { %v4378_v48 = vpop.xlane.xlu0 %4377 }
 0xd0a   : > { %v4389_v49 = vmul.f32 1.442695, %v4385_v47  ;;  %v4386_v51 = vsub.f32 %v4274_v14, %v4378_v48 }
 0xd0c   : > { %6204 = vpow2.f32 %v4389_v49  ;;  %v4391_v53 = vmul.f32 1.442695, %v4386_v51 }
 0xd0e   : > { %6206 = vpow2.f32 %v4391_v53 }
 0xd0f   : > { %v4381_v60 = vpop.xlane.xlu1 %4380 }
 0xd10   : > { %v4387_v61 = vsub.f32 %v4320_v34, %v4381_v60 }
 0xd11   : > { %v4384_v59 = vpop.xlane.xlu0 %4383 }
 0xd12   : > { %v4388_v29 = vsub.f32 %v4366_v37, %v4384_v59  ;;  %v4393_v63 = vmul.f32 1.442695, %v4387_v61 }
 0xd13   : > { %v3349_v8 = vpop.permute.xlu1 %3348 }
 0xd14   : > { %v4395_v62 = vmul.f32 1.442695, %v4388_v29  ;;  %v3360_v19 = vcombine.low %v7614_v0, %v3349_v8  ;;  %v3361_v20 = vcombine.high %v7614_v0, %v3349_v8 }
 0xd15   : > { %v3345_v10 = vpop.permute.xlu0 %3344 }
 0xd16   : > { %v7674_v54 = vpop.eup %6204  ;;  %6208 = vpow2.f32 %v4395_v62  ;;  %v3368_v15 = vrot.slane %v3360_v19, %v7357_v50  ;;  %v3375_v31 = vrot.slane %v3361_v20, %v7357_v50 }
 0xd17   : > { %v4397_v55 = vsel %vm4372_vm6, %v7674_v54, 0.0  ;;  %6210 = vpow2.f32 %v4393_v63  ;;  %v3351_v9 = vpop.permute.xlu1 %3350 }
 0xd18   : > { %v7678_v57 = vpop.eup %6206  ;;  %4398 = vadd.xlane.f32.xlu1 %v4397_v55  ;;  %v3428_v12 = vcombine.low %v3081_v44, %v3351_v9  ;;  %v3429_v13 = vcombine.high %v3081_v44, %v3351_v9 }
 0xd19   : > { %v4400_v58 = vsel %vm4372_vm6, %v7678_v57, 0.0 }
 0xd1a   : > { %4401 = vadd.xlane.f32.xlu0 %v4400_v58  ;;  %v3436_v21 = vrot.slane %v3428_v12, %v7357_v50  ;;  %v3443_v22 = vrot.slane %v3429_v13, %v7357_v50 }
 0xd20   : > { %v7685_v1 = vpop.eup %6208 }
 0xd21   : > { %v7687_v3 = vpop.eup %6210  ;;  %v4406_v5 = vsel %vm4372_vm6, %v7685_v1, 0.0 }
 0xd22   : > { %v4403_v7 = vsel %vm4372_vm6, %v7687_v3, 0.0 }
 0xd29   : > { %3356 = vrot.lane.b32.xlu1 %v3081_v44, %s6830_s3 }
 0xd30   : > { %3354 = vrot.lane.b32.xlu0 %v7614_v0, %s6830_s3  ;;  %s7971_s3 = sld [smem:[#allocation55_spill]] }
 0xd4d   : > { %4407 = vadd.xlane.f32.xlu1 %v4406_v5 }
 0xd4f   : > { %4404 = vadd.xlane.f32.xlu0 %v4403_v7 }
 0xda5   : > { %v4399_v11 = vpop.xlane.xlu1 %4398 }
 0xda6   : > { %6212 = vrcp.f32 %v4399_v11 }
 0xda7   : > { %v4402_v4 = vpop.xlane.xlu0 %4401 }
 0xda8   : > { %6214 = vrcp.f32 %v4402_v4 }
 0xda9   : > { %v3357_v16 = vpop.permute.xlu1 %3356 }
 0xdaa   : > { %v3444_v17 = vcombine.low %v3345_v10, %v3357_v16  ;;  %v3445_v6 = vcombine.high %v3345_v10, %v3357_v16 }
 0xdab   : > { %v3355_v23 = vpop.permute.xlu0 %3354 }
 0xdac   : > { %v3452_v25 = vrot.slane %v3444_v17, %v7357_v50  ;;  %v3459_v27 = vrot.slane %v3445_v6, %v7357_v50  ;;  %v3376_v52 = vcombine.low %v3343_v45, %v3355_v23  ;;  %v3377_v18 = vcombine.high %v3343_v45, %v3355_v23 }
 0xdae   : > { %v3460_v28 = vcombine.low %v3436_v21, %v3452_v25  ;;  %v3461_v14 = vcombine.high %v3436_v21, %v3452_v25  ;;  %v3476_v26 = vcombine.low %v3443_v22, %v3459_v27  ;;  %v3477_v30 = vcombine.high %v3443_v22, %v3459_v27 }
 0xdaf   : > { %v3384_v0 = vrot.slane %v3376_v52, %v7357_v50  ;;  %v3391_v32 = vrot.slane %v3377_v18, %v7357_v50 }
 0xdb0   : > { %v3468_v33 = vrot.slane %v3460_v28, %v7359_v56  ;;  %v3475_v34 = vrot.slane %v3461_v14, %v7359_v56  ;;  %v3484_v35 = vrot.slane %v3476_v26, %v7359_v56  ;;  %v3491_v36 = vrot.slane %v3477_v30, %v7359_v56  ;;  %v6213_v22 = vpop.eup %6212 }
 0xdb1   : > { %v3392_v37 = vcombine.low %v3368_v15, %v3384_v0  ;;  %v3393_v38 = vcombine.high %v3368_v15, %v3384_v0  ;;  %v3408_v39 = vcombine.low %v3375_v31, %v3391_v32  ;;  %v3409_v51 = vcombine.high %v3375_v31, %v3391_v32 }
 0xdb2   : > { %v3492_v40 = vcombine.high %v3468_v33, %v6828_v24  ;;  %v3493_v41 = vcombine.high %v3475_v34, %v6828_v24  ;;  %v3494_v42 = vcombine.high %v3484_v35, %v6828_v24  ;;  %v3495_v43 = vcombine.high %v3491_v36, %v6828_v24  ;;  %v6215_v52 = vpop.eup %6214 }
 0xdb3   : > { %v5582_v44 = vpack.c.bf16 %v3484_v35, %v3468_v33  ;;  %v5583_v45 = vpack.c.bf16 %v3491_v36, %v3475_v34  ;;  %v3400_v46 = vrot.slane %v3392_v37, %v7359_v56  ;;  %v3407_v47 = vrot.slane %v3393_v38, %v7359_v56 }
 0xdb4   : > { %v5586_v48 = vpack.c.bf16 %v3494_v42, %v3492_v40  ;;  %v5587_v49 = vpack.c.bf16 %v3495_v43, %v3493_v41  ;;  %v3416_v55 = vrot.slane %v3408_v39, %v7359_v56  ;;  %v3423_v59 = vrot.slane %v3409_v51, %v7359_v56 }
 0xdb5   : > { %v4444_v53 = vrot.slane %v5582_v44, %v7357_v50  ;;  %v4452_v58 = vrot.slane %v5583_v45, %v7357_v50  ;;  %v3424_v60 = vcombine.high %v3400_v46, %v6828_v24  ;;  %v3425_v29 = vcombine.high %v3407_v47, %v6828_v24 }
 0xdb6   : > { %v3426_v61 = vcombine.high %v3416_v55, %v6828_v24  ;;  %v5580_v62 = vpack.c.bf16 %v3416_v55, %v3400_v46  ;;  %v4494_v63 = vrot.slane %v5586_v48, %v7357_v50  ;;  %v4502_v5 = vrot.slane %v5587_v49, %v7357_v50  ;;  %v4713_v49 = vld [vmem:[%s7967_s14] sm:$0xf] }
 0xdb7   : > { %v3427_v7 = vcombine.high %v3423_v59, %v6828_v24  ;;  %v5581_v8 = vpack.c.bf16 %v3423_v59, %v3407_v47  ;;  %v4461_v13 = vcombine.low %v4444_v53, %v4452_v58  ;;  %v4413_v14 = vmul.f32 %v6213_v22, %v7674_v54  ;;  %v4714_v53 = vld [vmem:[%s7967_s14 + $0x4] sm:$0xf]  ;;  %v4715_v58 = vld [vmem:[%s7967_s14 + $0x8] sm:$0xf] }
 0xdb8   : > { %v4428_v9 = vrot.slane %v5580_v62, %v7357_v50  ;;  %v5584_v10 = vpack.c.bf16 %v3426_v61, %v3424_v60  ;;  %v4511_v6 = vcombine.low %v4494_v63, %v4502_v5  ;;  %v4414_v31 = vmul.f32 %v6215_v52, %v7678_v57  ;;  %v4716_v60 = vld [vmem:[%s7967_s14 + $0xc] sm:$0xf] }
 0xdb9   : > { %v4436_v11 = vrot.slane %v5581_v8, %v7357_v50  ;;  %v5585_v12 = vpack.c.bf16 %v3427_v7, %v3425_v29  ;;  %v4468_v20 = vrot.slane %v4461_v13, %v7359_v56  ;;  %v4417_v33 = vpack.c.bf16 %v4413_v14, %v4413_v14 }
 0xdba   : > { %v4478_v16 = vrot.slane %v5584_v10, %v7357_v50  ;;  %v4518_v27 = vrot.slane %v4511_v6, %v7359_v56  ;;  %v4418_v35 = vpack.c.bf16 %v4414_v31, %v4414_v31  ;;  %v4917_v38 = vsel %vm4372_vm6, %v4414_v31, 0.0 }
 0xdbb   : > { %v4486_v4 = vrot.slane %v5585_v12, %v7357_v50  ;;  %v4453_v17 = vcombine.low %v4428_v9, %v4436_v11  ;;  %v4916_v41 = vsel %vm4372_vm6, %v4413_v14, 0.0  ;;  %v4721_v51 = vsel %vm2297_vm4, %v4713_v49, 0  ;;  %v6183_v49 = vld [vmem:[%s7970_s23 + $0x8] sm:$0xff]  }
 0xdbc   : > { %v4918_v44 = vadd.f32 %v4917_v38, %v4916_v41  ;;  %v4767_v55 = vsel %vm2297_vm4, %v4714_v53, 0  ;;  %v4813_v62 = vsel %vm2297_vm4, %v4715_v58, 0  ;;  %v4859_v10 = vsel %vm2297_vm4, %v4716_v60, 0 }
 0xdbd   : > { %v4460_v19 = vrot.slane %v4453_v17, %v7359_v56  ;;  %v4503_v21 = vcombine.low %v4478_v16, %v4486_v4 }
 0xdbf   : > { %v4469_v23 = vcombine.low %v4460_v19, %v4468_v20  ;;  %v4510_v25 = vrot.slane %v4503_v21, %v7359_v56  ;;  %v4470_v15 = vcombine.high %v4460_v19, %v4468_v20 }
 0xdc1   : > { %v4519_v18 = vcombine.low %v4510_v25, %v4518_v27  ;;  %v4520_v28 = vcombine.high %v4510_v25, %v4518_v27  ;;  %v4525_v50 = vshrl.u32 %v4469_v23, 16  ;;  %v4533_v56 = vshrl.u32 %v4470_v15, 16 }
 0xdc3   : > { %v4523_v26 = vpack.i.b16 %v4519_v18, %v4469_v23  ;;  %v4526_v30 = vshrl.u32 %v4519_v18, 16  ;;  %v4534_v32 = vshrl.u32 %v4520_v28, 16  ;;  %v4531_v34 = vpack.i.b16 %v4520_v28, %v4470_v15 }
 0xdc5   : > { %5840 = vmatpush3.bf16.msra.mxu0 %v4523_v26  ;;  %v4527_v0 = vpack.i.b16 %v4526_v30, %v4525_v50  ;;  %v4535_v54 = vpack.i.b16 %v4534_v32, %v4533_v56 }
 0xdc6   : > { %5851 = vmatprep.subr.bf16.mxu0 %v6828_v24 }
 0xdc7   : > { %5846 = vmatpush3.bf16.msra.mxu1 %v4527_v0 }
 0xdc8   : > { %5842 = vmatmul.mubr.msk.bf16.vlgmr.msra.gmra.mrb[40].mxu0 %vm4372_vm6, %v4417_v33  ;;  %5857 = vmatprep.subr.bf16.mxu1 %v6828_v24 }
 0xdc9   : > { %5852 = vmatpush3.bf16.msra.mxu0 %v4531_v34  ;;  %5853 = vmatprep.mubr.msk.bf16.mxu0 %vm6829_vm2, %v6828_v24 }
 0xdca   : > { %5848 = vmatmul.mubr.msk.bf16.vlgmr.msra.gmra.mrb[40].mxu1 %vm4372_vm6, %v4418_v35  ;;  %5863 = vmatprep.subr.bf16.mxu0 %v6828_v24 }
 0xdcb   : > { %5858 = vmatpush3.bf16.msra.mxu1 %v4535_v54  ;;  %5859 = vmatprep.mubr.msk.bf16.mxu1 %vm6829_vm2, %v6828_v24 }
 0xdcc   : > { %5869 = vmatprep.subr.bf16.mxu1 %v6828_v24 }
 0xdda   : > { %v4408_v57 = vpop.xlane.xlu1 %4407 }
 0xddb   : > { %6216 = vrcp.f32 %v4408_v57 }
 0xddc   : > { %v4405_v36 = vpop.xlane.xlu0 %4404 }
 0xddd   : > { %6218 = vrcp.f32 %v4405_v36 }
 0xde5   : > { %v6217_v37 = vpop.eup %6216 }
 0xde6   : > { %v4416_v39 = vmul.f32 %v6217_v37, %v7685_v1 }
 0xde7   : > { %v6219_v40 = vpop.eup %6218 }
 0xde8   : > { %v4415_v42 = vmul.f32 %v6219_v40, %v7687_v3  ;;  %v4420_v43 = vpack.c.bf16 %v4416_v39, %v4416_v39  ;;  %v4921_v1 = vsel %vm4372_vm6, %v4416_v39, 0.0  ;;  %v5596_v39 = vld [vmem:[%s7968_s2] ss:$0 sm:$0xff]  ;;  %s7976_s2 = sld [smem:[#allocation58_spill]] }
 0xdea   : > { %v4919_v45 = vsel %vm4372_vm6, %v4415_v42, 0.0  ;;  %5860 = vmatmul.mubr.msk.bf16.vlgmr.msra.gmra.mrb[44].mxu1 %vm4372_vm6, %v4420_v43  ;;  %v4419_v46 = vpack.c.bf16 %v4415_v42, %v4415_v42 }
 0xdeb   : > { %v4920_v47 = vadd.f32 %v4919_v45, %v4918_v44  ;;  %5871 = vmatprep.mubr.msk.bf16.mxu1 %vm6829_vm2, %v6828_v24  ;;  %5870 = vmatpush3.bf16.msra.mxu1 %v4767_v55 }
 0xdec   : > { %5854 = vmatmul.mubr.msk.bf16.vlgmr.msra.gmra.mrb[44].mxu0 %vm4372_vm6, %v4419_v46  ;;  %5881 = vmatprep.subr.bf16.mxu1 %v6828_v24 }
 0xded   : > { %v4922_v48 = vadd.f32 %v4921_v1, %v4920_v47  ;;  %5865 = vmatprep.mubr.msk.bf16.mxu0 %vm6829_vm2, %v6828_v24  ;;  %5864 = vmatpush3.bf16.msra.mxu0 %v4721_v51 }
 0xdee   : > { %5875 = vmatprep.subr.bf16.mxu0 %v6828_v24 }
 0xdef   : > { %v4923_v3 = vmul.f32 0.25, %v4922_v48  ;;  %v6180_v48 = vld [vmem:[#allocation25] sm:$0xff]  }
 0xdf1   : > { %5137 = vst.msk [vmem:[%s7316_s5] sm:$0xff] %vm4372_vm6, %v4923_v3  ;;  %v6181_v3 = vld [vmem:[#allocation25 + $0x8] sm:$0xff]  }
 0xe9b   : > { %v4574_v59 = vpop.f32.mrb[40].mxu0 }
 0xe9c   : > { %v4709_v29 = vpack.c.bf16 %v4574_v59, %v4574_v59  ;;  %v5843_v61 = vpop.f32.mrb[41].mxu0  ;;  %v5597_v59 = vld [vmem:[%s7971_s3] ss:$0 sm:$0xff] }
 0xe9d   : > { %v4577_v63 = vpop.f32.mrb[42].mxu0  ;;  %v4617_v5 = vpop.f32.mrb[40].mxu1 }
 0xe9e   : > { %v4710_v7 = vpack.c.bf16 %v4617_v5, %v4617_v5  ;;  %v5844_v8 = vpop.f32.mrb[43].mxu0  ;;  %v5849_v9 = vpop.f32.mrb[41].mxu1  ;;  %5866 = vmatmul.mubr.msk.bf16.vlgmr.msra.gmra.mrb[48].mxu0 %vm2293_vm5, %v4709_v29  ;;  %v5598_v29 = vld [vmem:[%s7972_s26] ss:$0 sm:$0xff]  ;;  %v6184_v5 = vld [vmem:[%s7970_s23 + $0x10] sm:$0xff]  }
 0xe9f   : > { %v4620_v11 = vpop.f32.mrb[42].mxu1  ;;  %5876 = vmatpush3.bf16.msra.mxu0 %v4813_v62  ;;  %5877 = vmatprep.mubr.msk.bf16.mxu0 %vm6829_vm2, %v6828_v24  ;;  %v5599_v8 = vld [vmem:[%s7973_s10] ss:$0 sm:$0xff] }
 0xea0   : > { %v5850_v12 = vpop.f32.mrb[43].mxu1  ;;  %5872 = vmatmul.mubr.msk.bf16.vlgmr.msra.gmra.mrb[48].mxu1 %vm2293_vm5, %v4710_v7  ;;  %5887 = vmatprep.subr.bf16.mxu0 %v6828_v24  ;;  %v6185_v7 = vld [vmem:[%s7970_s23 + $0x18] sm:$0xff]  }
 0xea1   : > { %5882 = vmatpush3.bf16.msra.mxu1 %v4859_v10  ;;  %5883 = vmatprep.mubr.msk.bf16.mxu1 %vm6829_vm2, %v6828_v24 }
 0xea2   : > { %5895 = vmatprep.subr.bf16.mxu1 %v6828_v24 }
 0xebd   : > { %v4703_v13 = vpop.f32.mrb[44].mxu1 }
 0xebe   : > { %v4712_v16 = vpack.c.bf16 %v4703_v13, %v4703_v13  ;;  %v5861_v4 = vpop.f32.mrb[45].mxu1 }
 0xebf   : > { %v4660_v17 = vpop.f32.mrb[44].mxu0  ;;  %v4706_v6 = vpop.f32.mrb[46].mxu1 }
 0xec0   : > { %v4711_v19 = vpack.c.bf16 %v4660_v17, %v4660_v17  ;;  %v5855_v20 = vpop.f32.mrb[45].mxu0  ;;  %v5862_v21 = vpop.f32.mrb[47].mxu1  ;;  %5884 = vmatmul.mubr.msk.bf16.vlgmr.msra.gmra.mrb[52].mxu1 %vm2293_vm5, %v4712_v16  ;;  %v5603_v17 = vld [vmem:[%s7974_s11] ss:$0 sm:$0xff] }
 0xec1   : > { %v4663_v22 = vpop.f32.mrb[46].mxu0  ;;  %5903 = vmatprep.mubr.msk.bf16.mxu1 %vm6829_vm2, %v6828_v24 }
 0xec2   : > { %v5856_v23 = vpop.f32.mrb[47].mxu0  ;;  %5878 = vmatmul.mubr.msk.bf16.vlgmr.msra.gmra.mrb[52].mxu0 %vm2293_vm5, %v4711_v19 }
 0xec3   : > { %5891 = vmatprep.mubr.msk.bf16.mxu0 %vm6829_vm2, %v6828_v24  ;;  %5888 = vmatpush3.bf16.msra.mxu0 %v6180_v48 }
 0xec4   : > { %5889 = vmatprep.subr.bf16.mxu0 %v6828_v24 }
 0xec7   : > { %5890 = vmatpush3.bf16.msra.mxu0 %v6181_v3 }
 0xf71   : > { %v4757_v25 = vpop.f32.mrb[48].mxu0 }
 0xf72   : > { %v5867_v27 = vpop.f32.mrb[49].mxu0  ;;  %v4901_v28 = vsel %vm1384_vm3, %v4757_v25, 0.0 }
 0xf73   : > { %v4760_v52 = vpop.f32.mrb[50].mxu0  ;;  %v4803_v18 = vpop.f32.mrb[48].mxu1 }
 0xf74   : > { %v4902_v14 = vsel %vm1384_vm3, %v4803_v18, 0.0  ;;  %v5868_v26 = vpop.f32.mrb[51].mxu0  ;;  %v5873_v50 = vpop.f32.mrb[49].mxu1 }
 0xf75   : > { %v4903_v30 = vadd.f32 %v4902_v14, %v4901_v28  ;;  %v4806_v15 = vpop.f32.mrb[50].mxu1 }
 0xf76   : > { %v5874_v31 = vpop.f32.mrb[51].mxu1  ;;  %v5609_v15 = vld [vmem:[%s7975_s16] ss:$0 sm:$0xff] }
 0xf93   : > { %v4895_v0 = vpop.f32.mrb[52].mxu1 }
 0xf94   : > { %v5885_v32 = vpop.f32.mrb[53].mxu1  ;;  %v4906_v37 = vsel %vm1384_vm3, %v4895_v0, 0.0  ;;  %v5610_v0 = vld [vmem:[%s7976_s2] ss:$0 sm:$0xff] }
 0xf95   : > { %v4849_v33 = vpop.f32.mrb[52].mxu0  ;;  %v4898_v34 = vpop.f32.mrb[54].mxu1 }
 0xf96   : > { %v4904_v56 = vsel %vm1384_vm3, %v4849_v33, 0.0  ;;  %v5879_v35 = vpop.f32.mrb[53].mxu0  ;;  %v5886_v54 = vpop.f32.mrb[55].mxu1 }
 0xf97   : > { %v4905_v57 = vadd.f32 %v4904_v56, %v4903_v30  ;;  %v4852_v36 = vpop.f32.mrb[54].mxu0 }
 0xf98   : > { %v5880_v38 = vpop.f32.mrb[55].mxu0 }
 0xf99   : > { %v4907_v40 = vadd.f32 %v4906_v37, %v4905_v57 }
 0xf9b   : > { %v4915_v41 = vadd.f32 %v5596_v39, %v4907_v40 }
 0xf9d   : > { %v4924_v42 = vadd.f32 %v4915_v41, %v7572_v2  ;;  %v6182_v2 = vld [vmem:[%s7969_s15] sm:$0xff]   ;;  %s7978_s15 = sld [smem:[#allocation60_spill]] (!%p5611_p10) }
 0xf9e   : > { %5896 = vmatpush3.bf16.msra.mxu1 %v6182_v2  ;;  %v5612_v41 = vld [vmem:[%s7977_s4] ss:$0 sm:$0xff] (!%p5611_p10) }
 0xf9f   : > { %v4925_v43 = vsel %vm1384_vm3, %v4924_v42, 0.0  ;;  %5897 = vmatprep.subr.bf16.mxu1 %v6828_v24 }
 0xfa0   : > { %4926 = vadd.xlane.f32.xlu0 %v4925_v43 }
 0xfa2   : > { %5898 = vmatpush3.bf16.msra.mxu1 %v6183_v49 }
 0xfa3   : > { %5899 = vmatprep.subr.bf16.mxu1 %v6828_v24  ;;  %v5613_v43 = vld [vmem:[%s7978_s15] ss:$0 sm:$0xff] (!%p5611_p10) }
 0xfa6   : > { %5900 = vmatpush3.bf16.msra.mxu1 %v6184_v5 }
 0xfa7   : > { %5901 = vmatprep.subr.bf16.mxu1 %v6828_v24 }
 0xfaa   : > { %5902 = vmatpush3.bf16.msra.mxu1 %v6185_v7 }
0x102d   : > { %v4927_v44 = vpop.xlane.xlu0 %4926 }
0x102e   : > { %v4928_v45 = vmul.f32 0.03125, %v4927_v44 }
0x1030   : > { %v4929_v46 = vsub.f32 %v4924_v42, %v4928_v45 }
0x1032   : > { %v4930_v47 = vmul.f32 %v4929_v46, %v4929_v46 }
0x1034   : > { %v4931_v1 = vsel %vm1384_vm3, %v4930_v47, 0.0 }
0x1035   : > { %4932 = vadd.xlane.f32.xlu0 %v4931_v1 }
0x10c2   : > { %v4933_v51 = vpop.xlane.xlu0 %4932 }
0x10c3   : > { %v4934_v53 = vmul.f32 0.03125, %v4933_v51 }
0x10c5   : > { %v4935_v55 = vadd.f32 1e-05, %v4934_v53 }
0x10c7   : > { %6220 = vrsqrt.f32 %v4935_v55 }
0x10d1   : > { %v6221_v58 = vpop.eup %6220 }
0x10d2   : > { %v4937_v60 = vmul.f32 %v6221_v58, %v4929_v46 }
0x10d4   : > { %v4945_v61 = vmul.f32 %v5597_v59, %v4937_v60 }
0x10d6   : > { %v4953_v62 = vadd.f32 %v5598_v29, %v4945_v61 }
0x10d8   : > { %v4954_v63 = vpack.c.bf16 %v4953_v62, %v4953_v62 }
0x10da   : > { %5892 = vmatmul.mubr.msk.bf16.vlgmr.msra.gmra.mrb[56].mxu0 %vm1384_vm3, %v4954_v63 }
0x11ad   : > { %v5015_v9 = vpop.f32.mrb[56].mxu0 }
0x11ae   : > { %v5016_v10 = vadd.f32 %v5599_v8, %v5015_v9  ;;  %v5893_v11 = vpop.f32.mrb[57].mxu0 }
0x11af   : > { %v5018_v12 = vpop.f32.mrb[58].mxu0 }
0x11b0   : > { %v5021_v13 = vmax.f32 %v5016_v10, 0.0  ;;  %v5894_v16 = vpop.f32.mrb[59].mxu0 }
0x11b2   : > { %v5022_v4 = vpack.c.bf16 %v5021_v13, %v5021_v13 }
0x11b4   : > { %5904 = vmatmul.mubr.msk.bf16.vlgmr.msra.gmra.mrb[56].mxu1 %vm5062_vm7, %v5022_v4 }
0x1287   : > { %v5100_v6 = vpop.f32.mrb[56].mxu1 }
0x1288   : > { %v5101_v19 = vadd.f32 %v5603_v17, %v5100_v6  ;;  %v5905_v20 = vpop.f32.mrb[57].mxu1 }
0x1289   : > { %v5103_v21 = vpop.f32.mrb[58].mxu1 }
0x128a   : > { %v5906_v22 = vpop.f32.mrb[59].mxu1  ;;  %v5106_v23 = vadd.f32 %v5101_v19, %v4953_v62 }
0x128c   : > { %v5107_v24 = vsel %vm1384_vm3, %v5106_v23, 0.0 }
0x128d   : > { %5108 = vadd.xlane.f32.xlu1 %v5107_v24 }
0x131a   : > { %v5109_v25 = vpop.xlane.xlu1 %5108 }
0x131b   : > { %v5110_v27 = vmul.f32 0.03125, %v5109_v25 }
0x131d   : > { %v5111_v52 = vsub.f32 %v5106_v23, %v5110_v27 }
0x131f   : > { %v5112_v18 = vmul.f32 %v5111_v52, %v5111_v52 }
0x1321   : > { %v5113_v28 = vsel %vm1384_vm3, %v5112_v18, 0.0 }
0x1322   : > { %5114 = vadd.xlane.f32.xlu0 %v5113_v28 }
0x13af   : > { %v5115_v14 = vpop.xlane.xlu0 %5114 }
0x13b0   : > { %v5116_v26 = vmul.f32 0.03125, %v5115_v14 }
0x13b2   : > { %v5117_v50 = vadd.f32 1e-05, %v5116_v26 }
0x13b4   : > { %6222 = vrsqrt.f32 %v5117_v50 }
0x13be   : > { %v6223_v30 = vpop.eup %6222 }
0x13bf   : > { %v5119_v31 = vmul.f32 %v6223_v30, %v5111_v52  ;;  %5141 = sbr.rel (%p5611_p10) target bundleno = 5375 (0x14ff), region = 208 }
0x13c1   : > { %v5127_v32 = vmul.f32 %v5609_v15, %v5119_v31 }
0x13c3   : > { %v5135_v33 = vadd.f32 %v5610_v0, %v5127_v32 }
0x13c5   : > { %5136 = vst.msk [vmem:[%s7314_s9] sm:$0xff] %vm1384_vm3, %v5135_v33  ;;  %v5142_v34 = vsel (!%p5611_p10), %vm1384_vm3, %v5135_v33, 0.0 }
0x13c6   : > { %5143 = vadd.xlane.f32.xlu0 %v5142_v34 }
0x1453   : > { %v5144_v56 = vpop.xlane.xlu0 %5143 }
0x1454   : > { %v5145_v35 = vmul.f32 0.03125, %v5144_v56 }
0x1456   : > { %v5146_v54 = vsub.f32 %v5135_v33, %v5145_v35 }
0x1458   : > { %v5147_v57 = vmul.f32 %v5146_v54, %v5146_v54 }
0x145a   : > { %v5148_v36 = vsel %vm1384_vm3, %v5147_v57, 0.0 }
0x145b   : > { %5149 = vadd.xlane.f32.xlu0 %v5148_v36 }
0x14e8   : > { %v5150_v37 = vpop.xlane.xlu0 %5149 }
0x14e9   : > { %v5151_v38 = vmul.f32 0.03125, %v5150_v37 }
0x14eb   : > { %v5152_v39 = vadd.f32 1e-05, %v5151_v38 }
0x14ed   : > { %6224 = vrsqrt.f32 %v5152_v39 }
0x14f7   : > { %v6225_v40 = vpop.eup %6224 }
0x14f8   : > { %v5154_v42 = vmul.f32 %v6225_v40, %v5146_v54 }
0x14fa   : > { %v5162_v44 = vmul.f32 %v5612_v41, %v5154_v42 }
0x14fc   : > { %v5170_v45 = vadd.f32 %v5613_v43, %v5162_v44 }
0x14fe   : > { %5171 = vst.msk [vmem:[%s7314_s9] sm:$0xff] %vm1384_vm3, %v5170_v45 }
0x14ff PF: > { %s7979_s0 = sld [smem:[#allocation61_spill]]  ;;  %s7981_s26 = sld [smem:[#allocation69_spill]] }
0x1500   : > { %s5616_s10 = sshll.u32 %s6764_s7, 7  ;;  %s5191_s16 = sshll.u32 %s7314_s9, 4  ;;  %s5192_s16 = int_to_ptr.vmem [resolvable:$true] %s5191_s16 }
0x1501   : > { %s5173_s2 = scalar_lea.sflag [#allocation6], %s7307_s28  ;;  %s6618_s4 = scalar_lea.vmem %s5192_s16, 128 }
0x1502   : > { %p6619_p13 = scmp.ne.s32.totalorder %s5192_s16, %s6618_s4  ;;  %s6836_s15 = smov [#allocation27]  }
0x1503   : > { %s6622_s6 = sshll.u32 %s6836_s15, 4  ;;  %s6623_s6 = int_to_ptr.vmem [resolvable:$false] %s6622_s6 }
0x1504   : > { %s6624_s8 = scalar_lea.vmem %s6623_s6, 256  ;;  %p6625_p6 = scmp.lt.s32.totalorder %s5192_s16, %s6623_s6 }
0x1505   : > { %s7980_s3 = smov %s7979_s0  ;;  %s7819_s11 = scalar_lea.hbm %s7979_s0, %s5616_s10 }
0x1506   : > { %p7982_p1 = scmp.ne.s32.totalorder %s7981_s26, 0  ;;  %p6626_p7 = scmp.lt.s32.totalorder %s6624_s8, %s6618_s4 }
0x1508   : > { %p6620_p4 = pnand %p6619_p13, %p7982_p1  ;;  %p6627_p8 = por %p6626_p7, %p6625_p6 }
0x150a   : > { %p6621_p5 = pneg %p6620_p4 }
0x150c   : > { %p6628_p11 = pnand %p6627_p8, %p6621_p5 }
0x150e   : > { %6631 = shalt.err (!%p6628_p11)
}
0x150f   : > { %s6632_s9 = scalar_lea.hbm %s7819_s11, 128  ;;  %s6636_s0 = scalar_lea.hbm %s7980_s3, 256 }
0x1510   : > { %p6633_p12 = scmp.ne.s32.totalorder %s7819_s11, %s6632_s9  ;;  %p6637_p0 = scmp.lt.u32.totalorder %s7819_s11, %s7980_s3 }
0x1511   : > { %p6638_p2 = scmp.lt.u32.totalorder %s6636_s0, %s6632_s9  ;;  %p6640_p13 = scmp.lt.u32.totalorder %s6632_s9, %s7819_s11 }
0x1512   : > { %p6634_p3 = pnand %p6633_p12, %p7982_p1 }
0x1513   : > { %p6639_p10 = por %p6638_p2, %p6637_p0 }
0x1514   : > { %p6635_p9 = pneg %p6634_p3 }
0x1515   : > { %p6641_p4 = por %p6640_p13, %p6639_p10 }
0x1517   : > { %p6642_p5 = pnand %p6641_p4, %p6635_p9 }
0x1519   : > { %6645 = shalt.err (!%p6642_p5)
}
0x151a   : > { %s7983_s8 = sld [smem:[#allocation62_spill]]  ;;  %s5204_s4 = sshll.u32 %s7316_s5, 4  ;;  %s5205_s4 = int_to_ptr.vmem [resolvable:$true] %s5204_s4 }
0x151b   : > { %5963 = dma.vmem_to_hbm [thread:$0]  (%p7982_p1), %s5192_s16, 128, %s7819_s11, %s5173_s2  }
0x151c   : > { %s5178_s15 = scalar_lea.sflag [#allocation29], %s7307_s28  ;;  %s6646_s0 = scalar_lea.vmem %s5205_s4, 128 }
0x151d   : > { %p6647_p6 = scmp.ne.s32.totalorder %s5205_s4, %s6646_s0  ;;  %s6837_s9 = smov [#allocation28]  }
0x151e   : > { %s6650_s3 = sshll.u32 %s6837_s9, 4  ;;  %s6651_s3 = int_to_ptr.vmem [resolvable:$false] %s6650_s3 }
0x151f   : > { %p6648_p7 = pnand %p6647_p6, %p7982_p1  ;;  %s6652_s12 = scalar_lea.vmem %s6651_s3, 256 }
0x1520   : > { %s7839_s6 = scalar_lea.hbm %s7983_s8, %s5616_s10  ;;  %p6653_p11 = scmp.lt.s32.totalorder %s5205_s4, %s6651_s3 }
0x1521   : > { %p6649_p8 = pneg %p6648_p7  ;;  %p6654_p12 = scmp.lt.s32.totalorder %s6652_s12, %s6646_s0 }
0x1523   : > { %p6655_p3 = por %p6654_p12, %p6653_p11 }
0x1525   : > { %p6656_p9 = pnand %p6655_p3, %p6649_p8 }
0x1527   : > { %6659 = shalt.err (!%p6656_p9)
}
0x1528   : > { %s6660_s7 = scalar_lea.hbm %s7839_s6, 128  ;;  %s6664_s28 = scalar_lea.hbm %s7983_s8, 256 }
0x1529   : > { %p6661_p0 = scmp.ne.s32.totalorder %s7839_s6, %s6660_s7  ;;  %p6665_p13 = scmp.lt.u32.totalorder %s7839_s6, %s7983_s8 }
0x152a   : > { %p6666_p4 = scmp.lt.u32.totalorder %s6664_s28, %s6660_s7  ;;  %p6668_p6 = scmp.lt.u32.totalorder %s6660_s7, %s7839_s6 }
0x152b   : > { %p6662_p2 = pnand %p6661_p0, %p7982_p1 }
0x152c   : > { %p6667_p5 = por %p6666_p4, %p6665_p13 }
0x152d   : > { %p6663_p10 = pneg %p6662_p2 }
0x152e   : > { %p6669_p7 = por %p6668_p6, %p6667_p5 }
0x1530   : > { %p6670_p8 = pnand %p6669_p7, %p6663_p10 }
0x1532   : > { %6673 = shalt.err (!%p6670_p8)
}
0x1533   : > { %5964 = dma.vmem_to_hbm [thread:$0]  (%p7982_p1), %s5205_s4, 128, %s7839_s6, %s5178_s15  }
0x1534 PF: > { %s7984_s12 = sld [smem:[#allocation67_spill]]  ;;  %s7985_s5 = sld [smem:[#allocation63_spill]] }
0x1535   : > { %s7986_s3 = sld [smem:[#allocation71_spill]] }
0x153a   : > { %p6045_p11 = scmp.ge.s32.totalorder %s7984_s12, 2  ;;  %s5216_s10 = sand.u32 1, %s7985_s5  }
0x153b   : > { %p7987_p12 = scmp.ne.s32.totalorder %s7986_s3, 0  ;;  %s5217_s11 = scalar_lea.sflag [#allocation6], %s5216_s10 }
0x153d   : > { %p6011_p3 = pnand %p6045_p11, %p7987_p12 }
0x153f   : > { %6739 = dma.done.wait (!%p6011_p3), %s5217_s11, 128  }
0x1540   : > { %6741 = vsyncadd (!%p6011_p3), %s5217_s11, 4294967168  ;;  %s5226_s16 = scalar_lea.sflag [#allocation29], %s5216_s10 }
0x1541   : > { %6743 = dma.done.wait (!%p6011_p3), %s5226_s16, 128  }
0x1542   : > { %6745 = vsyncadd (!%p6011_p3), %s5226_s16, 4294967168  ;;  %s90_s15 = sadd.s32 1, %s7984_s12   ;;  %s7988_s26 = sld [smem:[#allocation64_spill]] }
0x1543   : > { %p87_p9 = scmp.ge.s32.totalorder %s90_s15, 6   ;;  %s7989_s2 = sld [smem:[#allocation72_spill]] }
0x1544   : > { %s7990_s0 = sld [smem:[#allocation65_spill]]  ;;  %s7991_s7 = sld [smem:[#allocation66_spill]] }
0x1545   : > { %s7992_s10 = sld [smem:[#allocation68_spill]]  ;;  %s7993_s11 = sld [smem:[#allocation70_spill]] }
0x1546   : > { %s7994_s28 = smov %s6752_s1  ;;  %89 = sbr.rel (!%p87_p9) target bundleno = 74 (0x4a), region = 296 }
0x1548   : > { %s7995_s1 = smov %s7988_s26 }
0x154d   :  { %5231 = vsyncpa [#allocation5], 1 }
0x154e   :  { %5233 = vsyncpa [#allocation5 + $0x1], 1 }
0x154f   :  { %5234 = vsyncpa [#allocation8], 1 }
0x1550   :  { %5235 = vsyncpa [#allocation11], 1 }
0x1551   :  { %5236 = vsyncpa [#allocation14], 1 }
0x1552   :  { %5237 = vsyncpa [#allocation17], 1 }
0x1553   :  { %5238 = vsyncpa [#allocation20], 1 }
0x1554   :  { %5239 = vsyncpa [#allocation23], 1 }
0x1555   :  { %5240 = vsyncpa [#allocation26], 1 }
0x1556   :  { %5241 = vsyncpa [#allocation6], 1 }
0x1557   :  { %5243 = vsyncpa [#allocation6 + $0x1], 1 }
0x1558   :  { %5244 = vsyncpa [#allocation29], 1 }
0x1559   :  { %5246 = vsyncpa [#allocation29 + $0x1], 1 }

</bundles_post_ra>
